<compile_context>
chip_gen: v5e
topology: v5e:2x2
jax: 0.10.0
libtpu: 0.0.40
codegen_flags: <defaults>
</compile_context>

<pallas_src>
import functools

import jax
import jax.numpy as jnp
from jax.experimental import pallas as pl
from jax.experimental.pallas import tpu as pltpu


LANES = 128                    # vreg lane width: last dim of every block
SUBLANES = 8                   # f32 sublane tile
ACC_ROWS = 64                  # accumulator height per split (breaks add chain)
MAX_BLOCK_ROWS = 8192          # 8192 x 128 x 4 B = 4 MiB per input block
FAST_PATH_ELEMS = 64 * 1024    # below this, plain JAX is faster than a launch
VMEM_LIMIT_BYTES = 40 * 1024 * 1024


def _round_up(x, m):
    return ((x + m - 1) // m) * m


def _round_down(x, m):
    return (x // m) * m


def _num_core_splits():
    """2 on multi-TensorCore chips (v7x-class), else 1."""
    try:
        kind = jax.devices()[0].device_kind.lower()
    except Exception:
        return 1
    return 2 if ("v7" in kind or "7x" in kind) else 1


def _sse_kernel(x_ref, t_ref, acc_ref, *, block_rows, steps_per_split,
                total_rows, needs_edge_mask):
    """Per-(split, step) partial sum of squared differences.

    acc_ref is the (ACC_ROWS, 128) f32 output block for this split; it stays
    resident across the "arbitrary" reduction axis and is written back to HBM
    once per split.  The final cross-lane reduce happens in the JAX wrapper.
    """
    c = pl.program_id(0)     # core split (both TensorCores on v7x)
    j = pl.program_id(1)     # reduction steps for this split ("arbitrary")

    @pl.when(j == 0)
    def _():
        acc_ref[...] = jnp.zeros_like(acc_ref)

    def accumulate(d):
        sq = d * d
        # Fold (block_rows, 128) down to (ACC_ROWS, 128) with plain vector
        # adds: block_rows // ACC_ROWS independent terms per accumulator slot,
        # 8 independent vreg chains -> VALU stays throughput-bound.
        acc_ref[...] += sq.reshape(-1, ACC_ROWS, LANES).sum(axis=0)

    if not needs_edge_mask:
        d = x_ref[...].astype(jnp.float32) - t_ref[...].astype(jnp.float32)
        accumulate(d)
    else:
        lb = c * steps_per_split + j                    # logical block index
        is_edge = (lb + 1) * block_rows > total_rows    # overhangs the array?

        @pl.when(jnp.logical_not(is_edge))
        def _():
            # Steady-state blocks: pure sub/mul/add, no mask cost.
            d = x_ref[...].astype(jnp.float32) - t_ref[...].astype(jnp.float32)
            accumulate(d)

        @pl.when(is_edge)
        def _():
            # Only the ragged edge (or a fully out-of-range safety-clamped
            # duplicate) block pays for iota + compare + select.
            row_ids = lb * block_rows + jax.lax.broadcasted_iota(
                jnp.int32, (block_rows, 1), 0)
            d = x_ref[...].astype(jnp.float32) - t_ref[...].astype(jnp.float32)
            # Mask BEFORE squaring so garbage (possibly NaN/Inf) overhang rows
            # cannot propagate into the accumulator.
            d = jnp.where(row_ids < total_rows, d, jnp.float32(0.0))
            accumulate(d)


def content_loss(x, target):
    """Returns (input, loss) matching ContentLoss.forward semantics.

    loss == mean((x - target)**2) in fp32; x is passed through unchanged.
    """
    assert x.shape == target.shape, "input and target must have the same shape"
    numel = x.size
    if numel == 0:
        return x, jnp.float32(0.0)

    # Small-input fast path: kernel launch + pipeline overhead would dominate.
    if numel < FAST_PATH_ELEMS:
        d = x.astype(jnp.float32) - target.astype(jnp.float32)
        return x, jnp.mean(d * d)

    flat_x = x.reshape(-1)
    flat_t = target.reshape(-1)

    # Full (8-sublane-aligned) 128-lane rows go through the kernel; the short
    # tail (< 8*128 + 128 elements) is summed in plain JAX.  This avoids a
    # jnp.pad round-trip of both operands through HBM.  For conv feature maps
    # (numel a multiple of 1024) the tail is empty and the 2-D reshape below
    # is a free bitcast — no extra copies at all.
    rows = _round_down(numel // LANES, SUBLANES)
    n_body = rows * LANES
    if n_body != numel:
        body_x = flat_x[:n_body]
        body_t = flat_t[:n_body]
        td = flat_x[n_body:].astype(jnp.float32) - flat_t[n_body:].astype(jnp.float32)
        tail_sse = jnp.sum(td * td)
    else:
        body_x, body_t = flat_x, flat_t
        tail_sse = jnp.float32(0.0)

    x2d = body_x.reshape(rows, LANES)
    t2d = body_t.reshape(rows, LANES)

    splits = _num_core_splits()

    # Pick the number of logical blocks as an exact multiple of `splits`, then
    # size blocks (multiple of ACC_ROWS) to cover `rows` with no duplicate /
    # fully-empty block per split and at most one ragged edge block.
    nb = max(splits, _round_up(pl.cdiv(rows, MAX_BLOCK_ROWS), splits))
    block_rows = min(MAX_BLOCK_ROWS, _round_up(pl.cdiv(rows, nb), ACC_ROWS))
    steps_per_split = nb // splits

    nb_valid = pl.cdiv(rows, block_rows)        # blocks that touch real rows
    needs_clamp = nb_valid < nb                 # pathological huge-input case
    needs_edge_mask = needs_clamp or (rows % block_rows != 0)
    last_valid = nb_valid - 1

    if needs_clamp:
        # Safety net only: keeps every DMA inside the array; the kernel fully
        # masks the duplicate block's contribution.
        def in_index_map(c, j):
            return (jnp.minimum(c * steps_per_split + j, last_valid), 0)
    else:
        def in_index_map(c, j):
            return (c * steps_per_split + j, 0)

    kernel = functools.partial(
        _sse_kernel,
        block_rows=block_rows,
        steps_per_split=steps_per_split,
        total_rows=rows,
        needs_edge_mask=needs_edge_mask,
    )

    core_sem = pltpu.CORE_PARALLEL if splits > 1 else pltpu.ARBITRARY

    partial_sums = pl.pallas_call(
        kernel,
        out_shape=jax.ShapeDtypeStruct((splits * ACC_ROWS, LANES), jnp.float32),
        grid_spec=pltpu.PrefetchScalarGridSpec(
            num_scalar_prefetch=0,
            grid=(splits, steps_per_split),
            in_specs=[
                pl.BlockSpec((block_rows, LANES), in_index_map),
                pl.BlockSpec((block_rows, LANES), in_index_map),
            ],
            out_specs=pl.BlockSpec((ACC_ROWS, LANES), lambda c, j: (c, 0)),
        ),
        compiler_params=pltpu.CompilerParams(
            dimension_semantics=(core_sem, pltpu.ARBITRARY),
            vmem_limit_bytes=VMEM_LIMIT_BYTES,
        ),
    )(x2d, t2d)

    # Final (tiny) cross-lane reduce + mean in plain JAX.
    loss = (jnp.sum(partial_sums) + tail_sse) / jnp.float32(numel)
    return x, loss


if __name__ == "__main__":
    key = jax.random.PRNGKey(0)
    k1, k2 = jax.random.split(key)

    # Small NCHW feature map (as produced by the conv stack that feeds
    # ContentLoss in neural_style.py); this hits the small-input fast path.
    x = jax.random.normal(k1, (2, 4, 16, 16), dtype=jnp.float32)
    target = jax.random.normal(k2, (2, 4, 16, 16), dtype=jnp.float32)

    out, loss = content_loss(x, target)
    out = jax.block_until_ready(out)
    loss = jax.block_until_ready(loss)

    ref_loss = jnp.mean((x - target) ** 2)
    assert jnp.allclose(loss, ref_loss, rtol=1e-6, atol=1e-6), (loss, ref_loss)
    assert jnp.array_equal(out, x)

    # Kernel-path cases: exact single-block tiling, ragged lane/row tails, and
    # multi-step accumulation at a realistic feature-map size.
    cases = [
        ((1, 64, 64, 64), 1e-6),    # 262144 elems: exact tiling, no mask
        ((1, 3, 200, 200), 1e-5),   # 120000 elems: ragged tail + edge mask
        ((1, 64, 136, 136), 5e-5),  # 1.18M elems: multi-block accumulation
    ]
    for idx, (shape, tol) in enumerate(cases):
        ka, kb = jax.random.split(jax.random.fold_in(key, idx + 1))
        a = jax.random.normal(ka, shape, dtype=jnp.float32)
        b = jax.random.normal(kb, shape, dtype=jnp.float32)
        o, l = content_loss(a, b)
        l = jax.block_until_ready(l)
        r = jnp.mean((a - b) ** 2)
        assert jnp.allclose(l, r, rtol=tol, atol=tol), (shape, l, r)
        assert o.shape == a.shape

    print("KERNEL_OK")
</pallas_src>

<mosaic_0001>
module attributes {stable_mosaic.version = 11 : i64} {
  func.func @_sse_kernel(%arg0: i32, %arg1: i32, %arg2: memref<2048x128xf32, #tpu.memory_space<vmem>>, %arg3: memref<2048x128xf32, #tpu.memory_space<vmem>>, %arg4: memref<64x128xf32, #tpu.memory_space<vmem>>) attributes {dimension_semantics = [#tpu.dimension_semantics<arbitrary>, #tpu.dimension_semantics<arbitrary>], iteration_bounds = array<i64: 1, 1>, scalar_prefetch = 0 : i64, scratch_operands = 0 : i64, tpu.core_type = #tpu.core_type<tc>, window_params = [{transform_indices = @transform_0, window_bounds = array<i64: 2048, 128>}, {transform_indices = @transform_1, window_bounds = array<i64: 2048, 128>}, {transform_indices = @transform_2, window_bounds = array<i64: 64, 128>}]} {
    %c0_i32 = arith.constant 0 : i32
    %0 = arith.cmpi eq, %arg1, %c0_i32 : i32
    %1 = arith.extui %0 : i1 to i32
    %c0_i32_0 = arith.constant 0 : i32
    %2 = arith.cmpi ne, %1, %c0_i32_0 : i32
    scf.if %2 {
      %cst_8 = arith.constant 0.000000e+00 : f32
      %12 = vector.broadcast %cst_8 : f32 to vector<64x128xf32>
      %c0_9 = arith.constant 0 : index
      %c0_10 = arith.constant 0 : index
      %13 = vector.load %arg4[%c0_9, %c0_10] : memref<64x128xf32, #tpu.memory_space<vmem>>, vector<64x128xf32>
      tpu.vector_store %arg4[%c0_9, %c0_10], %12 {strides = array<i32>} : memref<64x128xf32, #tpu.memory_space<vmem>>, vector<64x128xf32>,
    } else {
    }
    %c0 = arith.constant 0 : index
    %c0_1 = arith.constant 0 : index
    %3 = vector.load %arg2[%c0, %c0_1] : memref<2048x128xf32, #tpu.memory_space<vmem>>, vector<2048x128xf32>
    %c0_2 = arith.constant 0 : index
    %c0_3 = arith.constant 0 : index
    %4 = vector.load %arg3[%c0_2, %c0_3] : memref<2048x128xf32, #tpu.memory_space<vmem>>, vector<2048x128xf32>
    %5 = arith.subf %3, %4 : vector<2048x128xf32>
    %6 = arith.mulf %5, %5 : vector<2048x128xf32>
    %c0_4 = arith.constant 0 : index
    %c0_5 = arith.constant 0 : index
    %7 = vector.load %arg4[%c0_4, %c0_5] : memref<64x128xf32, #tpu.memory_space<vmem>>, vector<64x128xf32>
    %8 = vector.shape_cast %6 : vector<2048x128xf32> to vector<32x64x128xf32>
    %cst = arith.constant dense<0.000000e+00> : vector<64x128xf32>
    %9 = vector.multi_reduction <add>, %8, %cst [0] : vector<32x64x128xf32> to vector<64x128xf32>
    %10 = arith.addf %7, %9 : vector<64x128xf32>
    %c0_6 = arith.constant 0 : index
    %c0_7 = arith.constant 0 : index
    %11 = vector.load %arg4[%c0_6, %c0_7] : memref<64x128xf32, #tpu.memory_space<vmem>>, vector<64x128xf32>
    tpu.vector_store %arg4[%c0_6, %c0_7], %10 {strides = array<i32>} : memref<64x128xf32, #tpu.memory_space<vmem>>, vector<64x128xf32>,
    return
  }
  func.func @transform_0(%arg0: i32, %arg1: i32) -> (i32, i32) {
    %c1_i32 = arith.constant 1 : i32
    %0 = arith.muli %arg0, %c1_i32 : i32
    %1 = arith.addi %0, %arg1 : i32
    %c0_i32 = arith.constant 0 : i32
    %c0_i32_0 = arith.constant 0 : i32
    return %1, %c0_i32 : i32, i32
  }
  func.func @transform_1(%arg0: i32, %arg1: i32) -> (i32, i32) {
    %c1_i32 = arith.constant 1 : i32
    %0 = arith.muli %arg0, %c1_i32 : i32
    %1 = arith.addi %0, %arg1 : i32
    %c0_i32 = arith.constant 0 : i32
    %c0_i32_0 = arith.constant 0 : i32
    return %1, %c0_i32 : i32, i32
  }
  func.func @transform_2(%arg0: i32, %arg1: i32) -> (i32, i32) {
    %c0_i32 = arith.constant 0 : i32
    %c0_i32_0 = arith.constant 0 : i32
    return %arg0, %c0_i32 : i32, i32
  }
}

</mosaic_0001>

<bundles_post_ra>
// kernel: tpu_custom_call.1
= control target key start
LH: loop header
LB: loop body
LE: loop exit
PB: predicated region body
PF: predicated region fallthrough
CT: control target
= control target key end

     0   :  { %7 = vsyncpa [#allocation3], 0  ;;  %s3270_s0 = inlined_call_operand.hbm [shape: f32[2048,128], index: 0, kind: input, shape index: {}]   ;;  %s3271_s1 = inlined_call_operand.hbm [shape: f32[2048,128], index: 1, kind: input, shape index: {}]   ;;  %s3272_s2 = inlined_call_operand.hbm [shape: f32[64,128], index: 2, kind: output, shape index: {}]  }
   0x1   :  { %8 = vsyncpa [#allocation6], 0 }
   0x2   :  { %9 = vsyncpa [#allocation4], 0  ;;  %s18_s11 = sshll.u32 %s3270_s0, 4  ;;  %s1468_s12 = smov [#allocation2]   ;;  %s19_s11 = int_to_ptr.hbm [resolvable:$true] %s18_s11 }
   0x3   :  { %s20_s13 = sshll.u32 %s1468_s12, 4  ;;  %s35_s16 = sshll.u32 %s3271_s1, 4  ;;  %s21_s13 = int_to_ptr.vmem [resolvable:$true] %s20_s13  ;;  %s36_s16 = int_to_ptr.hbm [resolvable:$true] %s35_s16 }
   0x4   :  { %s1469_s17 = smov 128   ;;  %s1470_s18 = smov 8  }
   0x5   :  { %26 = dma.hbm_to_vmem [thread:$0]  %s19_s11, 32768, %s21_s13, [#allocation3], %s1469_s17, %s1469_s17, %s1470_s18  }
   0x6   :  { %s1471_s19 = smov [#allocation5]  }
   0x7   :  { %s37_s20 = sshll.u32 %s1471_s19, 4  ;;  %s38_s20 = int_to_ptr.vmem [resolvable:$true] %s37_s20 }
   0x8   :  { %43 = dma.hbm_to_vmem [thread:$0]  %s36_s16, 32768, %s38_s20, [#allocation6], %s1469_s17, %s1469_s17, %s1470_s18  }
   0x9   :  { %1462 = dma.done.wait [#allocation3], 32768  }
   0xa   :  { %1463 = vsyncadd [#allocation3], 4294934528 }
   0xb   :  { %1464 = dma.done.wait [#allocation6], 32768  }
   0xc   :  { %1465 = vsyncadd [#allocation6], 4294934528  ;;  %v68_v0 = vld [vmem:[#allocation2] sm:$0xff]  ;;  %v69_v1 = vld [vmem:[#allocation2 + $0x8] sm:$0xff]  ;;  %s1472_s0 = smov [#allocation7]   ;;  %s1370_s23 = sshll.u32 %s3272_s2, 4  ;;  %s1371_s23 = int_to_ptr.hbm [resolvable:$true] %s1370_s23 }
   0xd   :  { %v70_v2 = vld [vmem:[#allocation2 + $0x10] sm:$0xff]  ;;  %v71_v3 = vld [vmem:[#allocation2 + $0x18] sm:$0xff]  ;;  %v72_v4 = vld [vmem:[#allocation2 + $0x20] sm:$0xff]  ;;  %s1368_s1 = sshll.u32 %s1472_s0, 4  ;;  %s1369_s1 = int_to_ptr.vmem [resolvable:$true] %s1368_s1 }
   0xe   :  { %v73_v5 = vld [vmem:[#allocation2 + $0x28] sm:$0xff]  ;;  %v74_v6 = vld [vmem:[#allocation2 + $0x30] sm:$0xff]  ;;  %v75_v7 = vld [vmem:[#allocation2 + $0x38] sm:$0xff] }
   0xf   :  { %v76_v8 = vld [vmem:[#allocation2 + $0x40] sm:$0xff]  ;;  %v77_v9 = vld [vmem:[#allocation2 + $0x48] sm:$0xff]  ;;  %v78_v10 = vld [vmem:[#allocation2 + $0x50] sm:$0xff] }
  0x10   :  { %v79_v11 = vld [vmem:[#allocation2 + $0x58] sm:$0xff]  ;;  %v80_v12 = vld [vmem:[#allocation2 + $0x60] sm:$0xff]  ;;  %v81_v13 = vld [vmem:[#allocation2 + $0x68] sm:$0xff] }
  0x11   :  { %v324_v14 = vld [vmem:[#allocation5] sm:$0xff]  ;;  %v325_v15 = vld [vmem:[#allocation5 + $0x8] sm:$0xff]  ;;  %v82_v16 = vld [vmem:[#allocation2 + $0x70] sm:$0xff] }
  0x12   :  { %v83_v17 = vld [vmem:[#allocation2 + $0x78] sm:$0xff]  ;;  %v84_v18 = vld [vmem:[#allocation2 + $0x80] sm:$0xff]  ;;  %v326_v19 = vld [vmem:[#allocation5 + $0x10] sm:$0xff]  ;;  %v580_v22 = vsub.f32 %v68_v0, %v324_v14  ;;  %v581_v23 = vsub.f32 %v69_v1, %v325_v15 }
  0x13   :  { %v327_v20 = vld [vmem:[#allocation5 + $0x18] sm:$0xff]  ;;  %v328_v21 = vld [vmem:[#allocation5 + $0x20] sm:$0xff]  ;;  %v85_v24 = vld [vmem:[#allocation2 + $0x88] sm:$0xff]  ;;  %v582_v30 = vsub.f32 %v70_v2, %v326_v19 }
  0x14   :  { %v86_v25 = vld [vmem:[#allocation2 + $0x90] sm:$0xff]  ;;  %v87_v26 = vld [vmem:[#allocation2 + $0x98] sm:$0xff]  ;;  %v329_v27 = vld [vmem:[#allocation5 + $0x28] sm:$0xff]  ;;  %v583_v31 = vsub.f32 %v71_v3, %v327_v20  ;;  %v584_v32 = vsub.f32 %v72_v4, %v328_v21  ;;  %v1502_v42 = vmul.f32 %v580_v22, %v580_v22  ;;  %v1510_v52 = vmul.f32 %v581_v23, %v581_v23 }
  0x15   :  { %v330_v28 = vld [vmem:[#allocation5 + $0x30] sm:$0xff]  ;;  %v331_v29 = vld [vmem:[#allocation5 + $0x38] sm:$0xff]  ;;  %v88_v33 = vld [vmem:[#allocation2 + $0xa0] sm:$0xff]  ;;  %v585_v39 = vsub.f32 %v73_v5, %v329_v27  ;;  %v1518_v62 = vmul.f32 %v582_v30, %v582_v30 }
  0x16   :  { %v89_v34 = vld [vmem:[#allocation2 + $0xa8] sm:$0xff]  ;;  %v90_v35 = vld [vmem:[#allocation2 + $0xb0] sm:$0xff]  ;;  %v332_v36 = vld [vmem:[#allocation5 + $0x40] sm:$0xff]  ;;  %v586_v40 = vsub.f32 %v74_v6, %v330_v28  ;;  %v1500_v41 = vsub.f32 %v75_v7, %v331_v29  ;;  %3273 = vst [vmem:[#allocation11_spill] sm:$0xff] %v1502_v42 }
  0x17   :  { %v333_v37 = vld [vmem:[#allocation5 + $0x48] sm:$0xff]  ;;  %v334_v38 = vld [vmem:[#allocation5 + $0x50] sm:$0xff]  ;;  %v91_v43 = vld [vmem:[#allocation2 + $0xb8] sm:$0xff]  ;;  %v1504_v49 = vsub.f32 %v76_v8, %v332_v36  ;;  %3274 = vst [vmem:[#allocation12_spill] sm:$0xff] %v1510_v52  ;;  %v1526_v8 = vmul.f32 %v583_v31, %v583_v31 }
  0x18   :  { %v92_v44 = vld [vmem:[#allocation2 + $0xc0] sm:$0xff]  ;;  %v93_v45 = vld [vmem:[#allocation2 + $0xc8] sm:$0xff]  ;;  %v335_v46 = vld [vmem:[#allocation5 + $0x58] sm:$0xff]  ;;  %v1506_v50 = vsub.f32 %v77_v9, %v333_v37  ;;  %v1508_v51 = vsub.f32 %v78_v10, %v334_v38  ;;  %3275 = vst [vmem:[#allocation13_spill] sm:$0xff] %v1518_v62 }
  0x19   :  { %v336_v47 = vld [vmem:[#allocation5 + $0x60] sm:$0xff]  ;;  %v337_v48 = vld [vmem:[#allocation5 + $0x68] sm:$0xff]  ;;  %v94_v53 = vld [vmem:[#allocation2 + $0xd0] sm:$0xff]  ;;  %v1512_v59 = vsub.f32 %v79_v11, %v335_v46  ;;  %3276 = vst [vmem:[#allocation14_spill] sm:$0xff] %v1526_v8 }
  0x1a   :  { %v95_v54 = vld [vmem:[#allocation2 + $0xd8] sm:$0xff]  ;;  %v96_v55 = vld [vmem:[#allocation2 + $0xe0] sm:$0xff]  ;;  %v338_v56 = vld [vmem:[#allocation5 + $0x70] sm:$0xff]  ;;  %v1514_v60 = vsub.f32 %v80_v12, %v336_v47  ;;  %v1516_v61 = vsub.f32 %v81_v13, %v337_v48 }
  0x1b   :  { %v339_v57 = vld [vmem:[#allocation5 + $0x78] sm:$0xff]  ;;  %v340_v58 = vld [vmem:[#allocation5 + $0x80] sm:$0xff]  ;;  %v97_v63 = vld [vmem:[#allocation2 + $0xe8] sm:$0xff]  ;;  %v1520_v5 = vsub.f32 %v82_v16, %v338_v56  ;;  %v1534_v16 = vmul.f32 %v584_v32, %v584_v32 }
  0x1c   :  { %v98_v0 = vld [vmem:[#allocation2 + $0xf0] sm:$0xff]  ;;  %v99_v1 = vld [vmem:[#allocation2 + $0xf8] sm:$0xff]  ;;  %v341_v2 = vld [vmem:[#allocation5 + $0x88] sm:$0xff]  ;;  %v1522_v6 = vsub.f32 %v83_v17, %v339_v57  ;;  %v1524_v7 = vsub.f32 %v84_v18, %v340_v58 }
  0x1d   :  { %v342_v3 = vld [vmem:[#allocation5 + $0x90] sm:$0xff]  ;;  %v343_v4 = vld [vmem:[#allocation5 + $0x98] sm:$0xff]  ;;  %v100_v9 = vld [vmem:[#allocation2 + $0x100] sm:$0xff]  ;;  %v1528_v15 = vsub.f32 %v85_v24, %v341_v2  ;;  %3277 = vst [vmem:[#allocation15_spill] sm:$0xff] %v1534_v16  ;;  %v1542_v24 = vmul.f32 %v585_v39, %v585_v39 }
  0x1e   :  { %v101_v10 = vld [vmem:[#allocation2 + $0x108] sm:$0xff]  ;;  %v102_v11 = vld [vmem:[#allocation2 + $0x110] sm:$0xff]  ;;  %v344_v12 = vld [vmem:[#allocation5 + $0xa0] sm:$0xff]  ;;  %v1530_v19 = vsub.f32 %v86_v25, %v342_v3  ;;  %v1532_v20 = vsub.f32 %v87_v26, %v343_v4 }
  0x1f   :  { %v345_v13 = vld [vmem:[#allocation5 + $0xa8] sm:$0xff]  ;;  %v346_v14 = vld [vmem:[#allocation5 + $0xb0] sm:$0xff]  ;;  %v103_v17 = vld [vmem:[#allocation2 + $0x118] sm:$0xff]  ;;  %v1536_v28 = vsub.f32 %v88_v33, %v344_v12  ;;  %3278 = vst [vmem:[#allocation16_spill] sm:$0xff] %v1542_v24  ;;  %v1550_v33 = vmul.f32 %v586_v40, %v586_v40 }
  0x20   :  { %v104_v21 = vld [vmem:[#allocation2 + $0x120] sm:$0xff]  ;;  %v105_v18 = vld [vmem:[#allocation2 + $0x128] sm:$0xff]  ;;  %v347_v22 = vld [vmem:[#allocation5 + $0xb8] sm:$0xff]  ;;  %v1538_v29 = vsub.f32 %v89_v34, %v345_v13  ;;  %v1540_v30 = vsub.f32 %v90_v35, %v346_v14 }
  0x21   :  { %v348_v23 = vld [vmem:[#allocation5 + $0xc0] sm:$0xff]  ;;  %v349_v27 = vld [vmem:[#allocation5 + $0xc8] sm:$0xff]  ;;  %v106_v25 = vld [vmem:[#allocation2 + $0x130] sm:$0xff]  ;;  %v1544_v38 = vsub.f32 %v91_v43, %v347_v22  ;;  %3279 = vst [vmem:[#allocation17_spill] sm:$0xff] %v1550_v33  ;;  %v1560_v43 = vmul.f32 %v1500_v41, %v1500_v41 }
  0x22   :  { %v107_v31 = vld [vmem:[#allocation2 + $0x138] sm:$0xff]  ;;  %v108_v26 = vld [vmem:[#allocation2 + $0x140] sm:$0xff]  ;;  %v350_v36 = vld [vmem:[#allocation5 + $0xd0] sm:$0xff]  ;;  %v1546_v46 = vsub.f32 %v92_v44, %v348_v23  ;;  %v1548_v47 = vsub.f32 %v93_v45, %v349_v27 }
  0x23   :  { %v351_v32 = vld [vmem:[#allocation5 + $0xd8] sm:$0xff]  ;;  %v352_v37 = vld [vmem:[#allocation5 + $0xe0] sm:$0xff]  ;;  %v109_v34 = vld [vmem:[#allocation2 + $0x148] sm:$0xff]  ;;  %v1552_v58 = vsub.f32 %v94_v53, %v350_v36  ;;  %3280 = vst [vmem:[#allocation18_spill] sm:$0xff] %v1560_v43 }
  0x24   :  { %v110_v48 = vld [vmem:[#allocation2 + $0x150] sm:$0xff]  ;;  %v111_v35 = vld [vmem:[#allocation2 + $0x158] sm:$0xff]  ;;  %v353_v56 = vld [vmem:[#allocation5 + $0xe8] sm:$0xff]  ;;  %v1554_v2 = vsub.f32 %v95_v54, %v351_v32  ;;  %v1556_v3 = vsub.f32 %v96_v55, %v352_v37  ;;  %v1570_v54 = vmul.f32 %v1504_v49, %v1504_v49 }
  0x25   :  { %v354_v39 = vld [vmem:[#allocation5 + $0xf0] sm:$0xff]  ;;  %v355_v57 = vld [vmem:[#allocation5 + $0xf8] sm:$0xff]  ;;  %v112_v44 = vld [vmem:[#allocation2 + $0x160] sm:$0xff]  ;;  %v1562_v14 = vsub.f32 %v97_v63, %v353_v56 }
  0x26   :  { %v113_v45 = vld [vmem:[#allocation2 + $0x168] sm:$0xff]  ;;  %v114_v40 = vld [vmem:[#allocation2 + $0x170] sm:$0xff]  ;;  %v356_v4 = vld [vmem:[#allocation5 + $0x100] sm:$0xff]  ;;  %v1564_v22 = vsub.f32 %v98_v0, %v354_v39  ;;  %v1566_v53 = vsub.f32 %v99_v1, %v355_v57  ;;  %3281 = vst [vmem:[#allocation19_spill] sm:$0xff] %v1570_v54  ;;  %v1580_v0 = vmul.f32 %v1506_v50, %v1506_v50 }
  0x27   :  { %v357_v12 = vld [vmem:[#allocation5 + $0x108] sm:$0xff]  ;;  %v358_v13 = vld [vmem:[#allocation5 + $0x110] sm:$0xff]  ;;  %v115_v55 = vld [vmem:[#allocation2 + $0x178] sm:$0xff]  ;;  %v1572_v37 = vsub.f32 %v100_v9, %v356_v4 }
  0x28   :  { %v116_v23 = vld [vmem:[#allocation2 + $0x180] sm:$0xff]  ;;  %v117_v41 = vld [vmem:[#allocation2 + $0x188] sm:$0xff]  ;;  %v359_v27 = vld [vmem:[#allocation5 + $0x118] sm:$0xff]  ;;  %v1574_v43 = vsub.f32 %v101_v10, %v357_v12  ;;  %v1576_v63 = vsub.f32 %v102_v11, %v358_v13  ;;  %3282 = vst [vmem:[#allocation20_spill] sm:$0xff] %v1580_v0  ;;  %v1590_v10 = vmul.f32 %v1508_v51, %v1508_v51 }
  0x29   :  { %v360_v36 = vld [vmem:[#allocation5 + $0x120] sm:$0xff]  ;;  %v361_v32 = vld [vmem:[#allocation5 + $0x128] sm:$0xff]  ;;  %v118_v1 = vld [vmem:[#allocation2 + $0x190] sm:$0xff]  ;;  %v1582_v24 = vsub.f32 %v103_v17, %v359_v27 }
  0x2a   :  { %v119_v56 = vld [vmem:[#allocation2 + $0x198] sm:$0xff]  ;;  %v120_v49 = vld [vmem:[#allocation2 + $0x1a0] sm:$0xff]  ;;  %v362_v39 = vld [vmem:[#allocation5 + $0x130] sm:$0xff]  ;;  %v1584_v16 = vsub.f32 %v104_v21, %v360_v36  ;;  %v1586_v9 = vsub.f32 %v105_v18, %v361_v32  ;;  %3283 = vst [vmem:[#allocation21_spill] sm:$0xff] %v1590_v10  ;;  %v1600_v21 = vmul.f32 %v1512_v59, %v1512_v59 }
  0x2b   :  { %v363_v57 = vld [vmem:[#allocation5 + $0x138] sm:$0xff]  ;;  %v364_v33 = vld [vmem:[#allocation5 + $0x140] sm:$0xff]  ;;  %v121_v11 = vld [vmem:[#allocation2 + $0x1a8] sm:$0xff]  ;;  %v1592_v62 = vsub.f32 %v106_v25, %v362_v39 }
  0x2c   :  { %v122_v4 = vld [vmem:[#allocation2 + $0x1b0] sm:$0xff]  ;;  %v123_v50 = vld [vmem:[#allocation2 + $0x1b8] sm:$0xff]  ;;  %v365_v12 = vld [vmem:[#allocation5 + $0x148] sm:$0xff]  ;;  %v1594_v0 = vsub.f32 %v107_v31, %v363_v57  ;;  %v1596_v17 = vsub.f32 %v108_v26, %v364_v33  ;;  %3285 = vst [vmem:[#allocation23_spill] sm:$0xff] %v1600_v21  ;;  %v1610_v31 = vmul.f32 %v1514_v60, %v1514_v60 }
  0x2d   :  { %v366_v13 = vld [vmem:[#allocation5 + $0x150] sm:$0xff]  ;;  %v367_v8 = vld [vmem:[#allocation5 + $0x158] sm:$0xff]  ;;  %v124_v18 = vld [vmem:[#allocation2 + $0x1c0] sm:$0xff]  ;;  %v1602_v52 = vsub.f32 %v109_v34, %v365_v12 }
  0x2e   :  { %3284 = vst [vmem:[#allocation22_spill] sm:$0xff] %v1596_v17  ;;  %v125_v27 = vld [vmem:[#allocation2 + $0x1c8] sm:$0xff]  ;;  %v126_v51 = vld [vmem:[#allocation2 + $0x1d0] sm:$0xff]  ;;  %v368_v36 = vld [vmem:[#allocation5 + $0x160] sm:$0xff]  ;;  %v1604_v54 = vsub.f32 %v110_v48, %v366_v13  ;;  %v1606_v25 = vsub.f32 %v111_v35, %v367_v8  ;;  %v1620_v8 = vmul.f32 %v1516_v61, %v1516_v61 }
  0x2f   :  { %v369_v32 = vld [vmem:[#allocation5 + $0x168] sm:$0xff]  ;;  %v370_v10 = vld [vmem:[#allocation5 + $0x170] sm:$0xff]  ;;  %3288 = vst [vmem:[#allocation26_spill] sm:$0xff] %v1610_v31  ;;  %v127_v26 = vld [vmem:[#allocation2 + $0x1d8] sm:$0xff]  ;;  %v1612_v42 = vsub.f32 %v112_v44, %v368_v36 }
  0x30   :  { %3286 = vst [vmem:[#allocation24_spill] sm:$0xff] %v1604_v54  ;;  %v128_v33 = vld [vmem:[#allocation2 + $0x1e0] sm:$0xff]  ;;  %v129_v59 = vld [vmem:[#allocation2 + $0x1e8] sm:$0xff]  ;;  %v371_v39 = vld [vmem:[#allocation5 + $0x178] sm:$0xff]  ;;  %v1614_v17 = vsub.f32 %v113_v45, %v369_v32  ;;  %v1616_v34 = vsub.f32 %v114_v40, %v370_v10  ;;  %v1630_v45 = vmul.f32 %v1520_v5, %v1520_v5 }
  0x31   :  { %3287 = vst [vmem:[#allocation25_spill] sm:$0xff] %v1606_v25  ;;  %v372_v57 = vld [vmem:[#allocation5 + $0x180] sm:$0xff]  ;;  %v373_v21 = vld [vmem:[#allocation5 + $0x188] sm:$0xff]  ;;  %v130_v48 = vld [vmem:[#allocation2 + $0x1f0] sm:$0xff]  ;;  %v1622_v25 = vsub.f32 %v115_v55, %v371_v39 }
  0x32   :  { %3289 = vst [vmem:[#allocation27_spill] sm:$0xff] %v1614_v17  ;;  %v131_v35 = vld [vmem:[#allocation2 + $0x1f8] sm:$0xff]  ;;  %v132_v60 = vld [vmem:[#allocation2 + $0x200] sm:$0xff]  ;;  %v374_v12 = vld [vmem:[#allocation5 + $0x190] sm:$0xff]  ;;  %v1624_v54 = vsub.f32 %v116_v23, %v372_v57  ;;  %v1626_v44 = vsub.f32 %v117_v41, %v373_v21  ;;  %v1640_v23 = vmul.f32 %v1522_v6, %v1522_v6 }
  0x33   :  { %3290 = vst [vmem:[#allocation28_spill] sm:$0xff] %v1616_v34  ;;  %v375_v13 = vld [vmem:[#allocation5 + $0x198] sm:$0xff]  ;;  %v376_v31 = vld [vmem:[#allocation5 + $0x1a0] sm:$0xff]  ;;  %v133_v40 = vld [vmem:[#allocation2 + $0x208] sm:$0xff]  ;;  %v1632_v34 = vsub.f32 %v118_v1, %v374_v12 }
  0x34   :  { %3291 = vst [vmem:[#allocation29_spill] sm:$0xff] %v1620_v8  ;;  %v134_v10 = vld [vmem:[#allocation2 + $0x210] sm:$0xff]  ;;  %v135_v61 = vld [vmem:[#allocation2 + $0x218] sm:$0xff]  ;;  %v377_v36 = vld [vmem:[#allocation5 + $0x1a8] sm:$0xff]  ;;  %v1634_v17 = vsub.f32 %v119_v56, %v375_v13  ;;  %v1636_v55 = vsub.f32 %v120_v49, %v376_v31  ;;  %v1650_v56 = vmul.f32 %v1524_v7, %v1524_v7 }
  0x35   :  { %3292 = vst [vmem:[#allocation30_spill] sm:$0xff] %v1624_v54  ;;  %v378_v32 = vld [vmem:[#allocation5 + $0x1b0] sm:$0xff]  ;;  %v379_v8 = vld [vmem:[#allocation5 + $0x1b8] sm:$0xff]  ;;  %v136_v41 = vld [vmem:[#allocation2 + $0x220] sm:$0xff] }
  0x36   :  { %3293 = vst [vmem:[#allocation31_spill] sm:$0xff] %v1626_v44  ;;  %v137_v21 = vld [vmem:[#allocation2 + $0x228] sm:$0xff]  ;;  %v138_v5 = vld [vmem:[#allocation2 + $0x230] sm:$0xff]  ;;  %v380_v39 = vld [vmem:[#allocation5 + $0x1c0] sm:$0xff]  ;;  %v1642_v44 = vsub.f32 %v121_v11, %v377_v36  ;;  %v1644_v54 = vsub.f32 %v122_v4, %v378_v32  ;;  %v1646_v1 = vsub.f32 %v123_v50, %v379_v8  ;;  %v1660_v4 = vmul.f32 %v1528_v15, %v1528_v15 }
  0x37   :  { %3294 = vst [vmem:[#allocation32_spill] sm:$0xff] %v1630_v45  ;;  %v381_v57 = vld [vmem:[#allocation5 + $0x1c8] sm:$0xff]  ;;  %v382_v45 = vld [vmem:[#allocation5 + $0x1d0] sm:$0xff]  ;;  %v139_v49 = vld [vmem:[#allocation2 + $0x238] sm:$0xff] }
  0x38   :  { %3295 = vst [vmem:[#allocation33_spill] sm:$0xff] %v1634_v17  ;;  %v140_v31 = vld [vmem:[#allocation2 + $0x240] sm:$0xff]  ;;  %v141_v6 = vld [vmem:[#allocation2 + $0x248] sm:$0xff]  ;;  %v383_v12 = vld [vmem:[#allocation5 + $0x1d8] sm:$0xff]  ;;  %v1654_v17 = vsub.f32 %v125_v27, %v381_v57  ;;  %v1656_v11 = vsub.f32 %v126_v51, %v382_v45  ;;  %v1670_v27 = vmul.f32 %v1530_v19, %v1530_v19 }
  0x39   :  { %3296 = vst [vmem:[#allocation34_spill] sm:$0xff] %v1636_v55  ;;  %v384_v13 = vld [vmem:[#allocation5 + $0x1e0] sm:$0xff]  ;;  %v1652_v55 = vsub.f32 %v124_v18, %v380_v39  ;;  %v142_v50 = vld [vmem:[#allocation2 + $0x250] sm:$0xff]  ;;  %v143_v8 = vld [vmem:[#allocation2 + $0x258] sm:$0xff] }
  0x3a   :  { %3297 = vst [vmem:[#allocation35_spill] sm:$0xff] %v1640_v23  ;;  %v385_v23 = vld [vmem:[#allocation5 + $0x1e8] sm:$0xff]  ;;  %v144_v7 = vld [vmem:[#allocation2 + $0x260] sm:$0xff]  ;;  %v386_v36 = vld [vmem:[#allocation5 + $0x1f0] sm:$0xff] }
  0x3b   :  { %3298 = vst [vmem:[#allocation36_spill] sm:$0xff] %v1644_v54  ;;  %v387_v32 = vld [vmem:[#allocation5 + $0x1f8] sm:$0xff]  ;;  %v1664_v54 = vsub.f32 %v128_v33, %v384_v13  ;;  %v1666_v18 = vsub.f32 %v129_v59, %v385_v23  ;;  %v145_v51 = vld [vmem:[#allocation2 + $0x268] sm:$0xff]  ;;  %v146_v45 = vld [vmem:[#allocation2 + $0x270] sm:$0xff]  ;;  %v1680_v33 = vmul.f32 %v1532_v20, %v1532_v20 }
  0x3c   :  { %3299 = vst [vmem:[#allocation37_spill] sm:$0xff] %v1646_v1  ;;  %v1662_v1 = vsub.f32 %v127_v26, %v383_v12  ;;  %v147_v15 = vld [vmem:[#allocation2 + $0x278] sm:$0xff]  ;;  %v389_v39 = vld [vmem:[#allocation5 + $0x208] sm:$0xff]  ;;  %v390_v57 = vld [vmem:[#allocation5 + $0x210] sm:$0xff] }
  0x3d   :  { %3300 = vst [vmem:[#allocation38_spill] sm:$0xff] %v1650_v56  ;;  %v388_v56 = vld [vmem:[#allocation5 + $0x200] sm:$0xff]  ;;  %v149_v23 = vld [vmem:[#allocation2 + $0x288] sm:$0xff]  ;;  %v150_v19 = vld [vmem:[#allocation2 + $0x290] sm:$0xff] }
  0x3e   :  { %3301 = vst [vmem:[#allocation39_spill] sm:$0xff] %v1654_v17  ;;  %v1674_v17 = vsub.f32 %v131_v35, %v387_v32  ;;  %v1676_v26 = vsub.f32 %v132_v60, %v388_v56  ;;  %v148_v59 = vld [vmem:[#allocation2 + $0x280] sm:$0xff]  ;;  %v393_v13 = vld [vmem:[#allocation5 + $0x228] sm:$0xff]  ;;  %v1690_v35 = vmul.f32 %v1536_v28, %v1536_v28  ;;  %v151_v60 = vld [vmem:[#allocation2 + $0x298] sm:$0xff] }
  0x3f   :  { %3302 = vst [vmem:[#allocation40_spill] sm:$0xff] %v1656_v11  ;;  %v1672_v11 = vsub.f32 %v130_v48, %v386_v36  ;;  %v392_v12 = vld [vmem:[#allocation5 + $0x220] sm:$0xff]  ;;  %v153_v20 = vld [vmem:[#allocation2 + $0x2a8] sm:$0xff]  ;;  %v395_v36 = vld [vmem:[#allocation5 + $0x238] sm:$0xff] }
  0x40   :  { %3303 = vst [vmem:[#allocation41_spill] sm:$0xff] %v1660_v4  ;;  %v391_v4 = vld [vmem:[#allocation5 + $0x218] sm:$0xff]  ;;  %v152_v56 = vld [vmem:[#allocation2 + $0x2a0] sm:$0xff] }
  0x41   :  { %3304 = vst [vmem:[#allocation42_spill] sm:$0xff] %v1664_v54  ;;  %v1684_v54 = vsub.f32 %v134_v10, %v390_v57  ;;  %v1686_v48 = vsub.f32 %v135_v61, %v391_v4  ;;  %v396_v32 = vld [vmem:[#allocation5 + $0x240] sm:$0xff]  ;;  %v1700_v10 = vmul.f32 %v1538_v29, %v1538_v29  ;;  %v154_v61 = vld [vmem:[#allocation2 + $0x2b0] sm:$0xff]  ;;  %v155_v4 = vld [vmem:[#allocation2 + $0x2b8] sm:$0xff] }
  0x42   :  { %3305 = vst [vmem:[#allocation43_spill] sm:$0xff] %v1666_v18  ;;  %v1682_v18 = vsub.f32 %v133_v40, %v389_v39  ;;  %v156_v28 = vld [vmem:[#allocation2 + $0x2c0] sm:$0xff]  ;;  %v398_v39 = vld [vmem:[#allocation5 + $0x250] sm:$0xff]  ;;  %v399_v57 = vld [vmem:[#allocation5 + $0x258] sm:$0xff] }
  0x43   :  { %3306 = vst [vmem:[#allocation44_spill] sm:$0xff] %v1670_v27  ;;  %v394_v27 = vld [vmem:[#allocation5 + $0x230] sm:$0xff]  ;;  %v159_v29 = vld [vmem:[#allocation2 + $0x2d8] sm:$0xff] }
  0x44   :  { %3307 = vst [vmem:[#allocation45_spill] sm:$0xff] %v1674_v17  ;;  %v1694_v17 = vsub.f32 %v137_v21, %v393_v13  ;;  %v1696_v40 = vsub.f32 %v138_v5, %v394_v27  ;;  %v1710_v21 = vmul.f32 %v1540_v30, %v1540_v30  ;;  %v157_v5 = vld [vmem:[#allocation2 + $0x2c8] sm:$0xff]  ;;  %v158_v27 = vld [vmem:[#allocation2 + $0x2d0] sm:$0xff] }
  0x45   :  { %3308 = vst [vmem:[#allocation46_spill] sm:$0xff] %v1676_v26  ;;  %v1692_v26 = vsub.f32 %v136_v41, %v392_v12  ;;  %v401_v12 = vld [vmem:[#allocation5 + $0x268] sm:$0xff]  ;;  %v402_v13 = vld [vmem:[#allocation5 + $0x270] sm:$0xff] }
  0x46   :  { %3309 = vst [vmem:[#allocation47_spill] sm:$0xff] %v1680_v33  ;;  %v397_v33 = vld [vmem:[#allocation5 + $0x248] sm:$0xff]  ;;  %v162_v30 = vld [vmem:[#allocation2 + $0x2f0] sm:$0xff] }
  0x47   :  { %3310 = vst [vmem:[#allocation48_spill] sm:$0xff] %v1684_v54  ;;  %v1704_v54 = vsub.f32 %v140_v31, %v396_v32  ;;  %v1706_v41 = vsub.f32 %v141_v6, %v397_v33  ;;  %v1720_v31 = vmul.f32 %v1544_v38, %v1544_v38  ;;  %v160_v6 = vld [vmem:[#allocation2 + $0x2e0] sm:$0xff]  ;;  %v161_v33 = vld [vmem:[#allocation2 + $0x2e8] sm:$0xff] }
  0x48   :  { %3311 = vst [vmem:[#allocation49_spill] sm:$0xff] %v1686_v48  ;;  %v1702_v48 = vsub.f32 %v139_v49, %v395_v36  ;;  %v404_v36 = vld [vmem:[#allocation5 + $0x280] sm:$0xff]  ;;  %v405_v32 = vld [vmem:[#allocation5 + $0x288] sm:$0xff] }
  0x49   :  { %3312 = vst [vmem:[#allocation50_spill] sm:$0xff] %v1690_v35  ;;  %v400_v35 = vld [vmem:[#allocation5 + $0x260] sm:$0xff]  ;;  %v165_v38 = vld [vmem:[#allocation2 + $0x308] sm:$0xff] }
  0x4a   :  { %3313 = vst [vmem:[#allocation51_spill] sm:$0xff] %v1694_v17  ;;  %v1714_v17 = vsub.f32 %v143_v8, %v399_v57  ;;  %v1716_v49 = vsub.f32 %v144_v7, %v400_v35  ;;  %v1730_v8 = vmul.f32 %v1546_v46, %v1546_v46  ;;  %v163_v7 = vld [vmem:[#allocation2 + $0x2f8] sm:$0xff]  ;;  %v164_v35 = vld [vmem:[#allocation2 + $0x300] sm:$0xff] }
  0x4b   :  { %3314 = vst [vmem:[#allocation52_spill] sm:$0xff] %v1696_v40  ;;  %v1712_v40 = vsub.f32 %v142_v50, %v398_v39  ;;  %v407_v39 = vld [vmem:[#allocation5 + $0x298] sm:$0xff]  ;;  %v408_v57 = vld [vmem:[#allocation5 + $0x2a0] sm:$0xff] }
  0x4c   :  { %3315 = vst [vmem:[#allocation53_spill] sm:$0xff] %v1700_v10  ;;  %v403_v10 = vld [vmem:[#allocation5 + $0x278] sm:$0xff]  ;;  %v168_v46 = vld [vmem:[#allocation2 + $0x320] sm:$0xff] }
  0x4d   :  { %3316 = vst [vmem:[#allocation54_spill] sm:$0xff] %v1704_v54  ;;  %v1724_v54 = vsub.f32 %v146_v45, %v402_v13  ;;  %v1726_v50 = vsub.f32 %v147_v15, %v403_v10  ;;  %v1740_v45 = vmul.f32 %v1548_v47, %v1548_v47  ;;  %v166_v15 = vld [vmem:[#allocation2 + $0x310] sm:$0xff]  ;;  %v167_v10 = vld [vmem:[#allocation2 + $0x318] sm:$0xff] }
  0x4e   :  { %3317 = vst [vmem:[#allocation55_spill] sm:$0xff] %v1706_v41  ;;  %v1722_v41 = vsub.f32 %v145_v51, %v401_v12  ;;  %v410_v12 = vld [vmem:[#allocation5 + $0x2b0] sm:$0xff]  ;;  %v411_v13 = vld [vmem:[#allocation5 + $0x2b8] sm:$0xff] }
  0x4f   :  { %3318 = vst [vmem:[#allocation56_spill] sm:$0xff] %v1710_v21  ;;  %v406_v21 = vld [vmem:[#allocation5 + $0x290] sm:$0xff]  ;;  %v171_v47 = vld [vmem:[#allocation2 + $0x338] sm:$0xff] }
  0x50   :  { %3319 = vst [vmem:[#allocation57_spill] sm:$0xff] %v1714_v17  ;;  %v1734_v17 = vsub.f32 %v149_v23, %v405_v32  ;;  %v1736_v51 = vsub.f32 %v150_v19, %v406_v21  ;;  %v1750_v23 = vmul.f32 %v1552_v58, %v1552_v58  ;;  %v169_v19 = vld [vmem:[#allocation2 + $0x328] sm:$0xff]  ;;  %v170_v21 = vld [vmem:[#allocation2 + $0x330] sm:$0xff] }
  0x51   :  { %3320 = vst [vmem:[#allocation58_spill] sm:$0xff] %v1716_v49  ;;  %v1732_v49 = vsub.f32 %v148_v59, %v404_v36  ;;  %v413_v36 = vld [vmem:[#allocation5 + $0x2c8] sm:$0xff]  ;;  %v414_v32 = vld [vmem:[#allocation5 + $0x2d0] sm:$0xff] }
  0x52   :  { %3321 = vst [vmem:[#allocation59_spill] sm:$0xff] %v1720_v31  ;;  %v409_v31 = vld [vmem:[#allocation5 + $0x2a8] sm:$0xff]  ;;  %v174_v58 = vld [vmem:[#allocation2 + $0x350] sm:$0xff] }
  0x53   :  { %3322 = vst [vmem:[#allocation60_spill] sm:$0xff] %v1724_v54  ;;  %v1744_v54 = vsub.f32 %v152_v56, %v408_v57  ;;  %v1746_v59 = vsub.f32 %v153_v20, %v409_v31  ;;  %v1760_v56 = vmul.f32 %v1554_v2, %v1554_v2  ;;  %v172_v20 = vld [vmem:[#allocation2 + $0x340] sm:$0xff]  ;;  %v173_v31 = vld [vmem:[#allocation2 + $0x348] sm:$0xff] }
  0x54   :  { %3323 = vst [vmem:[#allocation61_spill] sm:$0xff] %v1726_v50  ;;  %v1742_v50 = vsub.f32 %v151_v60, %v407_v39  ;;  %v416_v39 = vld [vmem:[#allocation5 + $0x2e0] sm:$0xff]  ;;  %v417_v57 = vld [vmem:[#allocation5 + $0x2e8] sm:$0xff] }
  0x55   :  { %3324 = vst [vmem:[#allocation62_spill] sm:$0xff] %v1730_v8  ;;  %v412_v8 = vld [vmem:[#allocation5 + $0x2c0] sm:$0xff]  ;;  %v177_v2 = vld [vmem:[#allocation2 + $0x368] sm:$0xff] }
  0x56   :  { %3325 = vst [vmem:[#allocation63_spill] sm:$0xff] %v1734_v17  ;;  %v1754_v17 = vsub.f32 %v155_v4, %v411_v13  ;;  %v1756_v60 = vsub.f32 %v156_v28, %v412_v8  ;;  %v1770_v4 = vmul.f32 %v1556_v3, %v1556_v3  ;;  %v175_v28 = vld [vmem:[#allocation2 + $0x358] sm:$0xff]  ;;  %v176_v8 = vld [vmem:[#allocation2 + $0x360] sm:$0xff] }
  0x57   :  { %3326 = vst [vmem:[#allocation64_spill] sm:$0xff] %v1736_v51  ;;  %v1752_v51 = vsub.f32 %v154_v61, %v410_v12  ;;  %v419_v12 = vld [vmem:[#allocation5 + $0x2f8] sm:$0xff]  ;;  %v420_v13 = vld [vmem:[#allocation5 + $0x300] sm:$0xff] }
  0x58   :  { %3327 = vst [vmem:[#allocation65_spill] sm:$0xff] %v1740_v45  ;;  %v415_v45 = vld [vmem:[#allocation5 + $0x2d8] sm:$0xff]  ;;  %v180_v3 = vld [vmem:[#allocation2 + $0x380] sm:$0xff] }
  0x59   :  { %3328 = vst [vmem:[#allocation66_spill] sm:$0xff] %v1744_v54  ;;  %v1764_v54 = vsub.f32 %v158_v27, %v414_v32  ;;  %v1766_v61 = vsub.f32 %v159_v29, %v415_v45  ;;  %v1780_v27 = vmul.f32 %v1562_v14, %v1562_v14  ;;  %v178_v29 = vld [vmem:[#allocation2 + $0x370] sm:$0xff]  ;;  %v179_v45 = vld [vmem:[#allocation2 + $0x378] sm:$0xff] }
  0x5a   :  { %3329 = vst [vmem:[#allocation67_spill] sm:$0xff] %v1746_v59  ;;  %v1762_v59 = vsub.f32 %v157_v5, %v413_v36  ;;  %v422_v36 = vld [vmem:[#allocation5 + $0x310] sm:$0xff]  ;;  %v423_v32 = vld [vmem:[#allocation5 + $0x318] sm:$0xff] }
  0x5b   :  { %3330 = vst [vmem:[#allocation68_spill] sm:$0xff] %v1750_v23  ;;  %v418_v23 = vld [vmem:[#allocation5 + $0x2f0] sm:$0xff]  ;;  %v183_v14 = vld [vmem:[#allocation2 + $0x398] sm:$0xff] }
  0x5c   :  { %3331 = vst [vmem:[#allocation69_spill] sm:$0xff] %v1754_v17  ;;  %v1774_v17 = vsub.f32 %v161_v33, %v417_v57  ;;  %v1776_v5 = vsub.f32 %v162_v30, %v418_v23  ;;  %v1790_v33 = vmul.f32 %v1564_v22, %v1564_v22  ;;  %v181_v30 = vld [vmem:[#allocation2 + $0x388] sm:$0xff]  ;;  %v182_v23 = vld [vmem:[#allocation2 + $0x390] sm:$0xff] }
  0x5d   :  { %3332 = vst [vmem:[#allocation70_spill] sm:$0xff] %v1756_v60  ;;  %v1772_v60 = vsub.f32 %v160_v6, %v416_v39  ;;  %v425_v39 = vld [vmem:[#allocation5 + $0x328] sm:$0xff]  ;;  %v426_v57 = vld [vmem:[#allocation5 + $0x330] sm:$0xff] }
  0x5e   :  { %3333 = vst [vmem:[#allocation71_spill] sm:$0xff] %v1760_v56  ;;  %v421_v56 = vld [vmem:[#allocation5 + $0x308] sm:$0xff]  ;;  %v186_v22 = vld [vmem:[#allocation2 + $0x3b0] sm:$0xff] }
  0x5f   :  { %3334 = vst [vmem:[#allocation72_spill] sm:$0xff] %v1764_v54  ;;  %v1784_v54 = vsub.f32 %v164_v35, %v420_v13  ;;  %v1786_v6 = vsub.f32 %v165_v38, %v421_v56  ;;  %v1800_v35 = vmul.f32 %v1566_v53, %v1566_v53  ;;  %v184_v38 = vld [vmem:[#allocation2 + $0x3a0] sm:$0xff]  ;;  %v185_v56 = vld [vmem:[#allocation2 + $0x3a8] sm:$0xff] }
  0x60   :  { %3335 = vst [vmem:[#allocation73_spill] sm:$0xff] %v1766_v61  ;;  %v1782_v61 = vsub.f32 %v163_v7, %v419_v12  ;;  %v428_v12 = vld [vmem:[#allocation5 + $0x340] sm:$0xff]  ;;  %v429_v13 = vld [vmem:[#allocation5 + $0x348] sm:$0xff] }
  0x61   :  { %3336 = vst [vmem:[#allocation74_spill] sm:$0xff] %v1770_v4  ;;  %v424_v4 = vld [vmem:[#allocation5 + $0x320] sm:$0xff]  ;;  %v189_v53 = vld [vmem:[#allocation2 + $0x3c8] sm:$0xff] }
  0x62   :  { %3337 = vst [vmem:[#allocation75_spill] sm:$0xff] %v1774_v17  ;;  %v1794_v17 = vsub.f32 %v167_v10, %v423_v32  ;;  %v1796_v7 = vsub.f32 %v168_v46, %v424_v4  ;;  %v1810_v10 = vmul.f32 %v1572_v37, %v1572_v37  ;;  %v187_v46 = vld [vmem:[#allocation2 + $0x3b8] sm:$0xff]  ;;  %v188_v4 = vld [vmem:[#allocation2 + $0x3c0] sm:$0xff] }
  0x63   :  { %3338 = vst [vmem:[#allocation76_spill] sm:$0xff] %v1776_v5  ;;  %v1792_v5 = vsub.f32 %v166_v15, %v422_v36  ;;  %v431_v36 = vld [vmem:[#allocation5 + $0x358] sm:$0xff]  ;;  %v432_v32 = vld [vmem:[#allocation5 + $0x360] sm:$0xff] }
  0x64   :  { %3339 = vst [vmem:[#allocation77_spill] sm:$0xff] %v1780_v27  ;;  %v427_v27 = vld [vmem:[#allocation5 + $0x338] sm:$0xff]  ;;  %v192_v37 = vld [vmem:[#allocation2 + $0x3e0] sm:$0xff] }
  0x65   :  { %3340 = vst [vmem:[#allocation78_spill] sm:$0xff] %v1784_v54  ;;  %v1804_v54 = vsub.f32 %v170_v21, %v426_v57  ;;  %v1806_v15 = vsub.f32 %v171_v47, %v427_v27  ;;  %v1820_v21 = vmul.f32 %v1574_v43, %v1574_v43  ;;  %v190_v47 = vld [vmem:[#allocation2 + $0x3d0] sm:$0xff]  ;;  %v191_v27 = vld [vmem:[#allocation2 + $0x3d8] sm:$0xff] }
  0x66   :  { %3341 = vst [vmem:[#allocation79_spill] sm:$0xff] %v1786_v6  ;;  %v1802_v6 = vsub.f32 %v169_v19, %v425_v39  ;;  %v434_v39 = vld [vmem:[#allocation5 + $0x370] sm:$0xff]  ;;  %v435_v57 = vld [vmem:[#allocation5 + $0x378] sm:$0xff] }
  0x67   :  { %3342 = vst [vmem:[#allocation80_spill] sm:$0xff] %v1790_v33  ;;  %v430_v33 = vld [vmem:[#allocation5 + $0x350] sm:$0xff]  ;;  %v195_v43 = vld [vmem:[#allocation2 + $0x3f8] sm:$0xff] }
  0x68   :  { %3343 = vst [vmem:[#allocation81_spill] sm:$0xff] %v1794_v17  ;;  %v1814_v17 = vsub.f32 %v173_v31, %v429_v13  ;;  %v1816_v19 = vsub.f32 %v174_v58, %v430_v33  ;;  %v1830_v31 = vmul.f32 %v1576_v63, %v1576_v63  ;;  %v193_v58 = vld [vmem:[#allocation2 + $0x3e8] sm:$0xff]  ;;  %v194_v33 = vld [vmem:[#allocation2 + $0x3f0] sm:$0xff] }
  0x69   :  { %3344 = vst [vmem:[#allocation82_spill] sm:$0xff] %v1796_v7  ;;  %v1812_v7 = vsub.f32 %v172_v20, %v428_v12  ;;  %v437_v12 = vld [vmem:[#allocation5 + $0x388] sm:$0xff]  ;;  %v438_v13 = vld [vmem:[#allocation5 + $0x390] sm:$0xff] }
  0x6a   :  { %3345 = vst [vmem:[#allocation83_spill] sm:$0xff] %v1800_v35  ;;  %v433_v35 = vld [vmem:[#allocation5 + $0x368] sm:$0xff]  ;;  %v198_v63 = vld [vmem:[#allocation2 + $0x410] sm:$0xff] }
  0x6b   :  { %3346 = vst [vmem:[#allocation84_spill] sm:$0xff] %v1804_v54  ;;  %v1824_v54 = vsub.f32 %v176_v8, %v432_v32  ;;  %v1826_v20 = vsub.f32 %v177_v2, %v433_v35  ;;  %v1840_v8 = vmul.f32 %v1582_v24, %v1582_v24  ;;  %v196_v2 = vld [vmem:[#allocation2 + $0x400] sm:$0xff]  ;;  %v197_v35 = vld [vmem:[#allocation2 + $0x408] sm:$0xff] }
  0x6c   :  { %3347 = vst [vmem:[#allocation85_spill] sm:$0xff] %v1806_v15  ;;  %v1822_v15 = vsub.f32 %v175_v28, %v431_v36  ;;  %v440_v36 = vld [vmem:[#allocation5 + $0x3a0] sm:$0xff]  ;;  %v441_v32 = vld [vmem:[#allocation5 + $0x3a8] sm:$0xff] }
  0x6d   :  { %3348 = vst [vmem:[#allocation86_spill] sm:$0xff] %v1810_v10  ;;  %v436_v10 = vld [vmem:[#allocation5 + $0x380] sm:$0xff]  ;;  %v201_v24 = vld [vmem:[#allocation2 + $0x428] sm:$0xff] }
  0x6e   :  { %3349 = vst [vmem:[#allocation87_spill] sm:$0xff] %v1814_v17  ;;  %v1834_v17 = vsub.f32 %v179_v45, %v435_v57  ;;  %v1836_v28 = vsub.f32 %v180_v3, %v436_v10  ;;  %v1850_v45 = vmul.f32 %v1584_v16, %v1584_v16  ;;  %v199_v3 = vld [vmem:[#allocation2 + $0x418] sm:$0xff]  ;;  %v200_v10 = vld [vmem:[#allocation2 + $0x420] sm:$0xff] }
  0x6f   :  { %3350 = vst [vmem:[#allocation88_spill] sm:$0xff] %v1816_v19  ;;  %v1832_v19 = vsub.f32 %v178_v29, %v434_v39  ;;  %v443_v39 = vld [vmem:[#allocation5 + $0x3b8] sm:$0xff]  ;;  %v444_v57 = vld [vmem:[#allocation5 + $0x3c0] sm:$0xff] }
  0x70   :  { %3351 = vst [vmem:[#allocation89_spill] sm:$0xff] %v1820_v21  ;;  %v439_v21 = vld [vmem:[#allocation5 + $0x398] sm:$0xff]  ;;  %v204_v16 = vld [vmem:[#allocation2 + $0x440] sm:$0xff] }
  0x71   :  { %3352 = vst [vmem:[#allocation90_spill] sm:$0xff] %v1824_v54  ;;  %v1844_v54 = vsub.f32 %v182_v23, %v438_v13  ;;  %v1846_v29 = vsub.f32 %v183_v14, %v439_v21  ;;  %v1860_v23 = vmul.f32 %v1586_v9, %v1586_v9  ;;  %v202_v14 = vld [vmem:[#allocation2 + $0x430] sm:$0xff]  ;;  %v203_v21 = vld [vmem:[#allocation2 + $0x438] sm:$0xff] }
  0x72   :  { %3353 = vst [vmem:[#allocation91_spill] sm:$0xff] %v1826_v20  ;;  %v1842_v20 = vsub.f32 %v181_v30, %v437_v12  ;;  %v446_v12 = vld [vmem:[#allocation5 + $0x3d0] sm:$0xff]  ;;  %v447_v13 = vld [vmem:[#allocation5 + $0x3d8] sm:$0xff] }
  0x73   :  { %3354 = vst [vmem:[#allocation92_spill] sm:$0xff] %v1830_v31  ;;  %v442_v31 = vld [vmem:[#allocation5 + $0x3b0] sm:$0xff]  ;;  %v207_v9 = vld [vmem:[#allocation2 + $0x458] sm:$0xff] }
  0x74   :  { %3355 = vst [vmem:[#allocation93_spill] sm:$0xff] %v1834_v17  ;;  %v1854_v17 = vsub.f32 %v185_v56, %v441_v32  ;;  %v1856_v30 = vsub.f32 %v186_v22, %v442_v31  ;;  %v1870_v56 = vmul.f32 %v1592_v62, %v1592_v62  ;;  %v205_v22 = vld [vmem:[#allocation2 + $0x448] sm:$0xff]  ;;  %v206_v31 = vld [vmem:[#allocation2 + $0x450] sm:$0xff] }
  0x75   :  { %3356 = vst [vmem:[#allocation94_spill] sm:$0xff] %v1836_v28  ;;  %v1852_v28 = vsub.f32 %v184_v38, %v440_v36  ;;  %v449_v36 = vld [vmem:[#allocation5 + $0x3e8] sm:$0xff]  ;;  %v450_v32 = vld [vmem:[#allocation5 + $0x3f0] sm:$0xff] }
  0x76   :  { %3357 = vst [vmem:[#allocation95_spill] sm:$0xff] %v1840_v8  ;;  %v445_v8 = vld [vmem:[#allocation5 + $0x3c8] sm:$0xff]  ;;  %v210_v62 = vld [vmem:[#allocation2 + $0x470] sm:$0xff] }
  0x77   :  { %3358 = vst [vmem:[#allocation96_spill] sm:$0xff] %v1844_v54  ;;  %v1864_v54 = vsub.f32 %v188_v4, %v444_v57  ;;  %v1866_v38 = vsub.f32 %v189_v53, %v445_v8  ;;  %v1880_v4 = vmul.f32 %v1594_v0, %v1594_v0  ;;  %v208_v53 = vld [vmem:[#allocation2 + $0x460] sm:$0xff]  ;;  %v209_v8 = vld [vmem:[#allocation2 + $0x468] sm:$0xff] }
  0x78   :  { %3359 = vst [vmem:[#allocation97_spill] sm:$0xff] %v1846_v29  ;;  %v1862_v29 = vsub.f32 %v187_v46, %v443_v39  ;;  %v452_v39 = vld [vmem:[#allocation5 + $0x400] sm:$0xff]  ;;  %v453_v57 = vld [vmem:[#allocation5 + $0x408] sm:$0xff] }
  0x79   :  { %3360 = vst [vmem:[#allocation98_spill] sm:$0xff] %v1850_v45  ;;  %v448_v45 = vld [vmem:[#allocation5 + $0x3e0] sm:$0xff]  ;;  %v213_v0 = vld [vmem:[#allocation2 + $0x488] sm:$0xff] }
  0x7a   :  { %3361 = vst [vmem:[#allocation99_spill] sm:$0xff] %v1854_v17  ;;  %v1874_v17 = vsub.f32 %v191_v27, %v447_v13  ;;  %v1876_v46 = vsub.f32 %v192_v37, %v448_v45  ;;  %v3373_v27 = vld [vmem:[#allocation22_spill] sm:$0xff] }
  0x7b   :  { %3362 = vst [vmem:[#allocation100_spill] sm:$0xff] %v1856_v30  ;;  %v1872_v30 = vsub.f32 %v190_v47, %v446_v12  ;;  %v1890_v37 = vmul.f32 %v3373_v27, %v3373_v27  ;;  %v211_v45 = vld [vmem:[#allocation2 + $0x478] sm:$0xff]  ;;  %v212_v12 = vld [vmem:[#allocation2 + $0x480] sm:$0xff] }
  0x7c   :  { %3363 = vst [vmem:[#allocation101_spill] sm:$0xff] %v1860_v23  ;;  %v451_v23 = vld [vmem:[#allocation5 + $0x3f8] sm:$0xff] }
  0x7d   :  { %3364 = vst [vmem:[#allocation102_spill] sm:$0xff] %v1864_v54  ;;  %v1884_v54 = vsub.f32 %v194_v33, %v450_v32  ;;  %v1886_v47 = vsub.f32 %v195_v43, %v451_v23  ;;  %v455_v13 = vld [vmem:[#allocation5 + $0x418] sm:$0xff]  ;;  %v1900_v33 = vmul.f32 %v1602_v52, %v1602_v52  ;;  %v214_v43 = vld [vmem:[#allocation2 + $0x490] sm:$0xff] }
  0x7e   :  { %3365 = vst [vmem:[#allocation103_spill] sm:$0xff] %v1866_v38  ;;  %v1882_v38 = vsub.f32 %v193_v58, %v449_v36  ;;  %v215_v23 = vld [vmem:[#allocation2 + $0x498] sm:$0xff]  ;;  %v216_v36 = vld [vmem:[#allocation2 + $0x4a0] sm:$0xff]  ;;  %v458_v32 = vld [vmem:[#allocation5 + $0x430] sm:$0xff] }
  0x7f   :  { %3366 = vst [vmem:[#allocation104_spill] sm:$0xff] %v1870_v56  ;;  %v454_v56 = vld [vmem:[#allocation5 + $0x410] sm:$0xff]  ;;  %v459_v27 = vld [vmem:[#allocation5 + $0x438] sm:$0xff] }
  0x80   :  { %3367 = vst [vmem:[#allocation105_spill] sm:$0xff] %v1872_v30  ;;  %v1894_v30 = vsub.f32 %v197_v35, %v453_v57  ;;  %v1896_v58 = vsub.f32 %v198_v63, %v454_v56  ;;  %v3382_v35 = vld [vmem:[#allocation24_spill] sm:$0xff]  ;;  %v219_v52 = vld [vmem:[#allocation2 + $0x4b8] sm:$0xff] }
  0x81   :  { %3368 = vst [vmem:[#allocation106_spill] sm:$0xff] %v1874_v17  ;;  %v1892_v17 = vsub.f32 %v196_v2, %v452_v39  ;;  %v1910_v63 = vmul.f32 %v3382_v35, %v3382_v35  ;;  %v217_v56 = vld [vmem:[#allocation2 + $0x4a8] sm:$0xff]  ;;  %v218_v39 = vld [vmem:[#allocation2 + $0x4b0] sm:$0xff]  ;;  %v464_v35 = vld [vmem:[#allocation5 + $0x460] sm:$0xff] }
  0x82   :  { %3369 = vst [vmem:[#allocation107_spill] sm:$0xff] %v1876_v46  ;;  %v457_v46 = vld [vmem:[#allocation5 + $0x428] sm:$0xff] }
  0x83   :  { %3370 = vst [vmem:[#allocation108_spill] sm:$0xff] %v1880_v4  ;;  %v456_v4 = vld [vmem:[#allocation5 + $0x420] sm:$0xff]  ;;  %v1906_v2 = vsub.f32 %v201_v24, %v457_v46  ;;  %v461_v57 = vld [vmem:[#allocation5 + $0x448] sm:$0xff] }
  0x84   :  { %3371 = vst [vmem:[#allocation109_spill] sm:$0xff] %v1884_v54  ;;  %v1904_v54 = vsub.f32 %v200_v10, %v456_v4  ;;  %v3386_v10 = vld [vmem:[#allocation25_spill] sm:$0xff]  ;;  %v220_v46 = vld [vmem:[#allocation2 + $0x4c0] sm:$0xff]  ;;  %v221_v4 = vld [vmem:[#allocation2 + $0x4c8] sm:$0xff] }
  0x85   :  { %3372 = vst [vmem:[#allocation110_spill] sm:$0xff] %v1886_v47  ;;  %v1902_v47 = vsub.f32 %v199_v3, %v455_v13  ;;  %v1920_v24 = vmul.f32 %v3386_v10, %v3386_v10  ;;  %v222_v13 = vld [vmem:[#allocation2 + $0x4d0] sm:$0xff]  ;;  %v468_v10 = vld [vmem:[#allocation5 + $0x480] sm:$0xff] }
  0x86   :  { %3374 = vst [vmem:[#allocation22_spill] sm:$0xff] %v1890_v37  ;;  %v460_v37 = vld [vmem:[#allocation5 + $0x440] sm:$0xff] }
  0x87   :  { %3375 = vst [vmem:[#allocation111_spill] sm:$0xff] %v1892_v17  ;;  %v1914_v17 = vsub.f32 %v203_v21, %v459_v27  ;;  %v1916_v3 = vsub.f32 %v204_v16, %v460_v37  ;;  %v1930_v21 = vmul.f32 %v1612_v42, %v1612_v42  ;;  %v223_v16 = vld [vmem:[#allocation2 + $0x4d8] sm:$0xff]  ;;  %v224_v37 = vld [vmem:[#allocation2 + $0x4e0] sm:$0xff] }
  0x88   :  { %3376 = vst [vmem:[#allocation112_spill] sm:$0xff] %v1894_v30  ;;  %v1912_v30 = vsub.f32 %v202_v14, %v458_v32  ;;  %v225_v32 = vld [vmem:[#allocation2 + $0x4e8] sm:$0xff]  ;;  %v467_v27 = vld [vmem:[#allocation5 + $0x478] sm:$0xff]  ;;  %v228_v42 = vld [vmem:[#allocation2 + $0x500] sm:$0xff] }
  0x89   :  { %3377 = vst [vmem:[#allocation113_spill] sm:$0xff] %v1896_v58  ;;  %v463_v58 = vld [vmem:[#allocation5 + $0x458] sm:$0xff] }
  0x8a   :  { %3378 = vst [vmem:[#allocation114_spill] sm:$0xff] %v1900_v33  ;;  %v462_v33 = vld [vmem:[#allocation5 + $0x450] sm:$0xff]  ;;  %v1926_v14 = vsub.f32 %v207_v9, %v463_v58 }
  0x8b   :  { %3379 = vst [vmem:[#allocation115_spill] sm:$0xff] %v1902_v47  ;;  %v1924_v47 = vsub.f32 %v206_v31, %v462_v33  ;;  %v3395_v31 = vld [vmem:[#allocation27_spill] sm:$0xff]  ;;  %v226_v58 = vld [vmem:[#allocation2 + $0x4f0] sm:$0xff]  ;;  %v227_v33 = vld [vmem:[#allocation2 + $0x4f8] sm:$0xff] }
  0x8c   :  { %3380 = vst [vmem:[#allocation116_spill] sm:$0xff] %v1904_v54  ;;  %v1922_v54 = vsub.f32 %v205_v22, %v461_v57  ;;  %v1940_v9 = vmul.f32 %v3395_v31, %v3395_v31  ;;  %v470_v57 = vld [vmem:[#allocation5 + $0x490] sm:$0xff]  ;;  %v473_v31 = vld [vmem:[#allocation5 + $0x4a8] sm:$0xff] }
  0x8d   :  { %3381 = vst [vmem:[#allocation117_spill] sm:$0xff] %v1906_v2  ;;  %v466_v2 = vld [vmem:[#allocation5 + $0x470] sm:$0xff] }
  0x8e   :  { %3383 = vst [vmem:[#allocation24_spill] sm:$0xff] %v1910_v63  ;;  %v465_v63 = vld [vmem:[#allocation5 + $0x468] sm:$0xff]  ;;  %v1936_v22 = vsub.f32 %v210_v62, %v466_v2 }
  0x8f   :  { %3384 = vst [vmem:[#allocation118_spill] sm:$0xff] %v1914_v17  ;;  %v1934_v17 = vsub.f32 %v209_v8, %v465_v63  ;;  %v3399_v8 = vld [vmem:[#allocation28_spill] sm:$0xff]  ;;  %v230_v63 = vld [vmem:[#allocation2 + $0x510] sm:$0xff] }
  0x90   :  { %3385 = vst [vmem:[#allocation119_spill] sm:$0xff] %v1916_v3  ;;  %v1932_v3 = vsub.f32 %v208_v53, %v464_v35  ;;  %v1950_v62 = vmul.f32 %v3399_v8, %v3399_v8  ;;  %v229_v2 = vld [vmem:[#allocation2 + $0x508] sm:$0xff]  ;;  %v231_v35 = vld [vmem:[#allocation2 + $0x518] sm:$0xff] }
  0x91   :  { %3387 = vst [vmem:[#allocation25_spill] sm:$0xff] %v1920_v24  ;;  %v469_v24 = vld [vmem:[#allocation5 + $0x488] sm:$0xff] }
  0x92   :  { %3388 = vst [vmem:[#allocation120_spill] sm:$0xff] %v1922_v54  ;;  %v1944_v54 = vsub.f32 %v212_v12, %v468_v10  ;;  %v1946_v53 = vsub.f32 %v213_v0, %v469_v24  ;;  %v1960_v12 = vmul.f32 %v1622_v25, %v1622_v25  ;;  %v232_v0 = vld [vmem:[#allocation2 + $0x520] sm:$0xff]  ;;  %v233_v24 = vld [vmem:[#allocation2 + $0x528] sm:$0xff] }
  0x93   :  { %3389 = vst [vmem:[#allocation121_spill] sm:$0xff] %v1924_v47  ;;  %v1942_v47 = vsub.f32 %v211_v45, %v467_v27  ;;  %v234_v27 = vld [vmem:[#allocation2 + $0x530] sm:$0xff]  ;;  %v476_v10 = vld [vmem:[#allocation5 + $0x4c0] sm:$0xff]  ;;  %v477_v8 = vld [vmem:[#allocation5 + $0x4c8] sm:$0xff] }
  0x94   :  { %3390 = vst [vmem:[#allocation122_spill] sm:$0xff] %v1926_v14  ;;  %v472_v14 = vld [vmem:[#allocation5 + $0x4a0] sm:$0xff]  ;;  %v237_v25 = vld [vmem:[#allocation2 + $0x548] sm:$0xff] }
  0x95   :  { %3391 = vst [vmem:[#allocation123_spill] sm:$0xff] %v1930_v21  ;;  %v471_v21 = vld [vmem:[#allocation5 + $0x498] sm:$0xff]  ;;  %v1956_v45 = vsub.f32 %v216_v36, %v472_v14 }
  0x96   :  { %3392 = vst [vmem:[#allocation124_spill] sm:$0xff] %v1932_v3  ;;  %v1954_v3 = vsub.f32 %v215_v23, %v471_v21  ;;  %v3408_v23 = vld [vmem:[#allocation30_spill] sm:$0xff]  ;;  %v236_v21 = vld [vmem:[#allocation2 + $0x540] sm:$0xff] }
  0x97   :  { %3393 = vst [vmem:[#allocation125_spill] sm:$0xff] %v1934_v17  ;;  %v1952_v17 = vsub.f32 %v214_v43, %v470_v57  ;;  %v1970_v36 = vmul.f32 %v3408_v23, %v3408_v23  ;;  %v235_v14 = vld [vmem:[#allocation2 + $0x538] sm:$0xff]  ;;  %v482_v23 = vld [vmem:[#allocation5 + $0x4f0] sm:$0xff] }
  0x98   :  { %3394 = vst [vmem:[#allocation126_spill] sm:$0xff] %v1936_v22  ;;  %v475_v22 = vld [vmem:[#allocation5 + $0x4b8] sm:$0xff] }
  0x99   :  { %3396 = vst [vmem:[#allocation27_spill] sm:$0xff] %v1940_v9  ;;  %v474_v9 = vld [vmem:[#allocation5 + $0x4b0] sm:$0xff]  ;;  %v1966_v43 = vsub.f32 %v219_v52, %v475_v22  ;;  %v479_v57 = vld [vmem:[#allocation5 + $0x4d8] sm:$0xff] }
  0x9a   :  { %3397 = vst [vmem:[#allocation127_spill] sm:$0xff] %v1944_v54  ;;  %v1964_v54 = vsub.f32 %v218_v39, %v474_v9  ;;  %v3412_v39 = vld [vmem:[#allocation31_spill] sm:$0xff]  ;;  %v238_v22 = vld [vmem:[#allocation2 + $0x550] sm:$0xff]  ;;  %v239_v9 = vld [vmem:[#allocation2 + $0x558] sm:$0xff] }
  0x9b   :  { %3398 = vst [vmem:[#allocation128_spill] sm:$0xff] %v1946_v53  ;;  %v1962_v53 = vsub.f32 %v217_v56, %v473_v31  ;;  %v1980_v52 = vmul.f32 %v3412_v39, %v3412_v39  ;;  %v240_v31 = vld [vmem:[#allocation2 + $0x560] sm:$0xff]  ;;  %v486_v39 = vld [vmem:[#allocation5 + $0x510] sm:$0xff] }
  0x9c   :  { %3400 = vst [vmem:[#allocation28_spill] sm:$0xff] %v1950_v62  ;;  %v478_v62 = vld [vmem:[#allocation5 + $0x4d0] sm:$0xff] }
  0x9d   :  { %3401 = vst [vmem:[#allocation129_spill] sm:$0xff] %v1952_v17  ;;  %v1974_v17 = vsub.f32 %v221_v4, %v477_v8  ;;  %v1976_v56 = vsub.f32 %v222_v13, %v478_v62  ;;  %v1990_v4 = vmul.f32 %v1632_v34, %v1632_v34  ;;  %v241_v13 = vld [vmem:[#allocation2 + $0x568] sm:$0xff]  ;;  %v242_v62 = vld [vmem:[#allocation2 + $0x570] sm:$0xff] }
  0x9e   :  { %3402 = vst [vmem:[#allocation130_spill] sm:$0xff] %v1954_v3  ;;  %v1972_v3 = vsub.f32 %v220_v46, %v476_v10  ;;  %v243_v10 = vld [vmem:[#allocation2 + $0x578] sm:$0xff]  ;;  %v485_v8 = vld [vmem:[#allocation5 + $0x508] sm:$0xff]  ;;  %v246_v34 = vld [vmem:[#allocation2 + $0x590] sm:$0xff] }
  0x9f   :  { %3403 = vst [vmem:[#allocation131_spill] sm:$0xff] %v1956_v45  ;;  %v481_v45 = vld [vmem:[#allocation5 + $0x4e8] sm:$0xff] }
  0xa0   :  { %3404 = vst [vmem:[#allocation132_spill] sm:$0xff] %v1960_v12  ;;  %v480_v12 = vld [vmem:[#allocation5 + $0x4e0] sm:$0xff]  ;;  %v1986_v46 = vsub.f32 %v225_v32, %v481_v45 }
  0xa1   :  { %3405 = vst [vmem:[#allocation133_spill] sm:$0xff] %v1962_v53  ;;  %v1984_v53 = vsub.f32 %v224_v37, %v480_v12  ;;  %v3421_v37 = vld [vmem:[#allocation33_spill] sm:$0xff]  ;;  %v244_v45 = vld [vmem:[#allocation2 + $0x580] sm:$0xff]  ;;  %v245_v12 = vld [vmem:[#allocation2 + $0x588] sm:$0xff] }
  0xa2   :  { %3406 = vst [vmem:[#allocation134_spill] sm:$0xff] %v1964_v54  ;;  %v1982_v54 = vsub.f32 %v223_v16, %v479_v57  ;;  %v2000_v32 = vmul.f32 %v3421_v37, %v3421_v37  ;;  %v488_v57 = vld [vmem:[#allocation5 + $0x520] sm:$0xff]  ;;  %v491_v37 = vld [vmem:[#allocation5 + $0x538] sm:$0xff] }
  0xa3   :  { %3407 = vst [vmem:[#allocation135_spill] sm:$0xff] %v1966_v43  ;;  %v484_v43 = vld [vmem:[#allocation5 + $0x500] sm:$0xff] }
  0xa4   :  { %3409 = vst [vmem:[#allocation30_spill] sm:$0xff] %v1970_v36  ;;  %v483_v36 = vld [vmem:[#allocation5 + $0x4f8] sm:$0xff]  ;;  %v1996_v16 = vsub.f32 %v228_v42, %v484_v43 }
  0xa5   :  { %3410 = vst [vmem:[#allocation136_spill] sm:$0xff] %v1974_v17  ;;  %v1994_v17 = vsub.f32 %v227_v33, %v483_v36  ;;  %v3425_v33 = vld [vmem:[#allocation34_spill] sm:$0xff]  ;;  %v248_v36 = vld [vmem:[#allocation2 + $0x5a0] sm:$0xff] }
  0xa6   :  { %3411 = vst [vmem:[#allocation137_spill] sm:$0xff] %v1976_v56  ;;  %v1992_v56 = vsub.f32 %v226_v58, %v482_v23  ;;  %v2010_v42 = vmul.f32 %v3425_v33, %v3425_v33  ;;  %v247_v43 = vld [vmem:[#allocation2 + $0x598] sm:$0xff]  ;;  %v249_v23 = vld [vmem:[#allocation2 + $0x5a8] sm:$0xff] }
  0xa7   :  { %3413 = vst [vmem:[#allocation31_spill] sm:$0xff] %v1980_v52  ;;  %v487_v52 = vld [vmem:[#allocation5 + $0x518] sm:$0xff] }
  0xa8   :  { %3414 = vst [vmem:[#allocation138_spill] sm:$0xff] %v1982_v54  ;;  %v2004_v54 = vsub.f32 %v230_v63, %v486_v39  ;;  %v2006_v58 = vsub.f32 %v231_v35, %v487_v52  ;;  %v2020_v63 = vmul.f32 %v1642_v44, %v1642_v44  ;;  %v250_v35 = vld [vmem:[#allocation2 + $0x5b0] sm:$0xff]  ;;  %v251_v52 = vld [vmem:[#allocation2 + $0x5b8] sm:$0xff] }
  0xa9   :  { %3415 = vst [vmem:[#allocation139_spill] sm:$0xff] %v1984_v53  ;;  %v2002_v53 = vsub.f32 %v229_v2, %v485_v8  ;;  %v252_v8 = vld [vmem:[#allocation2 + $0x5c0] sm:$0xff]  ;;  %v494_v39 = vld [vmem:[#allocation5 + $0x550] sm:$0xff]  ;;  %v495_v33 = vld [vmem:[#allocation5 + $0x558] sm:$0xff] }
  0xaa   :  { %3416 = vst [vmem:[#allocation140_spill] sm:$0xff] %v1986_v46  ;;  %v490_v46 = vld [vmem:[#allocation5 + $0x530] sm:$0xff]  ;;  %v255_v44 = vld [vmem:[#allocation2 + $0x5d8] sm:$0xff] }
  0xab   :  { %3417 = vst [vmem:[#allocation141_spill] sm:$0xff] %v1990_v4  ;;  %v489_v4 = vld [vmem:[#allocation5 + $0x528] sm:$0xff]  ;;  %v2016_v2 = vsub.f32 %v234_v27, %v490_v46 }
  0xac   :  { %3418 = vst [vmem:[#allocation142_spill] sm:$0xff] %v1992_v56  ;;  %v2014_v56 = vsub.f32 %v233_v24, %v489_v4  ;;  %v3434_v24 = vld [vmem:[#allocation36_spill] sm:$0xff]  ;;  %v254_v4 = vld [vmem:[#allocation2 + $0x5d0] sm:$0xff] }
  0xad   :  { %3419 = vst [vmem:[#allocation143_spill] sm:$0xff] %v1994_v17  ;;  %v2012_v17 = vsub.f32 %v232_v0, %v488_v57  ;;  %v2030_v27 = vmul.f32 %v3434_v24, %v3434_v24  ;;  %v253_v46 = vld [vmem:[#allocation2 + $0x5c8] sm:$0xff]  ;;  %v500_v24 = vld [vmem:[#allocation5 + $0x580] sm:$0xff] }
  0xae   :  { %3420 = vst [vmem:[#allocation144_spill] sm:$0xff] %v1996_v16  ;;  %v493_v16 = vld [vmem:[#allocation5 + $0x548] sm:$0xff] }
  0xaf   :  { %3422 = vst [vmem:[#allocation33_spill] sm:$0xff] %v2000_v32  ;;  %v492_v32 = vld [vmem:[#allocation5 + $0x540] sm:$0xff]  ;;  %v2026_v0 = vsub.f32 %v237_v25, %v493_v16  ;;  %v497_v57 = vld [vmem:[#allocation5 + $0x568] sm:$0xff] }
  0xb0   :  { %3423 = vst [vmem:[#allocation145_spill] sm:$0xff] %v2004_v54  ;;  %v2024_v54 = vsub.f32 %v236_v21, %v492_v32  ;;  %v3438_v21 = vld [vmem:[#allocation37_spill] sm:$0xff]  ;;  %v256_v16 = vld [vmem:[#allocation2 + $0x5e0] sm:$0xff]  ;;  %v257_v32 = vld [vmem:[#allocation2 + $0x5e8] sm:$0xff] }
  0xb1   :  { %3424 = vst [vmem:[#allocation146_spill] sm:$0xff] %v2006_v58  ;;  %v2022_v58 = vsub.f32 %v235_v14, %v491_v37  ;;  %v2040_v25 = vmul.f32 %v3438_v21, %v3438_v21  ;;  %v258_v37 = vld [vmem:[#allocation2 + $0x5f0] sm:$0xff]  ;;  %v504_v21 = vld [vmem:[#allocation5 + $0x5a0] sm:$0xff] }
  0xb2   :  { %3426 = vst [vmem:[#allocation34_spill] sm:$0xff] %v2010_v42  ;;  %v496_v42 = vld [vmem:[#allocation5 + $0x560] sm:$0xff] }
  0xb3   :  { %3427 = vst [vmem:[#allocation147_spill] sm:$0xff] %v2012_v17  ;;  %v2034_v17 = vsub.f32 %v239_v9, %v495_v33  ;;  %v2036_v14 = vsub.f32 %v240_v31, %v496_v42  ;;  %v2050_v9 = vmul.f32 %v1652_v55, %v1652_v55  ;;  %v259_v31 = vld [vmem:[#allocation2 + $0x5f8] sm:$0xff]  ;;  %v260_v42 = vld [vmem:[#allocation2 + $0x600] sm:$0xff] }
  0xb4   :  { %3428 = vst [vmem:[#allocation148_spill] sm:$0xff] %v2014_v56  ;;  %v2032_v56 = vsub.f32 %v238_v22, %v494_v39  ;;  %v261_v39 = vld [vmem:[#allocation2 + $0x608] sm:$0xff]  ;;  %v503_v33 = vld [vmem:[#allocation5 + $0x598] sm:$0xff]  ;;  %v264_v55 = vld [vmem:[#allocation2 + $0x620] sm:$0xff] }
  0xb5   :  { %3429 = vst [vmem:[#allocation149_spill] sm:$0xff] %v2016_v2  ;;  %v499_v2 = vld [vmem:[#allocation5 + $0x578] sm:$0xff] }
  0xb6   :  { %3430 = vst [vmem:[#allocation150_spill] sm:$0xff] %v2020_v63  ;;  %v498_v63 = vld [vmem:[#allocation5 + $0x570] sm:$0xff]  ;;  %v2046_v22 = vsub.f32 %v243_v10, %v499_v2 }
  0xb7   :  { %3431 = vst [vmem:[#allocation151_spill] sm:$0xff] %v2022_v58  ;;  %v2044_v58 = vsub.f32 %v242_v62, %v498_v63  ;;  %v3447_v62 = vld [vmem:[#allocation39_spill] sm:$0xff]  ;;  %v262_v2 = vld [vmem:[#allocation2 + $0x610] sm:$0xff]  ;;  %v263_v63 = vld [vmem:[#allocation2 + $0x618] sm:$0xff] }
  0xb8   :  { %3432 = vst [vmem:[#allocation152_spill] sm:$0xff] %v2024_v54  ;;  %v2042_v54 = vsub.f32 %v241_v13, %v497_v57  ;;  %v2060_v10 = vmul.f32 %v3447_v62, %v3447_v62  ;;  %v506_v57 = vld [vmem:[#allocation5 + $0x5b0] sm:$0xff]  ;;  %v509_v62 = vld [vmem:[#allocation5 + $0x5c8] sm:$0xff] }
  0xb9   :  { %3433 = vst [vmem:[#allocation153_spill] sm:$0xff] %v2026_v0  ;;  %v502_v0 = vld [vmem:[#allocation5 + $0x590] sm:$0xff] }
  0xba   :  { %3435 = vst [vmem:[#allocation36_spill] sm:$0xff] %v2030_v27  ;;  %v501_v27 = vld [vmem:[#allocation5 + $0x588] sm:$0xff]  ;;  %v2056_v13 = vsub.f32 %v246_v34, %v502_v0 }
  0xbb   :  { %3436 = vst [vmem:[#allocation154_spill] sm:$0xff] %v2034_v17  ;;  %v2054_v17 = vsub.f32 %v245_v12, %v501_v27  ;;  %v3451_v12 = vld [vmem:[#allocation40_spill] sm:$0xff]  ;;  %v266_v27 = vld [vmem:[#allocation2 + $0x630] sm:$0xff] }
  0xbc   :  { %3437 = vst [vmem:[#allocation155_spill] sm:$0xff] %v2036_v14  ;;  %v2052_v14 = vsub.f32 %v244_v45, %v500_v24  ;;  %v2070_v34 = vmul.f32 %v3451_v12, %v3451_v12  ;;  %v265_v0 = vld [vmem:[#allocation2 + $0x628] sm:$0xff]  ;;  %v267_v24 = vld [vmem:[#allocation2 + $0x638] sm:$0xff] }
  0xbd   :  { %3439 = vst [vmem:[#allocation37_spill] sm:$0xff] %v2040_v25  ;;  %v505_v25 = vld [vmem:[#allocation5 + $0x5a8] sm:$0xff] }
  0xbe   :  { %3440 = vst [vmem:[#allocation156_spill] sm:$0xff] %v2042_v54  ;;  %v2064_v54 = vsub.f32 %v248_v36, %v504_v21  ;;  %v2066_v45 = vsub.f32 %v249_v23, %v505_v25  ;;  %v2080_v36 = vmul.f32 %v1662_v1, %v1662_v1  ;;  %v268_v23 = vld [vmem:[#allocation2 + $0x640] sm:$0xff]  ;;  %v269_v25 = vld [vmem:[#allocation2 + $0x648] sm:$0xff] }
  0xbf   :  { %3441 = vst [vmem:[#allocation157_spill] sm:$0xff] %v2044_v58  ;;  %v2062_v58 = vsub.f32 %v247_v43, %v503_v33  ;;  %v270_v33 = vld [vmem:[#allocation2 + $0x650] sm:$0xff]  ;;  %v512_v21 = vld [vmem:[#allocation5 + $0x5e0] sm:$0xff]  ;;  %v513_v12 = vld [vmem:[#allocation5 + $0x5e8] sm:$0xff] }
  0xc0   :  { %3442 = vst [vmem:[#allocation158_spill] sm:$0xff] %v2046_v22  ;;  %v508_v22 = vld [vmem:[#allocation5 + $0x5c0] sm:$0xff]  ;;  %v273_v1 = vld [vmem:[#allocation2 + $0x668] sm:$0xff] }
  0xc1   :  { %3443 = vst [vmem:[#allocation159_spill] sm:$0xff] %v2050_v9  ;;  %v507_v9 = vld [vmem:[#allocation5 + $0x5b8] sm:$0xff]  ;;  %v2076_v43 = vsub.f32 %v252_v8, %v508_v22 }
  0xc2   :  { %3444 = vst [vmem:[#allocation160_spill] sm:$0xff] %v2052_v14  ;;  %v2074_v14 = vsub.f32 %v251_v52, %v507_v9  ;;  %v3460_v52 = vld [vmem:[#allocation42_spill] sm:$0xff]  ;;  %v272_v9 = vld [vmem:[#allocation2 + $0x660] sm:$0xff] }
  0xc3   :  { %3445 = vst [vmem:[#allocation161_spill] sm:$0xff] %v2054_v17  ;;  %v2072_v17 = vsub.f32 %v250_v35, %v506_v57  ;;  %v2090_v8 = vmul.f32 %v3460_v52, %v3460_v52  ;;  %v271_v22 = vld [vmem:[#allocation2 + $0x658] sm:$0xff]  ;;  %v518_v52 = vld [vmem:[#allocation5 + $0x610] sm:$0xff] }
  0xc4   :  { %3446 = vst [vmem:[#allocation162_spill] sm:$0xff] %v2056_v13  ;;  %v511_v13 = vld [vmem:[#allocation5 + $0x5d8] sm:$0xff] }
  0xc5   :  { %3448 = vst [vmem:[#allocation39_spill] sm:$0xff] %v2060_v10  ;;  %v510_v10 = vld [vmem:[#allocation5 + $0x5d0] sm:$0xff]  ;;  %v2086_v35 = vsub.f32 %v255_v44, %v511_v13  ;;  %v515_v57 = vld [vmem:[#allocation5 + $0x5f8] sm:$0xff] }
  0xc6   :  { %3449 = vst [vmem:[#allocation163_spill] sm:$0xff] %v2064_v54  ;;  %v2084_v54 = vsub.f32 %v254_v4, %v510_v10  ;;  %v3464_v4 = vld [vmem:[#allocation43_spill] sm:$0xff]  ;;  %v274_v13 = vld [vmem:[#allocation2 + $0x670] sm:$0xff]  ;;  %v275_v10 = vld [vmem:[#allocation2 + $0x678] sm:$0xff] }
  0xc7   :  { %3450 = vst [vmem:[#allocation164_spill] sm:$0xff] %v2066_v45  ;;  %v2082_v45 = vsub.f32 %v253_v46, %v509_v62  ;;  %v2100_v44 = vmul.f32 %v3464_v4, %v3464_v4  ;;  %v276_v62 = vld [vmem:[#allocation2 + $0x680] sm:$0xff]  ;;  %v522_v4 = vld [vmem:[#allocation5 + $0x630] sm:$0xff] }
  0xc8   :  { %3452 = vst [vmem:[#allocation40_spill] sm:$0xff] %v2070_v34  ;;  %v514_v34 = vld [vmem:[#allocation5 + $0x5f0] sm:$0xff] }
  0xc9   :  { %3453 = vst [vmem:[#allocation165_spill] sm:$0xff] %v2072_v17  ;;  %v2094_v17 = vsub.f32 %v257_v32, %v513_v12  ;;  %v2096_v46 = vsub.f32 %v258_v37, %v514_v34  ;;  %v2110_v32 = vmul.f32 %v1672_v11, %v1672_v11  ;;  %v277_v37 = vld [vmem:[#allocation2 + $0x688] sm:$0xff]  ;;  %v278_v34 = vld [vmem:[#allocation2 + $0x690] sm:$0xff] }
  0xca   :  { %3454 = vst [vmem:[#allocation166_spill] sm:$0xff] %v2074_v14  ;;  %v2092_v14 = vsub.f32 %v256_v16, %v512_v21  ;;  %v279_v21 = vld [vmem:[#allocation2 + $0x698] sm:$0xff]  ;;  %v521_v12 = vld [vmem:[#allocation5 + $0x628] sm:$0xff]  ;;  %v282_v11 = vld [vmem:[#allocation2 + $0x6b0] sm:$0xff] }
  0xcb   :  { %3455 = vst [vmem:[#allocation167_spill] sm:$0xff] %v2076_v43  ;;  %v517_v43 = vld [vmem:[#allocation5 + $0x608] sm:$0xff] }
  0xcc   :  { %3456 = vst [vmem:[#allocation168_spill] sm:$0xff] %v2080_v36  ;;  %v516_v36 = vld [vmem:[#allocation5 + $0x600] sm:$0xff]  ;;  %v2106_v16 = vsub.f32 %v261_v39, %v517_v43 }
  0xcd   :  { %3457 = vst [vmem:[#allocation169_spill] sm:$0xff] %v2082_v45  ;;  %v2104_v45 = vsub.f32 %v260_v42, %v516_v36  ;;  %v3473_v42 = vld [vmem:[#allocation45_spill] sm:$0xff]  ;;  %v280_v43 = vld [vmem:[#allocation2 + $0x6a0] sm:$0xff]  ;;  %v281_v36 = vld [vmem:[#allocation2 + $0x6a8] sm:$0xff] }
  0xce   :  { %3458 = vst [vmem:[#allocation170_spill] sm:$0xff] %v2084_v54  ;;  %v2102_v54 = vsub.f32 %v259_v31, %v515_v57  ;;  %v2120_v39 = vmul.f32 %v3473_v42, %v3473_v42  ;;  %v524_v57 = vld [vmem:[#allocation5 + $0x640] sm:$0xff]  ;;  %v527_v42 = vld [vmem:[#allocation5 + $0x658] sm:$0xff] }
  0xcf   :  { %3459 = vst [vmem:[#allocation171_spill] sm:$0xff] %v2086_v35  ;;  %v520_v35 = vld [vmem:[#allocation5 + $0x620] sm:$0xff] }
  0xd0   :  { %3461 = vst [vmem:[#allocation42_spill] sm:$0xff] %v2090_v8  ;;  %v519_v8 = vld [vmem:[#allocation5 + $0x618] sm:$0xff]  ;;  %v2116_v31 = vsub.f32 %v264_v55, %v520_v35 }
  0xd1   :  { %3462 = vst [vmem:[#allocation172_spill] sm:$0xff] %v2094_v17  ;;  %v2114_v17 = vsub.f32 %v263_v63, %v519_v8  ;;  %v3477_v63 = vld [vmem:[#allocation46_spill] sm:$0xff]  ;;  %v284_v8 = vld [vmem:[#allocation2 + $0x6c0] sm:$0xff] }
  0xd2   :  { %3463 = vst [vmem:[#allocation173_spill] sm:$0xff] %v2096_v46  ;;  %v2112_v46 = vsub.f32 %v262_v2, %v518_v52  ;;  %v2130_v55 = vmul.f32 %v3477_v63, %v3477_v63  ;;  %v283_v35 = vld [vmem:[#allocation2 + $0x6b8] sm:$0xff]  ;;  %v285_v52 = vld [vmem:[#allocation2 + $0x6c8] sm:$0xff] }
  0xd3   :  { %3465 = vst [vmem:[#allocation43_spill] sm:$0xff] %v2100_v44  ;;  %v523_v44 = vld [vmem:[#allocation5 + $0x638] sm:$0xff] }
  0xd4   :  { %3466 = vst [vmem:[#allocation174_spill] sm:$0xff] %v2102_v54  ;;  %v2124_v54 = vsub.f32 %v266_v27, %v522_v4  ;;  %v2126_v2 = vsub.f32 %v267_v24, %v523_v44  ;;  %v2140_v27 = vmul.f32 %v1682_v18, %v1682_v18  ;;  %v286_v24 = vld [vmem:[#allocation2 + $0x6d0] sm:$0xff]  ;;  %v287_v44 = vld [vmem:[#allocation2 + $0x6d8] sm:$0xff] }
  0xd5   :  { %3467 = vst [vmem:[#allocation175_spill] sm:$0xff] %v2104_v45  ;;  %v2122_v45 = vsub.f32 %v265_v0, %v521_v12  ;;  %v288_v12 = vld [vmem:[#allocation2 + $0x6e0] sm:$0xff]  ;;  %v530_v4 = vld [vmem:[#allocation5 + $0x670] sm:$0xff]  ;;  %v531_v63 = vld [vmem:[#allocation5 + $0x678] sm:$0xff] }
  0xd6   :  { %3468 = vst [vmem:[#allocation176_spill] sm:$0xff] %v2106_v16  ;;  %v526_v16 = vld [vmem:[#allocation5 + $0x650] sm:$0xff]  ;;  %v291_v18 = vld [vmem:[#allocation2 + $0x6f8] sm:$0xff] }
  0xd7   :  { %3469 = vst [vmem:[#allocation177_spill] sm:$0xff] %v2110_v32  ;;  %v525_v32 = vld [vmem:[#allocation5 + $0x648] sm:$0xff]  ;;  %v2136_v0 = vsub.f32 %v270_v33, %v526_v16 }
  0xd8   :  { %3470 = vst [vmem:[#allocation178_spill] sm:$0xff] %v2112_v46  ;;  %v2134_v46 = vsub.f32 %v269_v25, %v525_v32  ;;  %v3486_v25 = vld [vmem:[#allocation48_spill] sm:$0xff]  ;;  %v290_v32 = vld [vmem:[#allocation2 + $0x6f0] sm:$0xff] }
  0xd9   :  { %3471 = vst [vmem:[#allocation179_spill] sm:$0xff] %v2114_v17  ;;  %v2132_v17 = vsub.f32 %v268_v23, %v524_v57  ;;  %v2150_v33 = vmul.f32 %v3486_v25, %v3486_v25  ;;  %v289_v16 = vld [vmem:[#allocation2 + $0x6e8] sm:$0xff]  ;;  %v536_v25 = vld [vmem:[#allocation5 + $0x6a0] sm:$0xff] }
  0xda   :  { %3472 = vst [vmem:[#allocation180_spill] sm:$0xff] %v2116_v31  ;;  %v529_v31 = vld [vmem:[#allocation5 + $0x668] sm:$0xff] }
  0xdb   :  { %3474 = vst [vmem:[#allocation45_spill] sm:$0xff] %v2120_v39  ;;  %v528_v39 = vld [vmem:[#allocation5 + $0x660] sm:$0xff]  ;;  %v2146_v23 = vsub.f32 %v273_v1, %v529_v31  ;;  %v533_v57 = vld [vmem:[#allocation5 + $0x688] sm:$0xff] }
  0xdc   :  { %3475 = vst [vmem:[#allocation181_spill] sm:$0xff] %v2124_v54  ;;  %v2144_v54 = vsub.f32 %v272_v9, %v528_v39  ;;  %v3490_v9 = vld [vmem:[#allocation49_spill] sm:$0xff]  ;;  %v292_v31 = vld [vmem:[#allocation2 + $0x700] sm:$0xff]  ;;  %v293_v39 = vld [vmem:[#allocation2 + $0x708] sm:$0xff] }
  0xdd   :  { %3476 = vst [vmem:[#allocation182_spill] sm:$0xff] %v2126_v2  ;;  %v2142_v2 = vsub.f32 %v271_v22, %v527_v42  ;;  %v2160_v1 = vmul.f32 %v3490_v9, %v3490_v9  ;;  %v294_v42 = vld [vmem:[#allocation2 + $0x710] sm:$0xff]  ;;  %v540_v9 = vld [vmem:[#allocation5 + $0x6c0] sm:$0xff] }
  0xde   :  { %3478 = vst [vmem:[#allocation46_spill] sm:$0xff] %v2130_v55  ;;  %v532_v55 = vld [vmem:[#allocation5 + $0x680] sm:$0xff] }
  0xdf   :  { %3479 = vst [vmem:[#allocation183_spill] sm:$0xff] %v2132_v17  ;;  %v2154_v17 = vsub.f32 %v275_v10, %v531_v63  ;;  %v2156_v22 = vsub.f32 %v276_v62, %v532_v55  ;;  %v2170_v10 = vmul.f32 %v1692_v26, %v1692_v26  ;;  %v295_v62 = vld [vmem:[#allocation2 + $0x718] sm:$0xff]  ;;  %v296_v55 = vld [vmem:[#allocation2 + $0x720] sm:$0xff] }
  0xe0   :  { %3480 = vst [vmem:[#allocation184_spill] sm:$0xff] %v2134_v46  ;;  %v2152_v46 = vsub.f32 %v274_v13, %v530_v4  ;;  %v297_v4 = vld [vmem:[#allocation2 + $0x728] sm:$0xff]  ;;  %v539_v63 = vld [vmem:[#allocation5 + $0x6b8] sm:$0xff]  ;;  %v300_v26 = vld [vmem:[#allocation2 + $0x740] sm:$0xff] }
  0xe1   :  { %3481 = vst [vmem:[#allocation185_spill] sm:$0xff] %v2136_v0  ;;  %v535_v0 = vld [vmem:[#allocation5 + $0x698] sm:$0xff] }
  0xe2   :  { %3482 = vst [vmem:[#allocation186_spill] sm:$0xff] %v2140_v27  ;;  %v534_v27 = vld [vmem:[#allocation5 + $0x690] sm:$0xff]  ;;  %v2166_v13 = vsub.f32 %v279_v21, %v535_v0 }
  0xe3   :  { %3483 = vst [vmem:[#allocation187_spill] sm:$0xff] %v2142_v2  ;;  %v2164_v2 = vsub.f32 %v278_v34, %v534_v27  ;;  %v3499_v34 = vld [vmem:[#allocation51_spill] sm:$0xff]  ;;  %v298_v0 = vld [vmem:[#allocation2 + $0x730] sm:$0xff]  ;;  %v299_v27 = vld [vmem:[#allocation2 + $0x738] sm:$0xff] }
  0xe4   :  { %3484 = vst [vmem:[#allocation188_spill] sm:$0xff] %v2144_v54  ;;  %v2162_v54 = vsub.f32 %v277_v37, %v533_v57  ;;  %v2180_v21 = vmul.f32 %v3499_v34, %v3499_v34  ;;  %v542_v57 = vld [vmem:[#allocation5 + $0x6d0] sm:$0xff]  ;;  %v545_v34 = vld [vmem:[#allocation5 + $0x6e8] sm:$0xff] }
  0xe5   :  { %3485 = vst [vmem:[#allocation189_spill] sm:$0xff] %v2146_v23  ;;  %v538_v23 = vld [vmem:[#allocation5 + $0x6b0] sm:$0xff] }
  0xe6   :  { %3487 = vst [vmem:[#allocation48_spill] sm:$0xff] %v2150_v33  ;;  %v537_v33 = vld [vmem:[#allocation5 + $0x6a8] sm:$0xff]  ;;  %v2176_v37 = vsub.f32 %v282_v11, %v538_v23 }
  0xe7   :  { %3488 = vst [vmem:[#allocation190_spill] sm:$0xff] %v2154_v17  ;;  %v2174_v17 = vsub.f32 %v281_v36, %v537_v33  ;;  %v3503_v36 = vld [vmem:[#allocation52_spill] sm:$0xff]  ;;  %v302_v33 = vld [vmem:[#allocation2 + $0x750] sm:$0xff] }
  0xe8   :  { %3489 = vst [vmem:[#allocation191_spill] sm:$0xff] %v2156_v22  ;;  %v2172_v22 = vsub.f32 %v280_v43, %v536_v25  ;;  %v2190_v11 = vmul.f32 %v3503_v36, %v3503_v36  ;;  %v301_v23 = vld [vmem:[#allocation2 + $0x748] sm:$0xff]  ;;  %v303_v25 = vld [vmem:[#allocation2 + $0x758] sm:$0xff] }
  0xe9   :  { %3491 = vst [vmem:[#allocation49_spill] sm:$0xff] %v2160_v1  ;;  %v541_v1 = vld [vmem:[#allocation5 + $0x6c8] sm:$0xff] }
  0xea   :  { %3492 = vst [vmem:[#allocation192_spill] sm:$0xff] %v2162_v54  ;;  %v2184_v54 = vsub.f32 %v284_v8, %v540_v9  ;;  %v2186_v43 = vsub.f32 %v285_v52, %v541_v1  ;;  %v2200_v8 = vmul.f32 %v1702_v48, %v1702_v48  ;;  %v304_v52 = vld [vmem:[#allocation2 + $0x760] sm:$0xff]  ;;  %v305_v1 = vld [vmem:[#allocation2 + $0x768] sm:$0xff] }
  0xeb   :  { %3493 = vst [vmem:[#allocation193_spill] sm:$0xff] %v2164_v2  ;;  %v2182_v2 = vsub.f32 %v283_v35, %v539_v63  ;;  %v306_v63 = vld [vmem:[#allocation2 + $0x770] sm:$0xff]  ;;  %v548_v9 = vld [vmem:[#allocation5 + $0x700] sm:$0xff]  ;;  %v549_v36 = vld [vmem:[#allocation5 + $0x708] sm:$0xff] }
  0xec   :  { %3494 = vst [vmem:[#allocation194_spill] sm:$0xff] %v2166_v13  ;;  %v544_v13 = vld [vmem:[#allocation5 + $0x6e0] sm:$0xff]  ;;  %v309_v48 = vld [vmem:[#allocation2 + $0x788] sm:$0xff] }
  0xed   :  { %3495 = vst [vmem:[#allocation195_spill] sm:$0xff] %v2170_v10  ;;  %v543_v10 = vld [vmem:[#allocation5 + $0x6d8] sm:$0xff]  ;;  %v2196_v35 = vsub.f32 %v288_v12, %v544_v13 }
  0xee   :  { %3496 = vst [vmem:[#allocation196_spill] sm:$0xff] %v2172_v22  ;;  %v2194_v22 = vsub.f32 %v287_v44, %v543_v10  ;;  %v3512_v44 = vld [vmem:[#allocation54_spill] sm:$0xff]  ;;  %v308_v10 = vld [vmem:[#allocation2 + $0x780] sm:$0xff] }
  0xef   :  { %3497 = vst [vmem:[#allocation197_spill] sm:$0xff] %v2174_v17  ;;  %v2192_v17 = vsub.f32 %v286_v24, %v542_v57  ;;  %v2210_v12 = vmul.f32 %v3512_v44, %v3512_v44  ;;  %v307_v13 = vld [vmem:[#allocation2 + $0x778] sm:$0xff]  ;;  %v554_v44 = vld [vmem:[#allocation5 + $0x730] sm:$0xff] }
  0xf0   :  { %3498 = vst [vmem:[#allocation198_spill] sm:$0xff] %v2176_v37  ;;  %v547_v37 = vld [vmem:[#allocation5 + $0x6f8] sm:$0xff] }
  0xf1   :  { %3500 = vst [vmem:[#allocation51_spill] sm:$0xff] %v2180_v21  ;;  %v546_v21 = vld [vmem:[#allocation5 + $0x6f0] sm:$0xff]  ;;  %v2206_v24 = vsub.f32 %v291_v18, %v547_v37  ;;  %v551_v57 = vld [vmem:[#allocation5 + $0x718] sm:$0xff] }
  0xf2   :  { %3501 = vst [vmem:[#allocation199_spill] sm:$0xff] %v2184_v54  ;;  %v2204_v54 = vsub.f32 %v290_v32, %v546_v21  ;;  %v3516_v32 = vld [vmem:[#allocation55_spill] sm:$0xff]  ;;  %v310_v37 = vld [vmem:[#allocation2 + $0x790] sm:$0xff]  ;;  %v311_v21 = vld [vmem:[#allocation2 + $0x798] sm:$0xff] }
  0xf3   :  { %3502 = vst [vmem:[#allocation200_spill] sm:$0xff] %v2186_v43  ;;  %v2202_v43 = vsub.f32 %v289_v16, %v545_v34  ;;  %v2220_v18 = vmul.f32 %v3516_v32, %v3516_v32  ;;  %v312_v34 = vld [vmem:[#allocation2 + $0x7a0] sm:$0xff]  ;;  %v558_v32 = vld [vmem:[#allocation5 + $0x750] sm:$0xff] }
  0xf4   :  { %3504 = vst [vmem:[#allocation52_spill] sm:$0xff] %v2190_v11  ;;  %v550_v11 = vld [vmem:[#allocation5 + $0x710] sm:$0xff] }
  0xf5   :  { %3505 = vst [vmem:[#allocation201_spill] sm:$0xff] %v2192_v17  ;;  %v2214_v17 = vsub.f32 %v293_v39, %v549_v36  ;;  %v2216_v16 = vsub.f32 %v294_v42, %v550_v11  ;;  %v2230_v39 = vmul.f32 %v1712_v40, %v1712_v40  ;;  %v313_v42 = vld [vmem:[#allocation2 + $0x7a8] sm:$0xff]  ;;  %v314_v11 = vld [vmem:[#allocation2 + $0x7b0] sm:$0xff] }
  0xf6   :  { %3506 = vst [vmem:[#allocation202_spill] sm:$0xff] %v2194_v22  ;;  %v2212_v22 = vsub.f32 %v292_v31, %v548_v9  ;;  %v315_v9 = vld [vmem:[#allocation2 + $0x7b8] sm:$0xff]  ;;  %v557_v36 = vld [vmem:[#allocation5 + $0x748] sm:$0xff]  ;;  %v318_v40 = vld [vmem:[#allocation2 + $0x7d0] sm:$0xff] }
  0xf7   :  { %3507 = vst [vmem:[#allocation203_spill] sm:$0xff] %v2196_v35  ;;  %v553_v35 = vld [vmem:[#allocation5 + $0x728] sm:$0xff] }
  0xf8   :  { %3508 = vst [vmem:[#allocation204_spill] sm:$0xff] %v2200_v8  ;;  %v552_v8 = vld [vmem:[#allocation5 + $0x720] sm:$0xff]  ;;  %v2226_v31 = vsub.f32 %v297_v4, %v553_v35 }
  0xf9   :  { %3509 = vst [vmem:[#allocation205_spill] sm:$0xff] %v2202_v43  ;;  %v2224_v43 = vsub.f32 %v296_v55, %v552_v8  ;;  %v3525_v55 = vld [vmem:[#allocation57_spill] sm:$0xff]  ;;  %v316_v35 = vld [vmem:[#allocation2 + $0x7c0] sm:$0xff]  ;;  %v317_v8 = vld [vmem:[#allocation2 + $0x7c8] sm:$0xff] }
  0xfa   :  { %3510 = vst [vmem:[#allocation206_spill] sm:$0xff] %v2204_v54  ;;  %v2222_v54 = vsub.f32 %v295_v62, %v551_v57  ;;  %v2240_v4 = vmul.f32 %v3525_v55, %v3525_v55  ;;  %v560_v57 = vld [vmem:[#allocation5 + $0x760] sm:$0xff]  ;;  %v563_v55 = vld [vmem:[#allocation5 + $0x778] sm:$0xff] }
  0xfb   :  { %3511 = vst [vmem:[#allocation207_spill] sm:$0xff] %v2206_v24  ;;  %v556_v24 = vld [vmem:[#allocation5 + $0x740] sm:$0xff] }
  0xfc   :  { %3513 = vst [vmem:[#allocation54_spill] sm:$0xff] %v2210_v12  ;;  %v555_v12 = vld [vmem:[#allocation5 + $0x738] sm:$0xff]  ;;  %v2236_v62 = vsub.f32 %v300_v26, %v556_v24 }
  0xfd   :  { %3514 = vst [vmem:[#allocation208_spill] sm:$0xff] %v2214_v17  ;;  %v2234_v17 = vsub.f32 %v299_v27, %v555_v12  ;;  %v3529_v27 = vld [vmem:[#allocation58_spill] sm:$0xff]  ;;  %v320_v12 = vld [vmem:[#allocation2 + $0x7e0] sm:$0xff] }
  0xfe   :  { %3515 = vst [vmem:[#allocation209_spill] sm:$0xff] %v2216_v16  ;;  %v2232_v16 = vsub.f32 %v298_v0, %v554_v44  ;;  %v2250_v26 = vmul.f32 %v3529_v27, %v3529_v27  ;;  %v319_v24 = vld [vmem:[#allocation2 + $0x7d8] sm:$0xff]  ;;  %v321_v44 = vld [vmem:[#allocation2 + $0x7e8] sm:$0xff]  ;;  %v568_v27 = vld [vmem:[#allocation5 + $0x7a0] sm:$0xff] }
  0xff   :  { %3517 = vst [vmem:[#allocation55_spill] sm:$0xff] %v2220_v18  ;;  %v559_v18 = vld [vmem:[#allocation5 + $0x758] sm:$0xff] }
 0x100   :  { %3518 = vst [vmem:[#allocation210_spill] sm:$0xff] %v2222_v54  ;;  %v2244_v54 = vsub.f32 %v302_v33, %v558_v32  ;;  %v2246_v0 = vsub.f32 %v303_v25, %v559_v18  ;;  %v2260_v33 = vmul.f32 %v1722_v41, %v1722_v41  ;;  %v322_v25 = vld [vmem:[#allocation2 + $0x7f0] sm:$0xff]  ;;  %v323_v18 = vld [vmem:[#allocation2 + $0x7f8] sm:$0xff] }
 0x101   :  { %3519 = vst [vmem:[#allocation211_spill] sm:$0xff] %v2224_v43  ;;  %v2242_v43 = vsub.f32 %v301_v23, %v557_v36  ;;  %v566_v36 = vld [vmem:[#allocation5 + $0x790] sm:$0xff]  ;;  %v567_v32 = vld [vmem:[#allocation5 + $0x798] sm:$0xff] }
 0x102   :  { %3520 = vst [vmem:[#allocation212_spill] sm:$0xff] %v2226_v31  ;;  %v562_v31 = vld [vmem:[#allocation5 + $0x770] sm:$0xff]  ;;  %v2272_v41 = vsub.f32 %v310_v37, %v566_v36  ;;  %v2290_v37 = vmul.f32 %v1732_v49, %v1732_v49  ;;  %v577_v36 = vld [vmem:[#allocation5 + $0x7e8] sm:$0xff] }
 0x103   :  { %3521 = vst [vmem:[#allocation213_spill] sm:$0xff] %v2230_v39  ;;  %v561_v39 = vld [vmem:[#allocation5 + $0x768] sm:$0xff]  ;;  %v2256_v23 = vsub.f32 %v306_v63, %v562_v31  ;;  %v570_v31 = vld [vmem:[#allocation5 + $0x7b0] sm:$0xff]  ;;  %v2306_v49 = vsub.f32 %v321_v44, %v577_v36 }
 0x104   :  { %3522 = vst [vmem:[#allocation214_spill] sm:$0xff] %v2232_v16  ;;  %v2254_v16 = vsub.f32 %v305_v1, %v561_v39  ;;  %v569_v63 = vld [vmem:[#allocation5 + $0x7a8] sm:$0xff]  ;;  %v571_v39 = vld [vmem:[#allocation5 + $0x7b8] sm:$0xff] }
 0x105   :  { %3523 = vst [vmem:[#allocation215_spill] sm:$0xff] %v2234_v17  ;;  %v2252_v17 = vsub.f32 %v304_v52, %v560_v57  ;;  %v3533_v52 = vld [vmem:[#allocation60_spill] sm:$0xff]  ;;  %v2274_v57 = vsub.f32 %v311_v21, %v567_v32  ;;  %v575_v21 = vld [vmem:[#allocation5 + $0x7d8] sm:$0xff] }
 0x106   :  { %3524 = vst [vmem:[#allocation216_spill] sm:$0xff] %v2236_v62  ;;  %v565_v62 = vld [vmem:[#allocation5 + $0x788] sm:$0xff]  ;;  %v2270_v1 = vmul.f32 %v3533_v52, %v3533_v52  ;;  %v2286_v52 = vsub.f32 %v315_v9, %v571_v39  ;;  %v579_v9 = vld [vmem:[#allocation5 + $0x7f8] sm:$0xff] }
 0x107   :  { %3526 = vst [vmem:[#allocation57_spill] sm:$0xff] %v2240_v4  ;;  %v564_v4 = vld [vmem:[#allocation5 + $0x780] sm:$0xff]  ;;  %v3537_v39 = vld [vmem:[#allocation64_spill] sm:$0xff] }
 0x108   :  { %3527 = vst [vmem:[#allocation217_spill] sm:$0xff] %v2244_v54  ;;  %v2266_v54 = vsub.f32 %v309_v48, %v565_v62  ;;  %v573_v48 = vld [vmem:[#allocation5 + $0x7c8] sm:$0xff]  ;;  %v574_v62 = vld [vmem:[#allocation5 + $0x7d0] sm:$0xff] }
 0x109   :  { %3528 = vst [vmem:[#allocation218_spill] sm:$0xff] %v2246_v0  ;;  %v2264_v0 = vsub.f32 %v308_v10, %v564_v4  ;;  %v572_v10 = vld [vmem:[#allocation5 + $0x7c0] sm:$0xff]  ;;  %v2282_v4 = vsub.f32 %v313_v42, %v569_v63  ;;  %v2302_v63 = vsub.f32 %v319_v24, %v575_v21  ;;  %v2342_v21 = vmul.f32 %v1762_v59, %v1762_v59 }
 0x10a   :  { %3530 = vst [vmem:[#allocation58_spill] sm:$0xff] %v2250_v26  ;;  %v2262_v26 = vsub.f32 %v307_v13, %v563_v55  ;;  %v2284_v55 = vsub.f32 %v314_v11, %v570_v31  ;;  %v2292_v32 = vsub.f32 %v316_v35, %v572_v10  ;;  %v578_v11 = vld [vmem:[#allocation5 + $0x7f0] sm:$0xff]  ;;  %v2310_v35 = vmul.f32 %v3537_v39, %v3537_v39  ;;  %v3538_v10 = vld [vmem:[#allocation66_spill] sm:$0xff]  ;;  %v3544_v39 = vld [vmem:[#allocation75_spill] sm:$0xff] }
 0x10b   :  { %3531 = vst [vmem:[#allocation219_spill] sm:$0xff] %v2256_v23  ;;  %v3534_v23 = vld [vmem:[#allocation61_spill] sm:$0xff]  ;;  %v2322_v24 = vmul.f32 %v3538_v10, %v3538_v10  ;;  %v2358_v10 = vmul.f32 %v3544_v39, %v3544_v39  ;;  %v2378_v39 = vmul.f32 %v1792_v5, %v1792_v5 }
 0x10c   :  { %3532 = vst [vmem:[#allocation220_spill] sm:$0xff] %v2260_v33  ;;  %v2276_v33 = vsub.f32 %v312_v34, %v568_v27  ;;  %v2280_v13 = vmul.f32 %v3534_v23, %v3534_v23  ;;  %v576_v34 = vld [vmem:[#allocation5 + $0x7e0] sm:$0xff]  ;;  %v2294_v23 = vsub.f32 %v317_v8, %v573_v48  ;;  %v2296_v27 = vsub.f32 %v318_v40, %v574_v62  ;;  %v3541_v62 = vld [vmem:[#allocation70_spill] sm:$0xff] }
 0x10d   :  { %v2304_v31 = vsub.f32 %v320_v12, %v576_v34  ;;  %v2312_v8 = vsub.f32 %v322_v25, %v578_v11  ;;  %v2314_v40 = vsub.f32 %v323_v18, %v579_v9  ;;  %v3539_v12 = vld [vmem:[#allocation67_spill] sm:$0xff]  ;;  %v2330_v48 = vmul.f32 %v1752_v51, %v1752_v51  ;;  %v3540_v25 = vld [vmem:[#allocation69_spill] sm:$0xff]  ;;  %v3542_v34 = vld [vmem:[#allocation72_spill] sm:$0xff]  ;;  %3545 = vst [vmem:[#allocation61_spill] sm:$0xff] %v2358_v10 }
 0x10e   :  { %3535 = vst [vmem:[#allocation60_spill] sm:$0xff] %v2280_v13  ;;  %v3536_v13 = vld [vmem:[#allocation63_spill] sm:$0xff]  ;;  %v2326_v44 = vmul.f32 %v3539_v12, %v3539_v12  ;;  %v2334_v18 = vmul.f32 %v3540_v25, %v3540_v25  ;;  %v2346_v36 = vmul.f32 %v3542_v34, %v3542_v34  ;;  %v3543_v11 = vld [vmem:[#allocation73_spill] sm:$0xff]  ;;  %v2354_v9 = vmul.f32 %v1772_v60, %v1772_v60  ;;  %v3546_v12 = vld [vmem:[#allocation76_spill] sm:$0xff] }
 0x10f   :  { %v2300_v42 = vmul.f32 %v3536_v13, %v3536_v13  ;;  %v2318_v13 = vmul.f32 %v1742_v50, %v1742_v50  ;;  %v2338_v50 = vmul.f32 %v3541_v62, %v3541_v62  ;;  %v2350_v51 = vmul.f32 %v3543_v11, %v3543_v11  ;;  %v3549_v62 = vld [vmem:[#allocation78_spill] sm:$0xff]  ;;  %v3550_v11 = vld [vmem:[#allocation79_spill] sm:$0xff]  ;;  %v3552_v10 = vld [vmem:[#allocation81_spill] sm:$0xff] }
 0x110   :  { %v2362_v59 = vmul.f32 %v3546_v12, %v3546_v12  ;;  %v2366_v25 = vmul.f32 %v1782_v61, %v1782_v61  ;;  %v2370_v34 = vmul.f32 %v3549_v62, %v3549_v62  ;;  %v2374_v60 = vmul.f32 %v3550_v11, %v3550_v11 }
 0x111   :  { %v2382_v12 = vmul.f32 %v3552_v10, %v3552_v10  ;;  %v2390_v62 = vmul.f32 %v1802_v6, %v1802_v6  ;;  %v2402_v10 = vmul.f32 %v1812_v7, %v1812_v7 }
 0x112   :  { %3547 = vst [vmem:[#allocation63_spill] sm:$0xff] %v2362_v59  ;;  %v3554_v59 = vld [vmem:[#allocation82_spill] sm:$0xff] }
 0x113   :  { %3548 = vst [vmem:[#allocation64_spill] sm:$0xff] %v2366_v25  ;;  %v2386_v61 = vmul.f32 %v3554_v59, %v3554_v59  ;;  %v3556_v25 = vld [vmem:[#allocation84_spill] sm:$0xff] }
 0x114   :  { %3551 = vst [vmem:[#allocation66_spill] sm:$0xff] %v2374_v60  ;;  %v2394_v11 = vmul.f32 %v3556_v25, %v3556_v25  ;;  %v3558_v60 = vld [vmem:[#allocation85_spill] sm:$0xff]  ;;  %v2414_v25 = vmul.f32 %v1822_v15, %v1822_v15 }
 0x115   :  { %3553 = vst [vmem:[#allocation67_spill] sm:$0xff] %v2382_v12  ;;  %v2398_v5 = vmul.f32 %v3558_v60, %v3558_v60  ;;  %v3560_v12 = vld [vmem:[#allocation87_spill] sm:$0xff] }
 0x116   :  { %3555 = vst [vmem:[#allocation69_spill] sm:$0xff] %v2386_v61  ;;  %v2406_v59 = vmul.f32 %v3560_v12, %v3560_v12  ;;  %v3562_v61 = vld [vmem:[#allocation88_spill] sm:$0xff]  ;;  %v2426_v12 = vmul.f32 %v1832_v19, %v1832_v19 }
 0x117   :  { %3557 = vst [vmem:[#allocation70_spill] sm:$0xff] %v2394_v11  ;;  %v2410_v6 = vmul.f32 %v3562_v61, %v3562_v61  ;;  %v3564_v11 = vld [vmem:[#allocation90_spill] sm:$0xff] }
 0x118   :  { %3559 = vst [vmem:[#allocation72_spill] sm:$0xff] %v2398_v5  ;;  %v2418_v60 = vmul.f32 %v3564_v11, %v3564_v11  ;;  %v3566_v5 = vld [vmem:[#allocation91_spill] sm:$0xff]  ;;  %v2438_v11 = vmul.f32 %v1842_v20, %v1842_v20 }
 0x119   :  { %3561 = vst [vmem:[#allocation73_spill] sm:$0xff] %v2406_v59  ;;  %v2422_v7 = vmul.f32 %v3566_v5, %v3566_v5  ;;  %v3569_v59 = vld [vmem:[#allocation93_spill] sm:$0xff] }
 0x11a   :  { %3563 = vst [vmem:[#allocation75_spill] sm:$0xff] %v2410_v6  ;;  %v2430_v61 = vmul.f32 %v3569_v59, %v3569_v59  ;;  %v3571_v6 = vld [vmem:[#allocation94_spill] sm:$0xff]  ;;  %v2450_v59 = vmul.f32 %v1852_v28, %v1852_v28 }
 0x11b   :  { %3565 = vst [vmem:[#allocation76_spill] sm:$0xff] %v2418_v60  ;;  %v2434_v15 = vmul.f32 %v3571_v6, %v3571_v6  ;;  %v3572_v60 = vld [vmem:[#allocation96_spill] sm:$0xff] }
 0x11c   :  { %3567 = vst [vmem:[#allocation78_spill] sm:$0xff] %v2422_v7  ;;  %v2442_v5 = vmul.f32 %v3572_v60, %v3572_v60  ;;  %v3574_v7 = vld [vmem:[#allocation97_spill] sm:$0xff]  ;;  %v2462_v60 = vmul.f32 %v1862_v29, %v1862_v29 }
 0x11d   :  { %3568 = vst [vmem:[#allocation79_spill] sm:$0xff] %v2426_v12  ;;  %v2446_v19 = vmul.f32 %v3574_v7, %v3574_v7  ;;  %v3579_v12 = vld [vmem:[#allocation100_spill] sm:$0xff] }
 0x11e   :  { %3570 = vst [vmem:[#allocation81_spill] sm:$0xff] %v2430_v61  ;;  %v3577_v61 = vld [vmem:[#allocation99_spill] sm:$0xff]  ;;  %v2458_v20 = vmul.f32 %v3579_v12, %v3579_v12 }
 0x11f   :  { %3573 = vst [vmem:[#allocation82_spill] sm:$0xff] %v2442_v5  ;;  %v2454_v6 = vmul.f32 %v3577_v61, %v3577_v61  ;;  %v3582_v5 = vld [vmem:[#allocation102_spill] sm:$0xff] }
 0x120   :  { %3575 = vst [vmem:[#allocation84_spill] sm:$0xff] %v2446_v19  ;;  %v2466_v7 = vmul.f32 %v3582_v5, %v3582_v5  ;;  %v3583_v19 = vld [vmem:[#allocation103_spill] sm:$0xff]  ;;  %v2486_v5 = vmul.f32 %v1882_v38, %v1882_v38 }
 0x121   :  { %3576 = vst [vmem:[#allocation85_spill] sm:$0xff] %v2450_v59  ;;  %v2470_v28 = vmul.f32 %v3583_v19, %v3583_v19  ;;  %v3585_v59 = vld [vmem:[#allocation105_spill] sm:$0xff] }
 0x122   :  { %3578 = vst [vmem:[#allocation87_spill] sm:$0xff] %v2454_v6  ;;  %v2474_v61 = vmul.f32 %v3585_v59, %v3585_v59  ;;  %v3587_v6 = vld [vmem:[#allocation106_spill] sm:$0xff] }
 0x123   :  { %3580 = vst [vmem:[#allocation88_spill] sm:$0xff] %v2458_v20  ;;  %v2478_v12 = vmul.f32 %v3587_v6, %v3587_v6  ;;  %v3589_v20 = vld [vmem:[#allocation107_spill] sm:$0xff] }
 0x124   :  { %3581 = vst [vmem:[#allocation90_spill] sm:$0xff] %v2462_v60  ;;  %v2482_v29 = vmul.f32 %v3589_v20, %v3589_v20  ;;  %v3592_v60 = vld [vmem:[#allocation109_spill] sm:$0xff] }
 0x125   :  { %3584 = vst [vmem:[#allocation91_spill] sm:$0xff] %v2470_v28  ;;  %v2490_v19 = vmul.f32 %v3592_v60, %v3592_v60  ;;  %v3594_v28 = vld [vmem:[#allocation110_spill] sm:$0xff] }
 0x126   :  { %3586 = vst [vmem:[#allocation93_spill] sm:$0xff] %v2474_v61  ;;  %v2494_v59 = vmul.f32 %v3594_v28, %v3594_v28  ;;  %v3596_v61 = vld [vmem:[#allocation111_spill] sm:$0xff] }
 0x127   :  { %3588 = vst [vmem:[#allocation94_spill] sm:$0xff] %v2478_v12  ;;  %v2498_v6 = vmul.f32 %v3596_v61, %v3596_v61  ;;  %v3597_v12 = vld [vmem:[#allocation112_spill] sm:$0xff] }
 0x128   :  { %3590 = vst [vmem:[#allocation96_spill] sm:$0xff] %v2482_v29  ;;  %v2502_v20 = vmul.f32 %v3597_v12, %v3597_v12  ;;  %v3599_v29 = vld [vmem:[#allocation113_spill] sm:$0xff]  ;;  %v2522_v12 = vmul.f32 %v1912_v30, %v1912_v30 }
 0x129   :  { %3591 = vst [vmem:[#allocation97_spill] sm:$0xff] %v2486_v5  ;;  %v2506_v38 = vmul.f32 %v3599_v29, %v3599_v29  ;;  %v3601_v5 = vld [vmem:[#allocation115_spill] sm:$0xff] }
 0x12a   :  { %3593 = vst [vmem:[#allocation99_spill] sm:$0xff] %v2490_v19  ;;  %v2510_v60 = vmul.f32 %v3601_v5, %v3601_v5  ;;  %v3603_v19 = vld [vmem:[#allocation116_spill] sm:$0xff] }
 0x12b   :  { %3595 = vst [vmem:[#allocation100_spill] sm:$0xff] %v2494_v59  ;;  %v2514_v28 = vmul.f32 %v3603_v19, %v3603_v19  ;;  %v3605_v59 = vld [vmem:[#allocation117_spill] sm:$0xff] }
 0x12c   :  { %3598 = vst [vmem:[#allocation102_spill] sm:$0xff] %v2502_v20  ;;  %v2518_v61 = vmul.f32 %v3605_v59, %v3605_v59  ;;  %v3608_v20 = vld [vmem:[#allocation118_spill] sm:$0xff] }
 0x12d   :  { %3600 = vst [vmem:[#allocation103_spill] sm:$0xff] %v2506_v38  ;;  %v2526_v29 = vmul.f32 %v3608_v20, %v3608_v20  ;;  %v3610_v38 = vld [vmem:[#allocation119_spill] sm:$0xff] }
 0x12e   :  { %3602 = vst [vmem:[#allocation105_spill] sm:$0xff] %v2510_v60  ;;  %v2530_v5 = vmul.f32 %v3610_v38, %v3610_v38  ;;  %v3612_v60 = vld [vmem:[#allocation120_spill] sm:$0xff] }
 0x12f   :  { %3604 = vst [vmem:[#allocation106_spill] sm:$0xff] %v2514_v28  ;;  %v2534_v19 = vmul.f32 %v3612_v60, %v3612_v60  ;;  %v3613_v28 = vld [vmem:[#allocation121_spill] sm:$0xff] }
 0x130   :  { %3606 = vst [vmem:[#allocation107_spill] sm:$0xff] %v2518_v61  ;;  %v2538_v59 = vmul.f32 %v3613_v28, %v3613_v28  ;;  %v3615_v61 = vld [vmem:[#allocation122_spill] sm:$0xff]  ;;  %v2558_v28 = vmul.f32 %v1942_v47, %v1942_v47 }
 0x131   :  { %3607 = vst [vmem:[#allocation109_spill] sm:$0xff] %v2522_v12  ;;  %v2542_v30 = vmul.f32 %v3615_v61, %v3615_v61  ;;  %v3617_v12 = vld [vmem:[#allocation124_spill] sm:$0xff] }
 0x132   :  { %3609 = vst [vmem:[#allocation110_spill] sm:$0xff] %v2526_v29  ;;  %v2546_v20 = vmul.f32 %v3617_v12, %v3617_v12  ;;  %v3619_v29 = vld [vmem:[#allocation125_spill] sm:$0xff] }
 0x133   :  { %3611 = vst [vmem:[#allocation111_spill] sm:$0xff] %v2530_v5  ;;  %v2550_v38 = vmul.f32 %v3619_v29, %v3619_v29  ;;  %v3621_v5 = vld [vmem:[#allocation126_spill] sm:$0xff] }
 0x134   :  { %3614 = vst [vmem:[#allocation112_spill] sm:$0xff] %v2538_v59  ;;  %v2554_v60 = vmul.f32 %v3621_v5, %v3621_v5  ;;  %v3624_v59 = vld [vmem:[#allocation127_spill] sm:$0xff] }
 0x135   :  { %3616 = vst [vmem:[#allocation113_spill] sm:$0xff] %v2542_v30  ;;  %v2562_v61 = vmul.f32 %v3624_v59, %v3624_v59  ;;  %v3626_v30 = vld [vmem:[#allocation128_spill] sm:$0xff] }
 0x136   :  { %3618 = vst [vmem:[#allocation115_spill] sm:$0xff] %v2546_v20  ;;  %v2566_v12 = vmul.f32 %v3626_v30, %v3626_v30  ;;  %v3628_v20 = vld [vmem:[#allocation129_spill] sm:$0xff] }
 0x137   :  { %3620 = vst [vmem:[#allocation116_spill] sm:$0xff] %v2550_v38  ;;  %v2570_v29 = vmul.f32 %v3628_v20, %v3628_v20  ;;  %v3629_v38 = vld [vmem:[#allocation130_spill] sm:$0xff] }
 0x138   :  { %3622 = vst [vmem:[#allocation117_spill] sm:$0xff] %v2554_v60  ;;  %v2574_v5 = vmul.f32 %v3629_v38, %v3629_v38  ;;  %v3631_v60 = vld [vmem:[#allocation131_spill] sm:$0xff]  ;;  %v2594_v38 = vmul.f32 %v1972_v3, %v1972_v3 }
 0x139   :  { %3623 = vst [vmem:[#allocation118_spill] sm:$0xff] %v2558_v28  ;;  %v2578_v47 = vmul.f32 %v3631_v60, %v3631_v60  ;;  %v3633_v28 = vld [vmem:[#allocation133_spill] sm:$0xff] }
 0x13a   :  { %3625 = vst [vmem:[#allocation119_spill] sm:$0xff] %v2562_v61  ;;  %v2582_v59 = vmul.f32 %v3633_v28, %v3633_v28  ;;  %v3635_v61 = vld [vmem:[#allocation134_spill] sm:$0xff] }
 0x13b   :  { %3627 = vst [vmem:[#allocation120_spill] sm:$0xff] %v2566_v12  ;;  %v2586_v30 = vmul.f32 %v3635_v61, %v3635_v61  ;;  %v3637_v12 = vld [vmem:[#allocation135_spill] sm:$0xff] }
 0x13c   :  { %3630 = vst [vmem:[#allocation121_spill] sm:$0xff] %v2574_v5  ;;  %v2590_v20 = vmul.f32 %v3637_v12, %v3637_v12  ;;  %v3640_v5 = vld [vmem:[#allocation136_spill] sm:$0xff] }
 0x13d   :  { %3632 = vst [vmem:[#allocation122_spill] sm:$0xff] %v2578_v47  ;;  %v2598_v60 = vmul.f32 %v3640_v5, %v3640_v5  ;;  %v3642_v47 = vld [vmem:[#allocation137_spill] sm:$0xff] }
 0x13e   :  { %3634 = vst [vmem:[#allocation124_spill] sm:$0xff] %v2582_v59  ;;  %v2602_v28 = vmul.f32 %v3642_v47, %v3642_v47  ;;  %v3644_v59 = vld [vmem:[#allocation138_spill] sm:$0xff] }
 0x13f   :  { %3636 = vst [vmem:[#allocation125_spill] sm:$0xff] %v2586_v30  ;;  %v2606_v61 = vmul.f32 %v3644_v59, %v3644_v59  ;;  %v3645_v30 = vld [vmem:[#allocation139_spill] sm:$0xff] }
 0x140   :  { %3638 = vst [vmem:[#allocation126_spill] sm:$0xff] %v2590_v20  ;;  %v2610_v12 = vmul.f32 %v3645_v30, %v3645_v30  ;;  %v3647_v20 = vld [vmem:[#allocation140_spill] sm:$0xff]  ;;  %v2630_v30 = vmul.f32 %v2002_v53, %v2002_v53 }
 0x141   :  { %3639 = vst [vmem:[#allocation127_spill] sm:$0xff] %v2594_v38  ;;  %v2614_v3 = vmul.f32 %v3647_v20, %v3647_v20  ;;  %v3649_v38 = vld [vmem:[#allocation142_spill] sm:$0xff] }
 0x142   :  { %3641 = vst [vmem:[#allocation128_spill] sm:$0xff] %v2598_v60  ;;  %v2618_v5 = vmul.f32 %v3649_v38, %v3649_v38  ;;  %v3651_v60 = vld [vmem:[#allocation143_spill] sm:$0xff] }
 0x143   :  { %3643 = vst [vmem:[#allocation129_spill] sm:$0xff] %v2602_v28  ;;  %v2622_v47 = vmul.f32 %v3651_v60, %v3651_v60  ;;  %v3653_v28 = vld [vmem:[#allocation144_spill] sm:$0xff] }
 0x144   :  { %3646 = vst [vmem:[#allocation130_spill] sm:$0xff] %v2610_v12  ;;  %v2626_v59 = vmul.f32 %v3653_v28, %v3653_v28  ;;  %v3656_v12 = vld [vmem:[#allocation145_spill] sm:$0xff] }
 0x145   :  { %3648 = vst [vmem:[#allocation131_spill] sm:$0xff] %v2614_v3  ;;  %v2634_v20 = vmul.f32 %v3656_v12, %v3656_v12  ;;  %v3658_v3 = vld [vmem:[#allocation146_spill] sm:$0xff] }
 0x146   :  { %3650 = vst [vmem:[#allocation133_spill] sm:$0xff] %v2618_v5  ;;  %v2638_v38 = vmul.f32 %v3658_v3, %v3658_v3  ;;  %v3660_v5 = vld [vmem:[#allocation147_spill] sm:$0xff] }
 0x147   :  { %3652 = vst [vmem:[#allocation134_spill] sm:$0xff] %v2622_v47  ;;  %v2642_v60 = vmul.f32 %v3660_v5, %v3660_v5  ;;  %v3661_v47 = vld [vmem:[#allocation148_spill] sm:$0xff] }
 0x148   :  { %3654 = vst [vmem:[#allocation135_spill] sm:$0xff] %v2626_v59  ;;  %v2646_v28 = vmul.f32 %v3661_v47, %v3661_v47  ;;  %v3663_v59 = vld [vmem:[#allocation149_spill] sm:$0xff]  ;;  %v2666_v47 = vmul.f32 %v2032_v56, %v2032_v56 }
 0x149   :  { %3655 = vst [vmem:[#allocation136_spill] sm:$0xff] %v2630_v30  ;;  %v2650_v53 = vmul.f32 %v3663_v59, %v3663_v59  ;;  %v3665_v30 = vld [vmem:[#allocation151_spill] sm:$0xff] }
 0x14a   :  { %3657 = vst [vmem:[#allocation137_spill] sm:$0xff] %v2634_v20  ;;  %v2654_v12 = vmul.f32 %v3665_v30, %v3665_v30  ;;  %v3667_v20 = vld [vmem:[#allocation152_spill] sm:$0xff] }
 0x14b   :  { %3659 = vst [vmem:[#allocation138_spill] sm:$0xff] %v2638_v38  ;;  %v2658_v3 = vmul.f32 %v3667_v20, %v3667_v20  ;;  %v3669_v38 = vld [vmem:[#allocation153_spill] sm:$0xff] }
 0x14c   :  { %3662 = vst [vmem:[#allocation139_spill] sm:$0xff] %v2646_v28  ;;  %v2662_v5 = vmul.f32 %v3669_v38, %v3669_v38  ;;  %v3672_v28 = vld [vmem:[#allocation154_spill] sm:$0xff] }
 0x14d   :  { %3664 = vst [vmem:[#allocation140_spill] sm:$0xff] %v2650_v53  ;;  %v2670_v59 = vmul.f32 %v3672_v28, %v3672_v28  ;;  %v3674_v53 = vld [vmem:[#allocation155_spill] sm:$0xff] }
 0x14e   :  { %3666 = vst [vmem:[#allocation142_spill] sm:$0xff] %v2654_v12  ;;  %v2674_v30 = vmul.f32 %v3674_v53, %v3674_v53  ;;  %v3676_v12 = vld [vmem:[#allocation156_spill] sm:$0xff] }
 0x14f   :  { %3668 = vst [vmem:[#allocation143_spill] sm:$0xff] %v2658_v3  ;;  %v2678_v20 = vmul.f32 %v3676_v12, %v3676_v12  ;;  %v3678_v3 = vld [vmem:[#allocation157_spill] sm:$0xff] }
 0x150   :  { %3670 = vst [vmem:[#allocation144_spill] sm:$0xff] %v2662_v5  ;;  %v2682_v38 = vmul.f32 %v3678_v3, %v3678_v3  ;;  %v3680_v5 = vld [vmem:[#allocation158_spill] sm:$0xff]  ;;  %v2702_v3 = vmul.f32 %v2062_v58, %v2062_v58 }
 0x151   :  { %3671 = vst [vmem:[#allocation145_spill] sm:$0xff] %v2666_v47  ;;  %v2686_v56 = vmul.f32 %v3680_v5, %v3680_v5  ;;  %v3682_v47 = vld [vmem:[#allocation160_spill] sm:$0xff] }
 0x152   :  { %3673 = vst [vmem:[#allocation146_spill] sm:$0xff] %v2670_v59  ;;  %v2690_v28 = vmul.f32 %v3682_v47, %v3682_v47  ;;  %v3683_v59 = vld [vmem:[#allocation161_spill] sm:$0xff] }
 0x153   :  { %3675 = vst [vmem:[#allocation147_spill] sm:$0xff] %v2674_v30  ;;  %v2694_v53 = vmul.f32 %v3683_v59, %v3683_v59  ;;  %v3685_v30 = vld [vmem:[#allocation162_spill] sm:$0xff] }
 0x154   :  { %3677 = vst [vmem:[#allocation148_spill] sm:$0xff] %v2678_v20  ;;  %v2698_v12 = vmul.f32 %v3685_v30, %v3685_v30  ;;  %v3692_v20 = vld [vmem:[#allocation165_spill] sm:$0xff] }
 0x155   :  { %3679 = vst [vmem:[#allocation149_spill] sm:$0xff] %v2682_v38  ;;  %v3688_v38 = vld [vmem:[#allocation163_spill] sm:$0xff]  ;;  %v2714_v59 = vmul.f32 %v3692_v20, %v3692_v20 }
 0x156   :  { %3681 = vst [vmem:[#allocation151_spill] sm:$0xff] %v2686_v56  ;;  %v2706_v5 = vmul.f32 %v3688_v38, %v3688_v38  ;;  %v3690_v56 = vld [vmem:[#allocation164_spill] sm:$0xff] }
 0x157   :  { %3684 = vst [vmem:[#allocation152_spill] sm:$0xff] %v2694_v53  ;;  %v2710_v47 = vmul.f32 %v3690_v56, %v3690_v56  ;;  %v3694_v53 = vld [vmem:[#allocation166_spill] sm:$0xff] }
 0x158   :  { %3686 = vst [vmem:[#allocation153_spill] sm:$0xff] %v2698_v12  ;;  %v2718_v30 = vmul.f32 %v3694_v53, %v3694_v53  ;;  %v3696_v12 = vld [vmem:[#allocation167_spill] sm:$0xff]  ;;  %v2738_v53 = vmul.f32 %v2092_v14, %v2092_v14 }
 0x159   :  { %3687 = vst [vmem:[#allocation154_spill] sm:$0xff] %v2702_v3  ;;  %v2722_v58 = vmul.f32 %v3696_v12, %v3696_v12  ;;  %v3697_v3 = vld [vmem:[#allocation169_spill] sm:$0xff] }
 0x15a   :  { %3689 = vst [vmem:[#allocation155_spill] sm:$0xff] %v2706_v5  ;;  %v2726_v38 = vmul.f32 %v3697_v3, %v3697_v3  ;;  %v3699_v5 = vld [vmem:[#allocation170_spill] sm:$0xff] }
 0x15b   :  { %3691 = vst [vmem:[#allocation156_spill] sm:$0xff] %v2710_v47  ;;  %v2730_v56 = vmul.f32 %v3699_v5, %v3699_v5  ;;  %v3701_v47 = vld [vmem:[#allocation171_spill] sm:$0xff] }
 0x15c   :  { %3693 = vst [vmem:[#allocation157_spill] sm:$0xff] %v2714_v59  ;;  %v2734_v20 = vmul.f32 %v3701_v47, %v3701_v47  ;;  %v3706_v59 = vld [vmem:[#allocation173_spill] sm:$0xff] }
 0x15d   :  { %3695 = vst [vmem:[#allocation158_spill] sm:$0xff] %v2718_v30  ;;  %v3704_v30 = vld [vmem:[#allocation172_spill] sm:$0xff]  ;;  %v2746_v3 = vmul.f32 %v3706_v59, %v3706_v59 }
 0x15e   :  { %3698 = vst [vmem:[#allocation160_spill] sm:$0xff] %v2726_v38  ;;  %v2742_v12 = vmul.f32 %v3704_v30, %v3704_v30  ;;  %v3708_v38 = vld [vmem:[#allocation174_spill] sm:$0xff] }
 0x15f   :  { %3700 = vst [vmem:[#allocation161_spill] sm:$0xff] %v2730_v56  ;;  %v2750_v5 = vmul.f32 %v3708_v38, %v3708_v38  ;;  %v3710_v56 = vld [vmem:[#allocation175_spill] sm:$0xff] }
 0x160   :  { %3702 = vst [vmem:[#allocation162_spill] sm:$0xff] %v2734_v20  ;;  %v2754_v47 = vmul.f32 %v3710_v56, %v3710_v56  ;;  %v3711_v20 = vld [vmem:[#allocation176_spill] sm:$0xff]  ;;  %v2774_v56 = vmul.f32 %v2122_v45, %v2122_v45 }
 0x161   :  { %3703 = vst [vmem:[#allocation163_spill] sm:$0xff] %v2738_v53  ;;  %v2758_v14 = vmul.f32 %v3711_v20, %v3711_v20  ;;  %v3713_v53 = vld [vmem:[#allocation178_spill] sm:$0xff] }
 0x162   :  { %3705 = vst [vmem:[#allocation164_spill] sm:$0xff] %v2742_v12  ;;  %v2762_v30 = vmul.f32 %v3713_v53, %v3713_v53  ;;  %v3715_v12 = vld [vmem:[#allocation179_spill] sm:$0xff] }
 0x163   :  { %3707 = vst [vmem:[#allocation165_spill] sm:$0xff] %v2746_v3  ;;  %v2766_v59 = vmul.f32 %v3715_v12, %v3715_v12  ;;  %v3717_v3 = vld [vmem:[#allocation180_spill] sm:$0xff] }
 0x164   :  { %3709 = vst [vmem:[#allocation166_spill] sm:$0xff] %v2750_v5  ;;  %v2770_v38 = vmul.f32 %v3717_v3, %v3717_v3  ;;  %v3720_v5 = vld [vmem:[#allocation181_spill] sm:$0xff] }
 0x165   :  { %3712 = vst [vmem:[#allocation167_spill] sm:$0xff] %v2758_v14  ;;  %v2778_v20 = vmul.f32 %v3720_v5, %v3720_v5  ;;  %v3722_v14 = vld [vmem:[#allocation182_spill] sm:$0xff] }
 0x166   :  { %3714 = vst [vmem:[#allocation169_spill] sm:$0xff] %v2762_v30  ;;  %v2782_v53 = vmul.f32 %v3722_v14, %v3722_v14  ;;  %v3724_v30 = vld [vmem:[#allocation183_spill] sm:$0xff] }
 0x167   :  { %3716 = vst [vmem:[#allocation170_spill] sm:$0xff] %v2766_v59  ;;  %v2786_v12 = vmul.f32 %v3724_v30, %v3724_v30  ;;  %v3725_v59 = vld [vmem:[#allocation184_spill] sm:$0xff] }
 0x168   :  { %3718 = vst [vmem:[#allocation171_spill] sm:$0xff] %v2770_v38  ;;  %v2790_v3 = vmul.f32 %v3725_v59, %v3725_v59  ;;  %v3727_v38 = vld [vmem:[#allocation185_spill] sm:$0xff]  ;;  %v2810_v59 = vmul.f32 %v2152_v46, %v2152_v46 }
 0x169   :  { %3719 = vst [vmem:[#allocation172_spill] sm:$0xff] %v2774_v56  ;;  %v2794_v45 = vmul.f32 %v3727_v38, %v3727_v38  ;;  %v3729_v56 = vld [vmem:[#allocation187_spill] sm:$0xff] }
 0x16a   :  { %3721 = vst [vmem:[#allocation173_spill] sm:$0xff] %v2778_v20  ;;  %v2798_v5 = vmul.f32 %v3729_v56, %v3729_v56  ;;  %v3731_v20 = vld [vmem:[#allocation188_spill] sm:$0xff] }
 0x16b   :  { %3723 = vst [vmem:[#allocation174_spill] sm:$0xff] %v2782_v53  ;;  %v2802_v14 = vmul.f32 %v3731_v20, %v3731_v20  ;;  %v3733_v53 = vld [vmem:[#allocation189_spill] sm:$0xff] }
 0x16c   :  { %3726 = vst [vmem:[#allocation175_spill] sm:$0xff] %v2790_v3  ;;  %v2806_v30 = vmul.f32 %v3733_v53, %v3733_v53  ;;  %v3736_v3 = vld [vmem:[#allocation190_spill] sm:$0xff] }
 0x16d   :  { %3728 = vst [vmem:[#allocation176_spill] sm:$0xff] %v2794_v45  ;;  %v2814_v38 = vmul.f32 %v3736_v3, %v3736_v3  ;;  %v3738_v45 = vld [vmem:[#allocation191_spill] sm:$0xff] }
 0x16e   :  { %3730 = vst [vmem:[#allocation178_spill] sm:$0xff] %v2798_v5  ;;  %v2818_v56 = vmul.f32 %v3738_v45, %v3738_v45  ;;  %v3740_v5 = vld [vmem:[#allocation192_spill] sm:$0xff] }
 0x16f   :  { %3732 = vst [vmem:[#allocation179_spill] sm:$0xff] %v2802_v14  ;;  %v2822_v20 = vmul.f32 %v3740_v5, %v3740_v5  ;;  %v3741_v14 = vld [vmem:[#allocation193_spill] sm:$0xff] }
 0x170   :  { %3734 = vst [vmem:[#allocation180_spill] sm:$0xff] %v2806_v30  ;;  %v2826_v53 = vmul.f32 %v3741_v14, %v3741_v14  ;;  %v3743_v30 = vld [vmem:[#allocation194_spill] sm:$0xff]  ;;  %v2846_v14 = vmul.f32 %v2182_v2, %v2182_v2 }
 0x171   :  { %3735 = vst [vmem:[#allocation181_spill] sm:$0xff] %v2810_v59  ;;  %v2830_v46 = vmul.f32 %v3743_v30, %v3743_v30  ;;  %v3745_v59 = vld [vmem:[#allocation196_spill] sm:$0xff] }
 0x172   :  { %3737 = vst [vmem:[#allocation182_spill] sm:$0xff] %v2814_v38  ;;  %v2834_v3 = vmul.f32 %v3745_v59, %v3745_v59  ;;  %v3747_v38 = vld [vmem:[#allocation197_spill] sm:$0xff] }
 0x173   :  { %3739 = vst [vmem:[#allocation183_spill] sm:$0xff] %v2818_v56  ;;  %v2838_v45 = vmul.f32 %v3747_v38, %v3747_v38  ;;  %v3749_v56 = vld [vmem:[#allocation198_spill] sm:$0xff] }
 0x174   :  { %3742 = vst [vmem:[#allocation184_spill] sm:$0xff] %v2826_v53  ;;  %v2842_v5 = vmul.f32 %v3749_v56, %v3749_v56  ;;  %v3752_v53 = vld [vmem:[#allocation199_spill] sm:$0xff] }
 0x175   :  { %3744 = vst [vmem:[#allocation185_spill] sm:$0xff] %v2830_v46  ;;  %v2850_v30 = vmul.f32 %v3752_v53, %v3752_v53  ;;  %v3754_v46 = vld [vmem:[#allocation200_spill] sm:$0xff] }
 0x176   :  { %3746 = vst [vmem:[#allocation187_spill] sm:$0xff] %v2834_v3  ;;  %v2854_v59 = vmul.f32 %v3754_v46, %v3754_v46  ;;  %v3756_v3 = vld [vmem:[#allocation201_spill] sm:$0xff] }
 0x177   :  { %3748 = vst [vmem:[#allocation188_spill] sm:$0xff] %v2838_v45  ;;  %v2858_v38 = vmul.f32 %v3756_v3, %v3756_v3  ;;  %v3757_v45 = vld [vmem:[#allocation202_spill] sm:$0xff] }
 0x178   :  { %3750 = vst [vmem:[#allocation189_spill] sm:$0xff] %v2842_v5  ;;  %v2862_v56 = vmul.f32 %v3757_v45, %v3757_v45  ;;  %v3759_v5 = vld [vmem:[#allocation203_spill] sm:$0xff]  ;;  %v2882_v45 = vmul.f32 %v2212_v22, %v2212_v22 }
 0x179   :  { %3751 = vst [vmem:[#allocation190_spill] sm:$0xff] %v2846_v14  ;;  %v2866_v2 = vmul.f32 %v3759_v5, %v3759_v5  ;;  %v3761_v14 = vld [vmem:[#allocation205_spill] sm:$0xff] }
 0x17a   :  { %3753 = vst [vmem:[#allocation191_spill] sm:$0xff] %v2850_v30  ;;  %v2870_v53 = vmul.f32 %v3761_v14, %v3761_v14  ;;  %v3763_v30 = vld [vmem:[#allocation206_spill] sm:$0xff] }
 0x17b   :  { %3755 = vst [vmem:[#allocation192_spill] sm:$0xff] %v2854_v59  ;;  %v2874_v46 = vmul.f32 %v3763_v30, %v3763_v30  ;;  %v3765_v59 = vld [vmem:[#allocation207_spill] sm:$0xff] }
 0x17c   :  { %3758 = vst [vmem:[#allocation193_spill] sm:$0xff] %v2862_v56  ;;  %v2878_v3 = vmul.f32 %v3765_v59, %v3765_v59  ;;  %v3768_v56 = vld [vmem:[#allocation208_spill] sm:$0xff] }
 0x17d   :  { %3760 = vst [vmem:[#allocation194_spill] sm:$0xff] %v2866_v2  ;;  %v2886_v5 = vmul.f32 %v3768_v56, %v3768_v56  ;;  %v3770_v2 = vld [vmem:[#allocation209_spill] sm:$0xff] }
 0x17e   :  { %3762 = vst [vmem:[#allocation196_spill] sm:$0xff] %v2870_v53  ;;  %v2890_v14 = vmul.f32 %v3770_v2, %v3770_v2  ;;  %v3772_v53 = vld [vmem:[#allocation210_spill] sm:$0xff] }
 0x17f   :  { %3764 = vst [vmem:[#allocation197_spill] sm:$0xff] %v2874_v46  ;;  %v2894_v30 = vmul.f32 %v3772_v53, %v3772_v53  ;;  %v3773_v46 = vld [vmem:[#allocation211_spill] sm:$0xff] }
 0x180   :  { %3766 = vst [vmem:[#allocation198_spill] sm:$0xff] %v2878_v3  ;;  %v2898_v59 = vmul.f32 %v3773_v46, %v3773_v46  ;;  %v3775_v3 = vld [vmem:[#allocation212_spill] sm:$0xff]  ;;  %v2918_v46 = vmul.f32 %v2242_v43, %v2242_v43 }
 0x181   :  { %3767 = vst [vmem:[#allocation199_spill] sm:$0xff] %v2882_v45  ;;  %v2902_v22 = vmul.f32 %v3775_v3, %v3775_v3  ;;  %v3777_v45 = vld [vmem:[#allocation214_spill] sm:$0xff] }
 0x182   :  { %3769 = vst [vmem:[#allocation200_spill] sm:$0xff] %v2886_v5  ;;  %v2906_v56 = vmul.f32 %v3777_v45, %v3777_v45  ;;  %v3779_v5 = vld [vmem:[#allocation215_spill] sm:$0xff] }
 0x183   :  { %3771 = vst [vmem:[#allocation201_spill] sm:$0xff] %v2890_v14  ;;  %v2910_v2 = vmul.f32 %v3779_v5, %v3779_v5  ;;  %v3781_v14 = vld [vmem:[#allocation216_spill] sm:$0xff]  ;;  %v2930_v5 = vmul.f32 %v2252_v17, %v2252_v17  ;;  %v2950_v17 = vmul.f32 %v2266_v54, %v2266_v54  ;;  %v2970_v54 = vmul.f32 %v2284_v55, %v2284_v55 }
 0x184   :  { %3774 = vst [vmem:[#allocation202_spill] sm:$0xff] %v2898_v59  ;;  %v2914_v53 = vmul.f32 %v3781_v14, %v3781_v14  ;;  %v3783_v59 = vld [vmem:[#allocation217_spill] sm:$0xff]  ;;  %v2934_v14 = vmul.f32 %v2254_v16, %v2254_v16  ;;  %v2954_v16 = vmul.f32 %v2272_v41, %v2272_v41  ;;  %v2974_v41 = vmul.f32 %v2286_v52, %v2286_v52 }
 0x185   :  { %3776 = vst [vmem:[#allocation203_spill] sm:$0xff] %v2902_v22  ;;  %v2922_v3 = vmul.f32 %v3783_v59, %v3783_v59  ;;  %v3785_v22 = vld [vmem:[#allocation218_spill] sm:$0xff]  ;;  %v2942_v59 = vmul.f32 %v2262_v26, %v2262_v26  ;;  %v2962_v26 = vmul.f32 %v2276_v33, %v2276_v33  ;;  %v2982_v33 = vmul.f32 %v2294_v23, %v2294_v23 }
 0x186   :  { %3778 = vst [vmem:[#allocation205_spill] sm:$0xff] %v2906_v56  ;;  %v2926_v45 = vmul.f32 %v3785_v22, %v3785_v22  ;;  %v2946_v22 = vmul.f32 %v2264_v0, %v2264_v0  ;;  %v2966_v0 = vmul.f32 %v2282_v4, %v2282_v4  ;;  %v2986_v4 = vmul.f32 %v2296_v27, %v2296_v27  ;;  %v3834_v56 = vld [vmem:[#allocation68_spill] sm:$0xff] }
 0x187   :  { %3780 = vst [vmem:[#allocation206_spill] sm:$0xff] %v2910_v2  ;;  %v3789_v2 = vld [vmem:[#allocation219_spill] sm:$0xff]  ;;  %v2990_v55 = vmul.f32 %v2302_v63, %v2302_v63  ;;  %v2994_v52 = vmul.f32 %v2304_v31, %v2304_v31  ;;  %v3002_v23 = vmul.f32 %v2312_v8, %v2312_v8  ;;  %v3006_v27 = vmul.f32 %v2314_v40, %v2314_v40  ;;  %v3812_v31 = vld [vmem:[#allocation13_spill] sm:$0xff] }
 0x188   :  { %3782 = vst [vmem:[#allocation207_spill] sm:$0xff] %v2918_v46  ;;  %v2938_v43 = vmul.f32 %v3789_v2, %v3789_v2  ;;  %v2958_v2 = vmul.f32 %v2274_v57, %v2274_v57  ;;  %v2978_v57 = vmul.f32 %v2292_v32, %v2292_v32  ;;  %v2998_v32 = vmul.f32 %v2306_v49, %v2306_v49  ;;  %v3815_v49 = vld [vmem:[#allocation23_spill] sm:$0xff]  ;;  %v3820_v40 = vld [vmem:[#allocation29_spill] sm:$0xff] }
 0x189   :  { %3784 = vst [vmem:[#allocation208_spill] sm:$0xff] %v2922_v3  ;;  %v3831_v3 = vld [vmem:[#allocation56_spill] sm:$0xff] }
 0x18a   :  { %3786 = vst [vmem:[#allocation209_spill] sm:$0xff] %v2926_v45 }
 0x18b   :  { %3787 = vst [vmem:[#allocation210_spill] sm:$0xff] %v2930_v5  ;;  %v3827_v5 = vld [vmem:[#allocation47_spill] sm:$0xff] }
 0x18c   :  { %3788 = vst [vmem:[#allocation211_spill] sm:$0xff] %v2934_v14  ;;  %v3824_v14 = vld [vmem:[#allocation35_spill] sm:$0xff] }
 0x18d   :  { %3790 = vst [vmem:[#allocation212_spill] sm:$0xff] %v2938_v43  ;;  %v3822_v43 = vld [vmem:[#allocation32_spill] sm:$0xff] }
 0x18e   :  { %3791 = vst [vmem:[#allocation214_spill] sm:$0xff] %v2942_v59  ;;  %v3821_v59 = vld [vmem:[#allocation17_spill] sm:$0xff] }
 0x18f   :  { %3792 = vst [vmem:[#allocation215_spill] sm:$0xff] %v2946_v22 }
 0x190   :  { %3793 = vst [vmem:[#allocation216_spill] sm:$0xff] %v2950_v17  ;;  %v3819_v17 = vld [vmem:[#allocation16_spill] sm:$0xff] }
 0x191   :  { %3794 = vst [vmem:[#allocation217_spill] sm:$0xff] %v2954_v16 }
 0x192   :  { %3795 = vst [vmem:[#allocation218_spill] sm:$0xff] %v2958_v2  ;;  %v3817_v2 = vld [vmem:[#allocation26_spill] sm:$0xff] }
 0x193   :  { %3796 = vst [vmem:[#allocation219_spill] sm:$0xff] %v2962_v26  ;;  %v3816_v26 = vld [vmem:[#allocation15_spill] sm:$0xff] }
 0x194   :  { %3797 = vst [vmem:[#allocation221_spill] sm:$0xff] %v2966_v0  ;;  %v1224_v8 = vadd.f32 %v3817_v2, %v3816_v26  ;;  %v3829_v2 = vld [vmem:[#allocation62_spill] sm:$0xff] }
 0x195   :  { %3798 = vst [vmem:[#allocation222_spill] sm:$0xff] %v2970_v54 }
 0x196   :  { %3799 = vst [vmem:[#allocation223_spill] sm:$0xff] %v2974_v41  ;;  %v3811_v41 = vld [vmem:[#allocation20_spill] sm:$0xff] }
 0x197   :  { %3800 = vst [vmem:[#allocation224_spill] sm:$0xff] %v2978_v57  ;;  %v3814_v57 = vld [vmem:[#allocation14_spill] sm:$0xff] }
 0x198   :  { %3801 = vst [vmem:[#allocation225_spill] sm:$0xff] %v2982_v33  ;;  %v3809_v33 = vld [vmem:[#allocation19_spill] sm:$0xff] }
 0x199   :  { %3802 = vst [vmem:[#allocation226_spill] sm:$0xff] %v2986_v4  ;;  %v3808_v4 = vld [vmem:[#allocation11_spill] sm:$0xff] }
 0x19a   :  { %3803 = vst [vmem:[#allocation227_spill] sm:$0xff] %v2990_v55  ;;  %v1100_v63 = vadd.f32 %v3809_v33, %v3808_v4  ;;  %v3810_v55 = vld [vmem:[#allocation12_spill] sm:$0xff]  ;;  %v1286_v33 = vadd.f32 %v3822_v43, %v3821_v59  ;;  %v3823_v4 = vld [vmem:[#allocation18_spill] sm:$0xff]  ;;  %v3833_v43 = vld [vmem:[#allocation65_spill] sm:$0xff] }
 0x19b   :  { %3804 = vst [vmem:[#allocation228_spill] sm:$0xff] %v2994_v52  ;;  %v1131_v54 = vadd.f32 %v3811_v41, %v3810_v55  ;;  %v3813_v52 = vld [vmem:[#allocation21_spill] sm:$0xff]  ;;  %v1317_v41 = vadd.f32 %v3824_v14, %v3823_v4  ;;  %v3835_v4 = vld [vmem:[#allocation71_spill] sm:$0xff] }
 0x19c   :  { %3805 = vst [vmem:[#allocation229_spill] sm:$0xff] %v2998_v32  ;;  %v1162_v0 = vadd.f32 %v3813_v52, %v3812_v31  ;;  %v1193_v32 = vadd.f32 %v3815_v49, %v3814_v57  ;;  %v3825_v55 = vld [vmem:[#allocation41_spill] sm:$0xff]  ;;  %v3826_v52 = vld [vmem:[#allocation44_spill] sm:$0xff]  ;;  %v3828_v49 = vld [vmem:[#allocation50_spill] sm:$0xff] }
 0x19d   :  { %3806 = vst [vmem:[#allocation230_spill] sm:$0xff] %v3002_v23  ;;  %v3818_v23 = vld [vmem:[#allocation38_spill] sm:$0xff]  ;;  %v1132_v22 = vadd.f32 %v1131_v54, %v3825_v55  ;;  %v1225_v45 = vadd.f32 %v1224_v8, %v3828_v49  ;;  %v3839_v49 = vld [vmem:[#allocation80_spill] sm:$0xff] }
 0x19e   :  { %3807 = vst [vmem:[#allocation231_spill] sm:$0xff] %v3006_v27  ;;  %v1101_v16 = vadd.f32 %v1100_v63, %v3818_v23  ;;  %v1255_v27 = vadd.f32 %v3820_v40, %v3819_v17  ;;  %v1163_v31 = vadd.f32 %v1162_v0, %v3826_v52  ;;  %v1194_v57 = vadd.f32 %v1193_v32, %v3827_v5  ;;  %v3830_v23 = vld [vmem:[#allocation53_spill] sm:$0xff]  ;;  %v3832_v40 = vld [vmem:[#allocation59_spill] sm:$0xff]  ;;  %v3836_v55 = vld [vmem:[#allocation74_spill] sm:$0xff] }
 0x19f   :  { %v1287_v17 = vadd.f32 %v1286_v33, %v3831_v3  ;;  %v1318_v46 = vadd.f32 %v1317_v41, %v3832_v40  ;;  %v1133_v59 = vadd.f32 %v1132_v22, %v3833_v43  ;;  %v1226_v0 = vadd.f32 %v1225_v45, %v3836_v55  ;;  %v3837_v52 = vld [vmem:[#allocation86_spill] sm:$0xff]  ;;  %v3838_v32 = vld [vmem:[#allocation77_spill] sm:$0xff]  ;;  %v3842_v33 = vld [vmem:[#allocation92_spill] sm:$0xff] }
 0x1a0   :  { %v1102_v26 = vadd.f32 %v1101_v16, %v3829_v2  ;;  %v1256_v63 = vadd.f32 %v1255_v27, %v3830_v23  ;;  %v1164_v14 = vadd.f32 %v1163_v31, %v3834_v56  ;;  %v1195_v54 = vadd.f32 %v1194_v57, %v3835_v4  ;;  %v3840_v2 = vld [vmem:[#allocation83_spill] sm:$0xff]  ;;  %v3841_v23 = vld [vmem:[#allocation89_spill] sm:$0xff]  ;;  %v3844_v43 = vld [vmem:[#allocation98_spill] sm:$0xff] }
 0x1a1   :  { %v1288_v16 = vadd.f32 %v1287_v17, %v3839_v49  ;;  %v1319_v27 = vadd.f32 %v1318_v46, %v3840_v2  ;;  %v1134_v3 = vadd.f32 %v1133_v59, %v3841_v23  ;;  %v3843_v40 = vld [vmem:[#allocation95_spill] sm:$0xff]  ;;  %v1227_v56 = vadd.f32 %v1226_v0, %v3844_v43  ;;  %v3845_v31 = vld [vmem:[#allocation22_spill] sm:$0xff]  ;;  %v3846_v4 = vld [vmem:[#allocation101_spill] sm:$0xff] }
 0x1a2   :  { %v1103_v5 = vadd.f32 %v1102_v26, %v3837_v52  ;;  %v1257_v8 = vadd.f32 %v1256_v63, %v3838_v32  ;;  %v1165_v41 = vadd.f32 %v1164_v14, %v3842_v33  ;;  %v1196_v22 = vadd.f32 %v1195_v54, %v3843_v40  ;;  %v3847_v55 = vld [vmem:[#allocation104_spill] sm:$0xff]  ;;  %v3849_v32 = vld [vmem:[#allocation114_spill] sm:$0xff]  ;;  %v3851_v2 = vld [vmem:[#allocation25_spill] sm:$0xff] }
 0x1a3   :  { %v1289_v26 = vadd.f32 %v1288_v16, %v3847_v55  ;;  %v3848_v52 = vld [vmem:[#allocation108_spill] sm:$0xff]  ;;  %v1135_v17 = vadd.f32 %v1134_v3, %v3849_v32  ;;  %v3852_v23 = vld [vmem:[#allocation123_spill] sm:$0xff]  ;;  %v3853_v33 = vld [vmem:[#allocation30_spill] sm:$0xff] }
 0x1a4   :  { %v1104_v57 = vadd.f32 %v1103_v5, %v3845_v31  ;;  %v1258_v45 = vadd.f32 %v1257_v8, %v3846_v4  ;;  %v1320_v63 = vadd.f32 %v1319_v27, %v3848_v52  ;;  %v3850_v49 = vld [vmem:[#allocation24_spill] sm:$0xff]  ;;  %v1197_v59 = vadd.f32 %v1196_v22, %v3851_v2  ;;  %v3854_v40 = vld [vmem:[#allocation27_spill] sm:$0xff]  ;;  %v3858_v55 = vld [vmem:[#allocation141_spill] sm:$0xff] }
 0x1a5   :  { %v1166_v46 = vadd.f32 %v1165_v41, %v3850_v49  ;;  %v1228_v14 = vadd.f32 %v1227_v56, %v3852_v23  ;;  %v3855_v43 = vld [vmem:[#allocation28_spill] sm:$0xff]  ;;  %v3857_v4 = vld [vmem:[#allocation31_spill] sm:$0xff]  ;;  %v3859_v52 = vld [vmem:[#allocation33_spill] sm:$0xff] }
 0x1a6   :  { %v1105_v54 = vadd.f32 %v1104_v57, %v3853_v33  ;;  %v1259_v0 = vadd.f32 %v1258_v45, %v3854_v40  ;;  %v1290_v5 = vadd.f32 %v1289_v26, %v3855_v43  ;;  %v3856_v31 = vld [vmem:[#allocation132_spill] sm:$0xff]  ;;  %v1136_v16 = vadd.f32 %v1135_v17, %v3857_v4  ;;  %v3860_v32 = vld [vmem:[#allocation34_spill] sm:$0xff]  ;;  %v3861_v49 = vld [vmem:[#allocation159_spill] sm:$0xff] }
 0x1a7   :  { %v1321_v8 = vadd.f32 %v1320_v63, %v3856_v31  ;;  %v1167_v27 = vadd.f32 %v1166_v46, %v3858_v55  ;;  %v1198_v3 = vadd.f32 %v1197_v59, %v3859_v52  ;;  %v1229_v41 = vadd.f32 %v1228_v14, %v3860_v32  ;;  %v3862_v2 = vld [vmem:[#allocation150_spill] sm:$0xff]  ;;  %v3863_v23 = vld [vmem:[#allocation36_spill] sm:$0xff]  ;;  %v3864_v33 = vld [vmem:[#allocation37_spill] sm:$0xff] }
 0x1a8   :  { %v1106_v22 = vadd.f32 %v1105_v54, %v3861_v49  ;;  %v1260_v56 = vadd.f32 %v1259_v0, %v3862_v2  ;;  %v1291_v57 = vadd.f32 %v1290_v5, %v3863_v23  ;;  %v3865_v40 = vld [vmem:[#allocation39_spill] sm:$0xff]  ;;  %v3866_v43 = vld [vmem:[#allocation40_spill] sm:$0xff]  ;;  %v3868_v4 = vld [vmem:[#allocation42_spill] sm:$0xff] }
 0x1a9   :  { %v1322_v45 = vadd.f32 %v1321_v8, %v3864_v33  ;;  %v1137_v26 = vadd.f32 %v1136_v16, %v3865_v40  ;;  %v1168_v63 = vadd.f32 %v1167_v27, %v3866_v43  ;;  %v3867_v31 = vld [vmem:[#allocation168_spill] sm:$0xff]  ;;  %v1230_v46 = vadd.f32 %v1229_v41, %v3868_v4  ;;  %v3869_v55 = vld [vmem:[#allocation46_spill] sm:$0xff]  ;;  %v3870_v52 = vld [vmem:[#allocation43_spill] sm:$0xff] }
 0x1aa   :  { %v1199_v17 = vadd.f32 %v1198_v3, %v3867_v31  ;;  %v1107_v59 = vadd.f32 %v1106_v22, %v3869_v55  ;;  %v1261_v14 = vadd.f32 %v1260_v56, %v3870_v52  ;;  %v3871_v32 = vld [vmem:[#allocation177_spill] sm:$0xff]  ;;  %v3873_v2 = vld [vmem:[#allocation186_spill] sm:$0xff]  ;;  %v3874_v23 = vld [vmem:[#allocation48_spill] sm:$0xff] }
 0x1ab   :  { %v1292_v54 = vadd.f32 %v1291_v57, %v3871_v32  ;;  %v3872_v49 = vld [vmem:[#allocation45_spill] sm:$0xff]  ;;  %v1138_v5 = vadd.f32 %v1137_v26, %v3873_v2  ;;  %v1169_v8 = vadd.f32 %v1168_v63, %v3874_v23  ;;  %v3876_v40 = vld [vmem:[#allocation195_spill] sm:$0xff]  ;;  %v3877_v43 = vld [vmem:[#allocation54_spill] sm:$0xff] }
 0x1ac   :  { %v1323_v0 = vadd.f32 %v1322_v45, %v3872_v49  ;;  %v3875_v33 = vld [vmem:[#allocation49_spill] sm:$0xff]  ;;  %v1231_v27 = vadd.f32 %v1230_v46, %v3876_v40  ;;  %v1108_v3 = vadd.f32 %v1107_v59, %v3877_v43  ;;  %v3878_v31 = vld [vmem:[#allocation51_spill] sm:$0xff]  ;;  %v3879_v4 = vld [vmem:[#allocation52_spill] sm:$0xff] }
 0x1ad   :  { %v1200_v16 = vadd.f32 %v1199_v17, %v3875_v33  ;;  %v1262_v41 = vadd.f32 %v1261_v14, %v3878_v31  ;;  %v1293_v22 = vadd.f32 %v1292_v54, %v3879_v4  ;;  %v3880_v55 = vld [vmem:[#allocation204_spill] sm:$0xff]  ;;  %v3881_v52 = vld [vmem:[#allocation55_spill] sm:$0xff]  ;;  %v3882_v32 = vld [vmem:[#allocation213_spill] sm:$0xff] }
 0x1ae   :  { %v1324_v56 = vadd.f32 %v1323_v0, %v3880_v55  ;;  %v1139_v57 = vadd.f32 %v1138_v5, %v3881_v52  ;;  %v1170_v45 = vadd.f32 %v1169_v8, %v3882_v32  ;;  %v3883_v49 = vld [vmem:[#allocation57_spill] sm:$0xff]  ;;  %v3884_v2 = vld [vmem:[#allocation58_spill] sm:$0xff]  ;;  %v1109_v17 = vadd.f32 %v1108_v3, %v2290_v37  ;;  %v3885_v23 = vld [vmem:[#allocation220_spill] sm:$0xff] }
 0x1af   :  { %v1201_v26 = vadd.f32 %v1200_v16, %v3883_v49  ;;  %v1232_v63 = vadd.f32 %v1231_v27, %v3884_v2  ;;  %v1263_v46 = vadd.f32 %v1262_v41, %v3885_v23  ;;  %v1294_v59 = vadd.f32 %v1293_v22, %v2270_v1  ;;  %v3886_v33 = vld [vmem:[#allocation60_spill] sm:$0xff]  ;;  %v3887_v3 = vld [vmem:[#allocation61_spill] sm:$0xff]  ;;  %v3888_v31 = vld [vmem:[#allocation63_spill] sm:$0xff] }
 0x1b0   :  { %v1325_v14 = vadd.f32 %v1324_v56, %v3886_v33  ;;  %v1140_v54 = vadd.f32 %v1139_v57, %v2300_v42  ;;  %v1171_v0 = vadd.f32 %v1170_v45, %v2310_v35  ;;  %v1110_v16 = vadd.f32 %v1109_v17, %v2338_v50  ;;  %v3889_v41 = vld [vmem:[#allocation64_spill] sm:$0xff]  ;;  %v3890_v4 = vld [vmem:[#allocation66_spill] sm:$0xff]  ;;  %v3891_v22 = vld [vmem:[#allocation67_spill] sm:$0xff] }
 0x1b1   :  { %v1202_v5 = vadd.f32 %v1201_v26, %v2318_v13  ;;  %v1233_v8 = vadd.f32 %v1232_v63, %v2322_v24  ;;  %v1264_v40 = vadd.f32 %v1263_v46, %v2326_v44  ;;  %v1295_v37 = vadd.f32 %v1294_v59, %v2330_v48  ;;  %v3892_v55 = vld [vmem:[#allocation69_spill] sm:$0xff]  ;;  %v3893_v56 = vld [vmem:[#allocation70_spill] sm:$0xff]  ;;  %v3894_v52 = vld [vmem:[#allocation72_spill] sm:$0xff] }
 0x1b2   :  { %v1326_v27 = vadd.f32 %v1325_v14, %v2334_v18  ;;  %v1141_v1 = vadd.f32 %v1140_v54, %v2342_v21  ;;  %v1172_v43 = vadd.f32 %v1171_v0, %v2346_v36  ;;  %v1111_v13 = vadd.f32 %v1110_v16, %v2370_v34  ;;  %v3895_v32 = vld [vmem:[#allocation73_spill] sm:$0xff]  ;;  %v3896_v49 = vld [vmem:[#allocation75_spill] sm:$0xff]  ;;  %v3897_v63 = vld [vmem:[#allocation76_spill] sm:$0xff] }
 0x1b3   :  { %v1203_v42 = vadd.f32 %v1202_v5, %v2350_v51  ;;  %v1234_v35 = vadd.f32 %v1233_v8, %v2354_v9  ;;  %v1265_v24 = vadd.f32 %v1264_v40, %v3887_v3  ;;  %v1296_v50 = vadd.f32 %v1295_v37, %v3888_v31  ;;  %v3898_v23 = vld [vmem:[#allocation78_spill] sm:$0xff]  ;;  %v3899_v59 = vld [vmem:[#allocation79_spill] sm:$0xff]  ;;  %v3900_v33 = vld [vmem:[#allocation81_spill] sm:$0xff] }
 0x1b4   :  { %v1327_v44 = vadd.f32 %v1326_v27, %v3889_v41  ;;  %v1142_v48 = vadd.f32 %v1141_v1, %v3890_v4  ;;  %v1173_v18 = vadd.f32 %v1172_v43, %v2378_v39  ;;  %v1112_v51 = vadd.f32 %v1111_v13, %v2402_v10  ;;  %v3901_v54 = vld [vmem:[#allocation82_spill] sm:$0xff]  ;;  %v3902_v5 = vld [vmem:[#allocation84_spill] sm:$0xff]  ;;  %v3903_v16 = vld [vmem:[#allocation85_spill] sm:$0xff] }
 0x1b5   :  { %v1204_v21 = vadd.f32 %v1203_v42, %v3891_v22  ;;  %v1235_v36 = vadd.f32 %v1234_v35, %v3892_v55  ;;  %v1266_v9 = vadd.f32 %v1265_v24, %v2390_v62  ;;  %v1297_v34 = vadd.f32 %v1296_v50, %v3893_v56  ;;  %v3904_v37 = vld [vmem:[#allocation87_spill] sm:$0xff]  ;;  %v3905_v1 = vld [vmem:[#allocation88_spill] sm:$0xff]  ;;  %v3906_v43 = vld [vmem:[#allocation90_spill] sm:$0xff] }
 0x1b6   :  { %v1328_v57 = vadd.f32 %v1327_v44, %v3894_v52  ;;  %v1143_v45 = vadd.f32 %v1142_v48, %v3895_v32  ;;  %v1174_v26 = vadd.f32 %v1173_v18, %v3896_v49  ;;  %v1113_v17 = vadd.f32 %v1112_v51, %v2434_v15  ;;  %v3907_v35 = vld [vmem:[#allocation91_spill] sm:$0xff]  ;;  %v3908_v3 = vld [vmem:[#allocation93_spill] sm:$0xff]  ;;  %v3909_v31 = vld [vmem:[#allocation94_spill] sm:$0xff] }
 0x1b7   :  { %v1205_v2 = vadd.f32 %v1204_v21, %v2414_v25  ;;  %v1236_v39 = vadd.f32 %v1235_v36, %v3897_v63  ;;  %v1267_v46 = vadd.f32 %v1266_v9, %v3898_v23  ;;  %v1298_v10 = vadd.f32 %v1297_v34, %v3899_v59  ;;  %v3910_v50 = vld [vmem:[#allocation96_spill] sm:$0xff]  ;;  %v3911_v4 = vld [vmem:[#allocation97_spill] sm:$0xff]  ;;  %v3912_v18 = vld [vmem:[#allocation99_spill] sm:$0xff] }
 0x1b8   :  { %v1329_v62 = vadd.f32 %v1328_v57, %v3900_v33  ;;  %v1144_v14 = vadd.f32 %v1143_v45, %v2438_v11  ;;  %v1175_v0 = vadd.f32 %v1174_v26, %v3901_v54  ;;  %v1114_v25 = vadd.f32 %v1113_v17, %v2466_v7  ;;  %v3913_v22 = vld [vmem:[#allocation100_spill] sm:$0xff]  ;;  %v3914_v55 = vld [vmem:[#allocation102_spill] sm:$0xff]  ;;  %v3915_v51 = vld [vmem:[#allocation103_spill] sm:$0xff] }
 0x1b9   :  { %v1206_v8 = vadd.f32 %v1205_v2, %v3902_v5  ;;  %v1237_v40 = vadd.f32 %v1236_v39, %v3903_v16  ;;  %v1268_v27 = vadd.f32 %v1267_v46, %v3904_v37  ;;  %v1299_v15 = vadd.f32 %v1298_v10, %v3905_v1  ;;  %v3916_v56 = vld [vmem:[#allocation105_spill] sm:$0xff]  ;;  %v3917_v52 = vld [vmem:[#allocation106_spill] sm:$0xff]  ;;  %v3918_v32 = vld [vmem:[#allocation111_spill] sm:$0xff] }
 0x1ba   :  { %v1330_v42 = vadd.f32 %v1329_v62, %v3906_v43  ;;  %v1145_v13 = vadd.f32 %v1144_v14, %v3907_v35  ;;  %v1176_v24 = vadd.f32 %v1175_v0, %v3908_v3  ;;  %v1115_v44 = vadd.f32 %v1114_v25, %v2498_v6  ;;  %v3919_v49 = vld [vmem:[#allocation107_spill] sm:$0xff]  ;;  %v3920_v2 = vld [vmem:[#allocation109_spill] sm:$0xff]  ;;  %v3921_v63 = vld [vmem:[#allocation110_spill] sm:$0xff] }
 0x1bb   :  { %v1207_v11 = vadd.f32 %v1206_v8, %v3909_v31  ;;  %v1238_v41 = vadd.f32 %v1237_v40, %v3910_v50  ;;  %v1269_v48 = vadd.f32 %v1268_v27, %v3911_v4  ;;  %v1300_v7 = vadd.f32 %v1299_v15, %v3912_v18  ;;  %v3922_v23 = vld [vmem:[#allocation112_spill] sm:$0xff]  ;;  %v3923_v59 = vld [vmem:[#allocation113_spill] sm:$0xff]  ;;  %v3924_v33 = vld [vmem:[#allocation115_spill] sm:$0xff] }
 0x1bc   :  { %v1331_v21 = vadd.f32 %v1330_v42, %v3913_v22  ;;  %v1146_v36 = vadd.f32 %v1145_v13, %v3914_v55  ;;  %v1177_v9 = vadd.f32 %v1176_v24, %v3915_v51  ;;  %v1116_v45 = vadd.f32 %v1115_v44, %v3918_v32  ;;  %v3925_v14 = vld [vmem:[#allocation119_spill] sm:$0xff]  ;;  %v3926_v0 = vld [vmem:[#allocation116_spill] sm:$0xff]  ;;  %v3927_v8 = vld [vmem:[#allocation117_spill] sm:$0xff] }
 0x1bd   :  { %v1208_v34 = vadd.f32 %v1207_v11, %v3916_v56  ;;  %v1239_v57 = vadd.f32 %v1238_v41, %v3917_v52  ;;  %v1270_v26 = vadd.f32 %v1269_v48, %v3919_v49  ;;  %v1301_v6 = vadd.f32 %v1300_v7, %v3920_v2  ;;  %v3928_v40 = vld [vmem:[#allocation118_spill] sm:$0xff]  ;;  %v3929_v37 = vld [vmem:[#allocation120_spill] sm:$0xff]  ;;  %v3930_v15 = vld [vmem:[#allocation121_spill] sm:$0xff] }
 0x1be   :  { %v1332_v39 = vadd.f32 %v1331_v21, %v3921_v63  ;;  %v1147_v17 = vadd.f32 %v1146_v36, %v2534_v19  ;;  %v1178_v46 = vadd.f32 %v1177_v9, %v3922_v23  ;;  %v1117_v54 = vadd.f32 %v1116_v45, %v3925_v14  ;;  %v3931_v43 = vld [vmem:[#allocation122_spill] sm:$0xff]  ;;  %v3932_v35 = vld [vmem:[#allocation127_spill] sm:$0xff]  ;;  %v3933_v3 = vld [vmem:[#allocation124_spill] sm:$0xff] }
 0x1bf   :  { %v1209_v10 = vadd.f32 %v1208_v34, %v3923_v59  ;;  %v1240_v62 = vadd.f32 %v1239_v57, %v3924_v33  ;;  %v1271_v5 = vadd.f32 %v1270_v26, %v3926_v0  ;;  %v1302_v16 = vadd.f32 %v1301_v6, %v3927_v8  ;;  %v3934_v31 = vld [vmem:[#allocation125_spill] sm:$0xff]  ;;  %v3935_v50 = vld [vmem:[#allocation126_spill] sm:$0xff]  ;;  %v3936_v44 = vld [vmem:[#allocation128_spill] sm:$0xff] }
 0x1c0   :  { %v1333_v25 = vadd.f32 %v1332_v39, %v3928_v40  ;;  %v1148_v27 = vadd.f32 %v1147_v17, %v3929_v37  ;;  %v1179_v1 = vadd.f32 %v1178_v46, %v2570_v29  ;;  %v1118_v13 = vadd.f32 %v1117_v54, %v3932_v35  ;;  %v3937_v48 = vld [vmem:[#allocation129_spill] sm:$0xff]  ;;  %v3938_v22 = vld [vmem:[#allocation130_spill] sm:$0xff]  ;;  %v3939_v21 = vld [vmem:[#allocation135_spill] sm:$0xff] }
 0x1c1   :  { %v1210_v19 = vadd.f32 %v1209_v10, %v3930_v15  ;;  %v1241_v42 = vadd.f32 %v1240_v62, %v3931_v43  ;;  %v1272_v24 = vadd.f32 %v1271_v5, %v3933_v3  ;;  %v1303_v11 = vadd.f32 %v1302_v16, %v3934_v31  ;;  %v3940_v36 = vld [vmem:[#allocation131_spill] sm:$0xff]  ;;  %v3941_v9 = vld [vmem:[#allocation133_spill] sm:$0xff]  ;;  %v3942_v34 = vld [vmem:[#allocation134_spill] sm:$0xff] }
 0x1c2   :  { %v1334_v41 = vadd.f32 %v1333_v25, %v3935_v50  ;;  %v1149_v4 = vadd.f32 %v1148_v27, %v3936_v44  ;;  %v1180_v18 = vadd.f32 %v1179_v1, %v3937_v48  ;;  %v1119_v55 = vadd.f32 %v1118_v13, %v3939_v21  ;;  %v3943_v57 = vld [vmem:[#allocation136_spill] sm:$0xff]  ;;  %v3944_v45 = vld [vmem:[#allocation137_spill] sm:$0xff]  ;;  %v3945_v26 = vld [vmem:[#allocation138_spill] sm:$0xff] }
 0x1c3   :  { %v1211_v7 = vadd.f32 %v1210_v19, %v2606_v61  ;;  %v1242_v29 = vadd.f32 %v1241_v42, %v3938_v22  ;;  %v1273_v51 = vadd.f32 %v1272_v24, %v3940_v36  ;;  %v1304_v56 = vadd.f32 %v1303_v11, %v3941_v9  ;;  %v3946_v63 = vld [vmem:[#allocation143_spill] sm:$0xff]  ;;  %v3948_v23 = vld [vmem:[#allocation140_spill] sm:$0xff]  ;;  %v3949_v59 = vld [vmem:[#allocation142_spill] sm:$0xff] }
 0x1c4   :  { %v1335_v52 = vadd.f32 %v1334_v41, %v3942_v34  ;;  %v1150_v32 = vadd.f32 %v1149_v4, %v3943_v57  ;;  %v1181_v49 = vadd.f32 %v1180_v18, %v3944_v45  ;;  %v1120_v61 = vadd.f32 %v1119_v55, %v3946_v63  ;;  %v3947_v39 = vld [vmem:[#allocation139_spill] sm:$0xff]  ;;  %v3950_v33 = vld [vmem:[#allocation144_spill] sm:$0xff]  ;;  %v3951_v14 = vld [vmem:[#allocation145_spill] sm:$0xff] }
 0x1c5   :  { %v1212_v2 = vadd.f32 %v1211_v7, %v3945_v26  ;;  %v1243_v6 = vadd.f32 %v1242_v29, %v2642_v60  ;;  %v1274_v17 = vadd.f32 %v1273_v51, %v3947_v39  ;;  %v1305_v46 = vadd.f32 %v1304_v56, %v3948_v23  ;;  %v3952_v0 = vld [vmem:[#allocation146_spill] sm:$0xff]  ;;  %v3953_v8 = vld [vmem:[#allocation147_spill] sm:$0xff]  ;;  %v3954_v25 = vld [vmem:[#allocation148_spill] sm:$0xff] }
 0x1c6   :  { %v1336_v10 = vadd.f32 %v1335_v52, %v3949_v59  ;;  %v1151_v62 = vadd.f32 %v1150_v32, %v3950_v33  ;;  %v1182_v54 = vadd.f32 %v1181_v49, %v3951_v14  ;;  %v1121_v40 = vadd.f32 %v1120_v61, %v2690_v28  ;;  %v3955_v37 = vld [vmem:[#allocation149_spill] sm:$0xff]  ;;  %v3956_v1 = vld [vmem:[#allocation151_spill] sm:$0xff]  ;;  %v3957_v19 = vld [vmem:[#allocation152_spill] sm:$0xff] }
 0x1c7   :  { %v1213_v5 = vadd.f32 %v1212_v2, %v3952_v0  ;;  %v1244_v16 = vadd.f32 %v1243_v6, %v3953_v8  ;;  %v1275_v60 = vadd.f32 %v1274_v17, %v3954_v25  ;;  %v1306_v27 = vadd.f32 %v1305_v46, %v3955_v37  ;;  %v3958_v42 = vld [vmem:[#allocation153_spill] sm:$0xff]  ;;  %v3959_v13 = vld [vmem:[#allocation154_spill] sm:$0xff]  ;;  %v3960_v24 = vld [vmem:[#allocation155_spill] sm:$0xff] }
 0x1c8   :  { %v1337_v15 = vadd.f32 %v1336_v10, %v3956_v1  ;;  %v1152_v43 = vadd.f32 %v1151_v62, %v3957_v19  ;;  %v1183_v35 = vadd.f32 %v1182_v54, %v3958_v42  ;;  %v1122_v11 = vadd.f32 %v1121_v40, %v2722_v58  ;;  %v3961_v50 = vld [vmem:[#allocation156_spill] sm:$0xff]  ;;  %v3962_v44 = vld [vmem:[#allocation157_spill] sm:$0xff]  ;;  %v3963_v4 = vld [vmem:[#allocation158_spill] sm:$0xff] }
 0x1c9   :  { %v1214_v3 = vadd.f32 %v1213_v5, %v3959_v13  ;;  %v1245_v31 = vadd.f32 %v1244_v16, %v3960_v24  ;;  %v1276_v41 = vadd.f32 %v1275_v60, %v3961_v50  ;;  %v1307_v28 = vadd.f32 %v1306_v27, %v3962_v44  ;;  %v3964_v18 = vld [vmem:[#allocation160_spill] sm:$0xff]  ;;  %v3965_v22 = vld [vmem:[#allocation161_spill] sm:$0xff]  ;;  %v3966_v21 = vld [vmem:[#allocation162_spill] sm:$0xff] }
 0x1ca   :  { %v1338_v48 = vadd.f32 %v1337_v15, %v3963_v4  ;;  %v1153_v7 = vadd.f32 %v1152_v43, %v3964_v18  ;;  %v1184_v29 = vadd.f32 %v1183_v35, %v3965_v22  ;;  %v3967_v36 = vld [vmem:[#allocation163_spill] sm:$0xff]  ;;  %v1123_v9 = vadd.f32 %v1122_v11, %v2754_v47  ;;  %v3968_v56 = vld [vmem:[#allocation164_spill] sm:$0xff]  ;;  %v3969_v52 = vld [vmem:[#allocation165_spill] sm:$0xff] }
 0x1cb   :  { %v1215_v55 = vadd.f32 %v1214_v3, %v3966_v21  ;;  %v1246_v51 = vadd.f32 %v1245_v31, %v3967_v36  ;;  %v1277_v34 = vadd.f32 %v1276_v41, %v3968_v56  ;;  %v1308_v58 = vadd.f32 %v1307_v28, %v3969_v52  ;;  %v3970_v57 = vld [vmem:[#allocation166_spill] sm:$0xff]  ;;  %v3971_v45 = vld [vmem:[#allocation167_spill] sm:$0xff]  ;;  %v3972_v26 = vld [vmem:[#allocation169_spill] sm:$0xff] }
 0x1cc   :  { %v1339_v32 = vadd.f32 %v1338_v48, %v3970_v57  ;;  %v1154_v49 = vadd.f32 %v1153_v7, %v3971_v45  ;;  %v1185_v2 = vadd.f32 %v1184_v29, %v3972_v26  ;;  %v3973_v6 = vld [vmem:[#allocation170_spill] sm:$0xff]  ;;  %v3974_v61 = vld [vmem:[#allocation171_spill] sm:$0xff]  ;;  %v1124_v17 = vadd.f32 %v1123_v9, %v2786_v12  ;;  %v3975_v23 = vld [vmem:[#allocation172_spill] sm:$0xff] }
 0x1cd   :  { %v1216_v63 = vadd.f32 %v1215_v55, %v3973_v6  ;;  %v1247_v39 = vadd.f32 %v1246_v51, %v3974_v61  ;;  %v1278_v46 = vadd.f32 %v1277_v34, %v3975_v23  ;;  %v3976_v59 = vld [vmem:[#allocation173_spill] sm:$0xff]  ;;  %v3977_v10 = vld [vmem:[#allocation174_spill] sm:$0xff]  ;;  %v3978_v62 = vld [vmem:[#allocation175_spill] sm:$0xff] }
 0x1ce   :  { %v1309_v47 = vadd.f32 %v1308_v58, %v3976_v59  ;;  %v1340_v33 = vadd.f32 %v1339_v32, %v3977_v10  ;;  %v1155_v14 = vadd.f32 %v1154_v49, %v3978_v62  ;;  %v3979_v54 = vld [vmem:[#allocation176_spill] sm:$0xff]  ;;  %v3980_v5 = vld [vmem:[#allocation178_spill] sm:$0xff]  ;;  %v3981_v16 = vld [vmem:[#allocation179_spill] sm:$0xff] }
 0x1cf   :  { %v1186_v0 = vadd.f32 %v1185_v2, %v3979_v54  ;;  %v1217_v8 = vadd.f32 %v1216_v63, %v3980_v5  ;;  %v1248_v40 = vadd.f32 %v1247_v39, %v3981_v16  ;;  %v3982_v25 = vld [vmem:[#allocation183_spill] sm:$0xff]  ;;  %v3983_v37 = vld [vmem:[#allocation180_spill] sm:$0xff]  ;;  %v3984_v1 = vld [vmem:[#allocation181_spill] sm:$0xff] }
 0x1d0   :  { %v1125_v60 = vadd.f32 %v1124_v17, %v3982_v25  ;;  %v1279_v27 = vadd.f32 %v1278_v46, %v3983_v37  ;;  %v1310_v12 = vadd.f32 %v1309_v47, %v3984_v1  ;;  %v3985_v15 = vld [vmem:[#allocation182_spill] sm:$0xff]  ;;  %v1156_v43 = vadd.f32 %v1155_v14, %v2822_v20  ;;  %v3986_v42 = vld [vmem:[#allocation184_spill] sm:$0xff]  ;;  %v3987_v13 = vld [vmem:[#allocation185_spill] sm:$0xff] }
 0x1d1   :  { %v1341_v19 = vadd.f32 %v1340_v33, %v3985_v15  ;;  %v1187_v35 = vadd.f32 %v1186_v0, %v3986_v42  ;;  %v1218_v3 = vadd.f32 %v1217_v8, %v3987_v13  ;;  %v3988_v24 = vld [vmem:[#allocation187_spill] sm:$0xff]  ;;  %v3990_v41 = vld [vmem:[#allocation188_spill] sm:$0xff]  ;;  %v3991_v28 = vld [vmem:[#allocation189_spill] sm:$0xff] }
 0x1d2   :  { %v1249_v31 = vadd.f32 %v1248_v40, %v3988_v24  ;;  %v3989_v11 = vld [vmem:[#allocation191_spill] sm:$0xff]  ;;  %v1280_v44 = vadd.f32 %v1279_v27, %v3990_v41  ;;  %v1311_v4 = vadd.f32 %v1310_v12, %v3991_v28  ;;  %v3992_v48 = vld [vmem:[#allocation190_spill] sm:$0xff]  ;;  %v3993_v7 = vld [vmem:[#allocation192_spill] sm:$0xff] }
 0x1d3   :  { %v1126_v50 = vadd.f32 %v1125_v60, %v3989_v11  ;;  %v1342_v18 = vadd.f32 %v1341_v19, %v3992_v48  ;;  %v1157_v22 = vadd.f32 %v1156_v43, %v3993_v7  ;;  %v1188_v29 = vadd.f32 %v1187_v35, %v2858_v38  ;;  %v3994_v21 = vld [vmem:[#allocation193_spill] sm:$0xff]  ;;  %v3995_v55 = vld [vmem:[#allocation194_spill] sm:$0xff]  ;;  %v3996_v51 = vld [vmem:[#allocation199_spill] sm:$0xff] }
 0x1d4   :  { %v1219_v20 = vadd.f32 %v1218_v3, %v3994_v21  ;;  %v1250_v36 = vadd.f32 %v1249_v31, %v3995_v55  ;;  %v3997_v56 = vld [vmem:[#allocation196_spill] sm:$0xff]  ;;  %v3998_v52 = vld [vmem:[#allocation197_spill] sm:$0xff]  ;;  %v3999_v57 = vld [vmem:[#allocation198_spill] sm:$0xff] }
 0x1d5   :  { %v1127_v9 = vadd.f32 %v1126_v50, %v3996_v51  ;;  %v1281_v34 = vadd.f32 %v1280_v44, %v3997_v56  ;;  %v1312_v58 = vadd.f32 %v1311_v4, %v3998_v52  ;;  %v1343_v32 = vadd.f32 %v1342_v18, %v3999_v57  ;;  %v4000_v45 = vld [vmem:[#allocation200_spill] sm:$0xff]  ;;  %v4001_v26 = vld [vmem:[#allocation201_spill] sm:$0xff]  ;;  %v4002_v63 = vld [vmem:[#allocation202_spill] sm:$0xff] }
 0x1d6   :  { %v1158_v49 = vadd.f32 %v1157_v22, %v4000_v45  ;;  %v1189_v2 = vadd.f32 %v1188_v29, %v4001_v26  ;;  %v1220_v6 = vadd.f32 %v1219_v20, %v2894_v30  ;;  %v1251_v38 = vadd.f32 %v1250_v36, %v4002_v63  ;;  %v4003_v39 = vld [vmem:[#allocation203_spill] sm:$0xff]  ;;  %v4004_v23 = vld [vmem:[#allocation205_spill] sm:$0xff]  ;;  %v4005_v59 = vld [vmem:[#allocation206_spill] sm:$0xff] }
 0x1d7   :  { %v1128_v61 = vadd.f32 %v1127_v9, %v2914_v53  ;;  %v1282_v17 = vadd.f32 %v1281_v34, %v4003_v39  ;;  %v1313_v46 = vadd.f32 %v1312_v58, %v4004_v23  ;;  %v1344_v47 = vadd.f32 %v1343_v32, %v4005_v59  ;;  %v4006_v10 = vld [vmem:[#allocation207_spill] sm:$0xff]  ;;  %v4007_v62 = vld [vmem:[#allocation208_spill] sm:$0xff]  ;;  %v4008_v54 = vld [vmem:[#allocation209_spill] sm:$0xff] }
 0x1d8   :  { %v1159_v33 = vadd.f32 %v1158_v49, %v4006_v10  ;;  %v1190_v14 = vadd.f32 %v1189_v2, %v4007_v62  ;;  %v1221_v0 = vadd.f32 %v1220_v6, %v4008_v54  ;;  %v4009_v5 = vld [vmem:[#allocation210_spill] sm:$0xff]  ;;  %v4010_v16 = vld [vmem:[#allocation215_spill] sm:$0xff]  ;;  %v4012_v60 = vld [vmem:[#allocation212_spill] sm:$0xff] }
 0x1d9   :  { %v1252_v8 = vadd.f32 %v1251_v38, %v4009_v5  ;;  %v1129_v30 = vadd.f32 %v1128_v61, %v4010_v16  ;;  %v4011_v40 = vld [vmem:[#allocation211_spill] sm:$0xff]  ;;  %v1314_v53 = vadd.f32 %v1313_v46, %v4012_v60  ;;  %v4013_v37 = vld [vmem:[#allocation214_spill] sm:$0xff]  ;;  %v4014_v1 = vld [vmem:[#allocation216_spill] sm:$0xff] }
 0x1da   :  { %v1283_v25 = vadd.f32 %v1282_v17, %v4011_v40  ;;  %v1345_v27 = vadd.f32 %v1344_v47, %v4013_v37  ;;  %v1160_v12 = vadd.f32 %v1159_v33, %v4014_v1  ;;  %v4015_v15 = vld [vmem:[#allocation217_spill] sm:$0xff]  ;;  %v4016_v43 = vld [vmem:[#allocation218_spill] sm:$0xff]  ;;  %v4017_v35 = vld [vmem:[#allocation219_spill] sm:$0xff] }
 0x1db   :  { %v1191_v19 = vadd.f32 %v1190_v14, %v4015_v15  ;;  %v1222_v42 = vadd.f32 %v1221_v0, %v4016_v43  ;;  %v1253_v13 = vadd.f32 %v1252_v8, %v4017_v35  ;;  %v4018_v3 = vld [vmem:[#allocation224_spill] sm:$0xff]  ;;  %v4019_v31 = vld [vmem:[#allocation221_spill] sm:$0xff]  ;;  %v4020_v50 = vld [vmem:[#allocation222_spill] sm:$0xff] }
 0x1dc   :  { %v1130_v24 = vadd.f32 %v1129_v30, %v4018_v3  ;;  %v1284_v11 = vadd.f32 %v1283_v25, %v4019_v31  ;;  %v1315_v41 = vadd.f32 %v1314_v53, %v4020_v50  ;;  %v4021_v44 = vld [vmem:[#allocation223_spill] sm:$0xff]  ;;  %v4022_v4 = vld [vmem:[#allocation225_spill] sm:$0xff]  ;;  %v4023_v18 = vld [vmem:[#allocation226_spill] sm:$0xff] }
 0x1dd   :  { %v1346_v28 = vadd.f32 %v1345_v27, %v4021_v44  ;;  %v1161_v48 = vadd.f32 %v1160_v12, %v4022_v4  ;;  %v1192_v7 = vadd.f32 %v1191_v19, %v4023_v18  ;;  %v4024_v22 = vld [vmem:[#allocation227_spill] sm:$0xff]  ;;  %v4025_v21 = vld [vmem:[#allocation228_spill] sm:$0xff]  ;;  %v4026_v55 = vld [vmem:[#allocation229_spill] sm:$0xff] }
 0x1de   :  { %v1223_v29 = vadd.f32 %v1222_v42, %v4024_v22  ;;  %v1254_v20 = vadd.f32 %v1253_v13, %v4025_v21  ;;  %v1285_v36 = vadd.f32 %v1284_v11, %v4026_v55  ;;  %v4027_v51 = vld [vmem:[#allocation230_spill] sm:$0xff]  ;;  %v4028_v56 = vld [vmem:[#allocation231_spill] sm:$0xff]  ;;  %1356 = vst [vmem:[#allocation7] sm:$0xff] %v1130_v24 }
 0x1df   :  { %v1316_v9 = vadd.f32 %v1315_v41, %v4027_v51  ;;  %v1347_v34 = vadd.f32 %v1346_v28, %v4028_v56  ;;  %1357 = vst [vmem:[#allocation7 + $0x8] sm:$0xff] %v1161_v48 }
 0x1e0   :  { %1358 = vst [vmem:[#allocation7 + $0x10] sm:$0xff] %v1192_v7 }
 0x1e1   :  { %1359 = vst [vmem:[#allocation7 + $0x18] sm:$0xff] %v1223_v29 }
 0x1e2   :  { %1360 = vst [vmem:[#allocation7 + $0x20] sm:$0xff] %v1254_v20 }
 0x1e3   :  { %1361 = vst [vmem:[#allocation7 + $0x28] sm:$0xff] %v1285_v36 }
 0x1e4   :  { %1362 = vst [vmem:[#allocation7 + $0x30] sm:$0xff] %v1316_v9 }
 0x1e5   :  { %1363 = vst [vmem:[#allocation7 + $0x38] sm:$0xff] %v1347_v34 }
 0x1e6   :  { %1376 = dma.vmem_to_hbm [thread:$0]  %s1369_s1, 1024, %s1371_s23, [#allocation4], %s1469_s17, %s1469_s17, %s1470_s18  }
 0x1e7   :  { %1466 = dma.done.wait [#allocation4], 1024  }
 0x1e8   :  { %1467 = vsyncadd [#allocation4], 4294966272 }
 0x1e9   :  { %1381 = vsyncpa [#allocation3], 1 }
 0x1ea   :  { %1382 = vsyncpa [#allocation6], 1 }
 0x1eb   :  { %1383 = vsyncpa [#allocation4], 1 }

</bundles_post_ra>
